<compile_context>
chip_gen: v7x
topology: tpu7x:2x2x1
jax: 0.10.0
libtpu: 0.0.40
codegen_flags: <defaults>
</compile_context>

<pallas_src>
import jax
import jax.numpy as jnp
from jax.experimental import pallas as pl
from jax.experimental.pallas import tpu as pltpu


# Architecture constants fixed by the PyTorch module spec.
C_IN = 20
C0 = 50                        # conv_transpose_0: 20->50, k=1, stride=1, pad=0
C1, K1, S1, P1 = 10, 2, 3, 1   # conv_transpose_1: 50->10, k=2, stride=3, pad=1
C2, K2, S2, P2 = 5, 4, 4, 2    # conv_transpose_2: 10->5,  k=4, stride=4, pad=2
KO1 = K1 ** 3                  # 8 conv1 kernel offsets
N2 = C2 * K2 ** 3              # 320 conv2 columns (c2, md, mh, mw)


def _round_up(v, m):
    return ((v + m - 1) // m) * m


N2P = _round_up(N2, 128)       # 384: lane-aligned per-offset chunk
N_OUT = KO1 * N2P              # 3072 = 24*128: lane-dense output slab width


def _silu(x):
    # x * sigmoid(x) with a single transcendental (EUP) per element.
    return 0.5 * x * (jnp.tanh(0.5 * x) + 1.0)


# ---------------------------------------------------------------------------
# The fused Pallas kernel
# ---------------------------------------------------------------------------
def _fused_kernel(x_ref, w0_ref, b0_ref, w1_ref, b1_ref, w2_ref, b2_ref, o_ref):
    # conv0 (1x1x1) + SiLU : (bm, 20) @ (20, 50)
    h0 = jnp.dot(x_ref[...], w0_ref[...], preferred_element_type=jnp.float32)
    h0 = _silu(h0 + b0_ref[...])
    # For each conv1 kernel offset k = kd*4 + kh*2 + kw:
    #   v4 tap  = h0 @ W1_k + b1            (bm, 10)
    #   v6      = silu(v4)
    #   chunk k = silu(v6 @ W2_flat + b2)   (bm, 384)  -> lane-aligned store
    for k in range(KO1):
        y1k = jnp.dot(h0, w1_ref[k], preferred_element_type=jnp.float32)
        v6k = _silu(y1k + b1_ref[...])
        y2k = jnp.dot(v6k, w2_ref[...], preferred_element_type=jnp.float32)
        o_ref[:, k * N2P:(k + 1) * N2P] = _silu(y2k + b2_ref[...])


def _fused_call(x_rows, prep, *, block_m=512):
    M, _ = x_rows.shape
    # Largest row tile that fits comfortably in VMEM (out tile = bm*3072*4B);
    # keep the grid at >= 2 steps so both v7x TensorCores get work (costs one
    # extra ~0.35us grid step on single-TC v5e/v6e).
    bm = min(block_m, max(8, _round_up(pl.cdiv(M, 2), 8)))
    grid = (pl.cdiv(M, bm),)
    weights = (prep["w0"], prep["b0"], prep["w1"], prep["b1"],
               prep["w2"], prep["b2"])
    in_specs = [pl.BlockSpec((bm, C_IN), lambda i: (i, 0))]
    for w in weights:
        in_specs.append(pl.BlockSpec(w.shape, lambda i, _nd=w.ndim: (0,) * _nd))
    return pl.pallas_call(
        _fused_kernel,
        out_shape=jax.ShapeDtypeStruct((M, N_OUT), jnp.float32),
        grid=grid,
        in_specs=in_specs,
        out_specs=pl.BlockSpec((bm, N_OUT), lambda i: (i, 0)),
        compiler_params=pltpu.CompilerParams(
            dimension_semantics=("parallel",),
            vmem_limit_bytes=32 * 1024 * 1024),
    )(x_rows, *weights)


# ---------------------------------------------------------------------------
# Parameter preparation (hoisted out of the forward path)
# ---------------------------------------------------------------------------
def prepare_params(params):
    (w0, b0), (w1, b1), (w2, b2) = params
    f32 = jnp.float32
    w0_2d = w0.reshape(C_IN, C0).astype(f32)                       # (20, 50)
    b0_r = b0.reshape(1, C0).astype(f32)
    # conv1 weight: one (C0, C1) matrix per kernel offset k = kd*4 + kh*2 + kw
    w1_k = jnp.transpose(w1.astype(f32), (2, 3, 4, 0, 1)).reshape(KO1, C0, C1)
    b1_r = b1.reshape(1, C1).astype(f32)
    # conv2 weight flattened over (c2, md, mh, mw), zero-padded to 384 columns
    w2_2d = w2.reshape(C1, N2).astype(f32)                         # (10, 320)
    b2_c = jnp.repeat(b2.astype(f32), K2 ** 3)                     # (320,)
    w2_p = jnp.pad(w2_2d, ((0, 0), (0, N2P - N2)))
    b2_p = jnp.pad(b2_c, (0, N2P - N2)).reshape(1, N2P)
    # Final v9 value of v4 sites that receive only the conv1 bias (uncovered):
    const_row = _silu(_silu(b1.astype(f32)) @ w2_2d + b2_c)        # (320,)
    const_blk = const_row.reshape(C2, K2, K2, K2)                  # (c2,md,mh,mw)
    return {"w0": w0_2d, "b0": b0_r, "w1": w1_k, "b1": b1_r,
            "w2": w2_p, "b2": b2_p, "const": const_blk}


# ---------------------------------------------------------------------------
# Forward pass (jit-compatible; all shape math is static)
# ---------------------------------------------------------------------------
def model_forward(x, prep):
    N, _, D, H, W = x.shape
    M = N * D * H * W
    D1 = (D - 1) * S1 + K1 - 2 * P1
    H1 = (H - 1) * S1 + K1 - 2 * P1
    W1 = (W - 1) * S1 + K1 - 2 * P1
    D2 = (D1 - 1) * S2 + K2 - 2 * P2
    H2 = (H1 - 1) * S2 + K2 - 2 * P2
    W2 = (W1 - 1) * S2 + K2 - 2 * P2

    # NCDHW -> one channels row per input voxel.
    x_rows = jnp.transpose(x, (0, 2, 3, 4, 1)).reshape(M, C_IN)

    # All three convs + SiLUs in one Pallas kernel.
    y = _fused_call(x_rows, prep)                                  # (M, 8*384)

    # (M, 8*384) -> (n, d, h, w, kd, kh, kw, c2, md, mh, mw)
    y = y.reshape(N, D, H, W, K1, K1, K1, N2P)[..., :N2]
    y = y.reshape(N, D, H, W, K1, K1, K1, C2, K2, K2, K2)
    # -> (n, c2, d, kd, md, h, kh, mh, w, kw, mw): channels-first placement order
    y = jnp.transpose(y, (0, 7, 1, 4, 8, 2, 5, 9, 3, 6, 10))

    # Expanded pre-crop grid: per spatial axis (input idx, conv1 offset in {0,1,2},
    # conv2 offset in {0..3}).  Offset 2 of the conv1 axis means "bias-only v4
    # site" -> fill those with the precomputed constant row, then overwrite the
    # covered (offsets 0,1) region with the kernel output.  Stride >= kernel for
    # both layers makes this placement exact (non-overlapping, each output
    # position covered at most once).
    grid_shape = (N, C2, D, S1, K2, H, S1, K2, W, S1, K2)
    e = jnp.broadcast_to(
        prep["const"].reshape(1, C2, 1, 1, K2, 1, 1, K2, 1, 1, K2), grid_shape)
    e = e.at[:, :, :, :K1, :, :, :K1, :, :, :K1, :].set(y)

    e = e.reshape(N, C2, S1 * K2 * D, S1 * K2 * H, S1 * K2 * W)
    off = S2 * P1 + P2          # combined crop offset of the two paddings
    return e[:, :, off:off + D2, off:off + H2, off:off + W2]


# ---------------------------------------------------------------------------
# Plain-XLA reference (PyTorch ConvTranspose3d semantics) for validation
# ---------------------------------------------------------------------------
def _conv_transpose3d_ref(x, w, b, stride, padding):
    k = w.shape[2]
    w_t = jnp.transpose(jnp.flip(w, axis=(2, 3, 4)), (1, 0, 2, 3, 4))
    pad = k - 1 - padding
    y = jax.lax.conv_general_dilated(
        x, w_t, window_strides=(1, 1, 1), padding=[(pad, pad)] * 3,
        lhs_dilation=(stride, stride, stride),
        dimension_numbers=("NCDHW", "OIDHW", "NCDHW"),
        precision=jax.lax.Precision.HIGHEST)
    return y + b.reshape(1, -1, 1, 1, 1)


def model_reference(x, params):
    (w0, b0), (w1, b1), (w2, b2) = params
    v1 = _conv_transpose3d_ref(x, w0, b0, 1, 0)
    v3 = v1 * jax.nn.sigmoid(v1)
    v4 = _conv_transpose3d_ref(v3, w1, b1, S1, P1)
    v6 = v4 * jax.nn.sigmoid(v4)
    v7 = _conv_transpose3d_ref(v6, w2, b2, S2, P2)
    return v7 * jax.nn.sigmoid(v7)


# ---------------------------------------------------------------------------
# Deterministic parameter init (PyTorch-style uniform bounds)
# ---------------------------------------------------------------------------
def init_params(key):
    keys = jax.random.split(key, 6)

    def uni(k, shape, fan_in):
        bound = 1.0 / (fan_in ** 0.5)
        return jax.random.uniform(k, shape, jnp.float32, -bound, bound)

    w0 = uni(keys[0], (C_IN, C0, 1, 1, 1), C_IN)
    b0 = uni(keys[1], (C0,), C_IN)
    w1 = uni(keys[2], (C0, C1, K1, K1, K1), C0 * K1 ** 3)
    b1 = uni(keys[3], (C1,), C0 * K1 ** 3)
    w2 = uni(keys[4], (C1, C2, K2, K2, K2), C1 * K2 ** 3)
    b2 = uni(keys[5], (C2,), C1 * K2 ** 3)
    return ((w0, b0), (w1, b1), (w2, b2))


if __name__ == "__main__":
    key = jax.random.PRNGKey(0)
    k_x, k_p = jax.random.split(key)

    # Small, non-cubic shapes consistent with the module (Cin = 20 fixed).
    x = jax.random.normal(k_x, (1, C_IN, 6, 5, 4), jnp.float32)
    params = init_params(k_p)
    prep = prepare_params(params)          # weight reshapes hoisted out

    fwd = jax.jit(model_forward)
    out = jax.block_until_ready(fwd(x, prep))

    # spatial: 6 -> 15 -> 56, 5 -> 12 -> 44, 4 -> 9 -> 32
    assert out.shape == (1, C2, 56, 44, 32), out.shape
    assert bool(jnp.all(jnp.isfinite(out)))

    # Validate against a plain-XLA conv_transpose reference (same f32 math).
    ref = jax.block_until_ready(jax.jit(model_reference)(x, params))
    max_err = float(jnp.max(jnp.abs(out - ref)))
    tol = 1e-2 * (1.0 + float(jnp.max(jnp.abs(ref))))
    assert max_err <= tol, (max_err, tol)
    print("KERNEL_OK")
</pallas_src>

<mosaic_0001>
module attributes {stable_mosaic.version = 11 : i64} {
  func.func @_fused_kernel(%arg0: i32, %arg1: memref<64x20xf32, #tpu.memory_space<vmem>>, %arg2: memref<20x50xf32, #tpu.memory_space<vmem>>, %arg3: memref<1x50xf32, #tpu.memory_space<vmem>>, %arg4: memref<8x50x10xf32, #tpu.memory_space<vmem>>, %arg5: memref<1x10xf32, #tpu.memory_space<vmem>>, %arg6: memref<10x384xf32, #tpu.memory_space<vmem>>, %arg7: memref<1x384xf32, #tpu.memory_space<vmem>>, %arg8: memref<64x3072xf32, #tpu.memory_space<vmem>>) attributes {dimension_semantics = [#tpu.dimension_semantics<parallel>], iteration_bounds = array<i64: 2>, scalar_prefetch = 0 : i64, scratch_operands = 0 : i64, tpu.core_type = #tpu.core_type<tc>, window_params = [{transform_indices = @transform_0, window_bounds = array<i64: 64, 20>}, {pipeline_mode = #tpu.pipeline_mode<synchronous>, transform_indices = @transform_1, window_bounds = array<i64: 20, 50>}, {pipeline_mode = #tpu.pipeline_mode<synchronous>, transform_indices = @transform_2, window_bounds = array<i64: 1, 50>}, {pipeline_mode = #tpu.pipeline_mode<synchronous>, transform_indices = @transform_3, window_bounds = array<i64: 8, 50, 10>}, {pipeline_mode = #tpu.pipeline_mode<synchronous>, transform_indices = @transform_4, window_bounds = array<i64: 1, 10>}, {pipeline_mode = #tpu.pipeline_mode<synchronous>, transform_indices = @transform_5, window_bounds = array<i64: 10, 384>}, {pipeline_mode = #tpu.pipeline_mode<synchronous>, transform_indices = @transform_6, window_bounds = array<i64: 1, 384>}, {transform_indices = @transform_7, window_bounds = array<i64: 64, 3072>}]} {
    %c0 = arith.constant 0 : index
    %c0_0 = arith.constant 0 : index
    %0 = vector.load %arg1[%c0, %c0_0] : memref<64x20xf32, #tpu.memory_space<vmem>>, vector<64x20xf32>
    %c0_1 = arith.constant 0 : index
    %c0_2 = arith.constant 0 : index
    %1 = vector.load %arg2[%c0_1, %c0_2] : memref<20x50xf32, #tpu.memory_space<vmem>>, vector<20x50xf32>
    %cst = arith.constant dense<0.000000e+00> : vector<64x50xf32>
    %2 = tpu.matmul %0, %1, %cst {dimension_numbers = #tpu.dot_dimension_numbers<[1], [0], [0], [1], [0, 0, 1, 1], [], []>} : vector<64x20xf32>, vector<20x50xf32>, vector<64x50xf32> -> vector<64x50xf32>
    %c0_3 = arith.constant 0 : index
    %c0_4 = arith.constant 0 : index
    %3 = vector.load %arg3[%c0_3, %c0_4] : memref<1x50xf32, #tpu.memory_space<vmem>>, vector<1x50xf32>
    %4 = vector.broadcast %3 : vector<1x50xf32> to vector<64x50xf32>
    %5 = arith.addf %2, %4 : vector<64x50xf32>
    %cst_5 = arith.constant 5.000000e-01 : f32
    %6 = vector.broadcast %cst_5 : f32 to vector<64x50xf32>
    %7 = arith.mulf %6, %5 : vector<64x50xf32>
    %cst_6 = arith.constant 5.000000e-01 : f32
    %8 = vector.broadcast %cst_6 : f32 to vector<64x50xf32>
    %9 = arith.mulf %8, %5 : vector<64x50xf32>
    %10 = math.tanh %9 : vector<64x50xf32>
    %cst_7 = arith.constant 1.000000e+00 : f32
    %11 = vector.broadcast %cst_7 : f32 to vector<64x50xf32>
    %12 = arith.addf %10, %11 : vector<64x50xf32>
    %13 = arith.mulf %7, %12 : vector<64x50xf32>
    %c0_8 = arith.constant 0 : index
    %c0_9 = arith.constant 0 : index
    %c0_10 = arith.constant 0 : index
    %14 = vector.load %arg4[%c0_8, %c0_9, %c0_10] : memref<8x50x10xf32, #tpu.memory_space<vmem>>, vector<1x50x10xf32>
    %15 = vector.shape_cast %14 : vector<1x50x10xf32> to vector<50x10xf32>
    %cst_11 = arith.constant dense<0.000000e+00> : vector<64x10xf32>
    %16 = tpu.matmul %13, %15, %cst_11 {dimension_numbers = #tpu.dot_dimension_numbers<[1], [0], [0], [1], [0, 0, 1, 1], [], []>} : vector<64x50xf32>, vector<50x10xf32>, vector<64x10xf32> -> vector<64x10xf32>
    %c0_12 = arith.constant 0 : index
    %c0_13 = arith.constant 0 : index
    %17 = vector.load %arg5[%c0_12, %c0_13] : memref<1x10xf32, #tpu.memory_space<vmem>>, vector<1x10xf32>
    %18 = vector.broadcast %17 : vector<1x10xf32> to vector<64x10xf32>
    %19 = arith.addf %16, %18 : vector<64x10xf32>
    %cst_14 = arith.constant 5.000000e-01 : f32
    %20 = vector.broadcast %cst_14 : f32 to vector<64x10xf32>
    %21 = arith.mulf %20, %19 : vector<64x10xf32>
    %cst_15 = arith.constant 5.000000e-01 : f32
    %22 = vector.broadcast %cst_15 : f32 to vector<64x10xf32>
    %23 = arith.mulf %22, %19 : vector<64x10xf32>
    %24 = math.tanh %23 : vector<64x10xf32>
    %cst_16 = arith.constant 1.000000e+00 : f32
    %25 = vector.broadcast %cst_16 : f32 to vector<64x10xf32>
    %26 = arith.addf %24, %25 : vector<64x10xf32>
    %27 = arith.mulf %21, %26 : vector<64x10xf32>
    %c0_17 = arith.constant 0 : index
    %c0_18 = arith.constant 0 : index
    %28 = vector.load %arg6[%c0_17, %c0_18] : memref<10x384xf32, #tpu.memory_space<vmem>>, vector<10x384xf32>
    %cst_19 = arith.constant dense<0.000000e+00> : vector<64x384xf32>
    %29 = tpu.matmul %27, %28, %cst_19 {dimension_numbers = #tpu.dot_dimension_numbers<[1], [0], [0], [1], [0, 0, 1, 1], [], []>} : vector<64x10xf32>, vector<10x384xf32>, vector<64x384xf32> -> vector<64x384xf32>
    %c0_20 = arith.constant 0 : index
    %c0_21 = arith.constant 0 : index
    %30 = vector.load %arg7[%c0_20, %c0_21] : memref<1x384xf32, #tpu.memory_space<vmem>>, vector<1x384xf32>
    %31 = vector.broadcast %30 : vector<1x384xf32> to vector<64x384xf32>
    %32 = arith.addf %29, %31 : vector<64x384xf32>
    %cst_22 = arith.constant 5.000000e-01 : f32
    %33 = vector.broadcast %cst_22 : f32 to vector<64x384xf32>
    %34 = arith.mulf %33, %32 : vector<64x384xf32>
    %cst_23 = arith.constant 5.000000e-01 : f32
    %35 = vector.broadcast %cst_23 : f32 to vector<64x384xf32>
    %36 = arith.mulf %35, %32 : vector<64x384xf32>
    %37 = math.tanh %36 : vector<64x384xf32>
    %cst_24 = arith.constant 1.000000e+00 : f32
    %38 = vector.broadcast %cst_24 : f32 to vector<64x384xf32>
    %39 = arith.addf %37, %38 : vector<64x384xf32>
    %40 = arith.mulf %34, %39 : vector<64x384xf32>
    %c0_25 = arith.constant 0 : index
    %c0_26 = arith.constant 0 : index
    %41 = vector.load %arg8[%c0_25, %c0_26] : memref<64x3072xf32, #tpu.memory_space<vmem>>, vector<64x384xf32>
    tpu.vector_store %arg8[%c0_25, %c0_26], %40 {strides = array<i32>} : memref<64x3072xf32, #tpu.memory_space<vmem>>, vector<64x384xf32>,
    %c1 = arith.constant 1 : index
    %c0_27 = arith.constant 0 : index
    %c0_28 = arith.constant 0 : index
    %42 = vector.load %arg4[%c1, %c0_27, %c0_28] : memref<8x50x10xf32, #tpu.memory_space<vmem>>, vector<1x50x10xf32>
    %43 = vector.shape_cast %42 : vector<1x50x10xf32> to vector<50x10xf32>
    %cst_29 = arith.constant dense<0.000000e+00> : vector<64x10xf32>
    %44 = tpu.matmul %13, %43, %cst_29 {dimension_numbers = #tpu.dot_dimension_numbers<[1], [0], [0], [1], [0, 0, 1, 1], [], []>} : vector<64x50xf32>, vector<50x10xf32>, vector<64x10xf32> -> vector<64x10xf32>
    %c0_30 = arith.constant 0 : index
    %c0_31 = arith.constant 0 : index
    %45 = vector.load %arg5[%c0_30, %c0_31] : memref<1x10xf32, #tpu.memory_space<vmem>>, vector<1x10xf32>
    %46 = vector.broadcast %45 : vector<1x10xf32> to vector<64x10xf32>
    %47 = arith.addf %44, %46 : vector<64x10xf32>
    %cst_32 = arith.constant 5.000000e-01 : f32
    %48 = vector.broadcast %cst_32 : f32 to vector<64x10xf32>
    %49 = arith.mulf %48, %47 : vector<64x10xf32>
    %cst_33 = arith.constant 5.000000e-01 : f32
    %50 = vector.broadcast %cst_33 : f32 to vector<64x10xf32>
    %51 = arith.mulf %50, %47 : vector<64x10xf32>
    %52 = math.tanh %51 : vector<64x10xf32>
    %cst_34 = arith.constant 1.000000e+00 : f32
    %53 = vector.broadcast %cst_34 : f32 to vector<64x10xf32>
    %54 = arith.addf %52, %53 : vector<64x10xf32>
    %55 = arith.mulf %49, %54 : vector<64x10xf32>
    %c0_35 = arith.constant 0 : index
    %c0_36 = arith.constant 0 : index
    %56 = vector.load %arg6[%c0_35, %c0_36] : memref<10x384xf32, #tpu.memory_space<vmem>>, vector<10x384xf32>
    %cst_37 = arith.constant dense<0.000000e+00> : vector<64x384xf32>
    %57 = tpu.matmul %55, %56, %cst_37 {dimension_numbers = #tpu.dot_dimension_numbers<[1], [0], [0], [1], [0, 0, 1, 1], [], []>} : vector<64x10xf32>, vector<10x384xf32>, vector<64x384xf32> -> vector<64x384xf32>
    %c0_38 = arith.constant 0 : index
    %c0_39 = arith.constant 0 : index
    %58 = vector.load %arg7[%c0_38, %c0_39] : memref<1x384xf32, #tpu.memory_space<vmem>>, vector<1x384xf32>
    %59 = vector.broadcast %58 : vector<1x384xf32> to vector<64x384xf32>
    %60 = arith.addf %57, %59 : vector<64x384xf32>
    %cst_40 = arith.constant 5.000000e-01 : f32
    %61 = vector.broadcast %cst_40 : f32 to vector<64x384xf32>
    %62 = arith.mulf %61, %60 : vector<64x384xf32>
    %cst_41 = arith.constant 5.000000e-01 : f32
    %63 = vector.broadcast %cst_41 : f32 to vector<64x384xf32>
    %64 = arith.mulf %63, %60 : vector<64x384xf32>
    %65 = math.tanh %64 : vector<64x384xf32>
    %cst_42 = arith.constant 1.000000e+00 : f32
    %66 = vector.broadcast %cst_42 : f32 to vector<64x384xf32>
    %67 = arith.addf %65, %66 : vector<64x384xf32>
    %68 = arith.mulf %62, %67 : vector<64x384xf32>
    %c0_43 = arith.constant 0 : index
    %c384 = arith.constant 384 : index
    %69 = vector.load %arg8[%c0_43, %c384] : memref<64x3072xf32, #tpu.memory_space<vmem>>, vector<64x384xf32>
    tpu.vector_store %arg8[%c0_43, %c384], %68 {strides = array<i32>} : memref<64x3072xf32, #tpu.memory_space<vmem>>, vector<64x384xf32>,
    %c2 = arith.constant 2 : index
    %c0_44 = arith.constant 0 : index
    %c0_45 = arith.constant 0 : index
    %70 = vector.load %arg4[%c2, %c0_44, %c0_45] : memref<8x50x10xf32, #tpu.memory_space<vmem>>, vector<1x50x10xf32>
    %71 = vector.shape_cast %70 : vector<1x50x10xf32> to vector<50x10xf32>
    %cst_46 = arith.constant dense<0.000000e+00> : vector<64x10xf32>
    %72 = tpu.matmul %13, %71, %cst_46 {dimension_numbers = #tpu.dot_dimension_numbers<[1], [0], [0], [1], [0, 0, 1, 1], [], []>} : vector<64x50xf32>, vector<50x10xf32>, vector<64x10xf32> -> vector<64x10xf32>
    %c0_47 = arith.constant 0 : index
    %c0_48 = arith.constant 0 : index
    %73 = vector.load %arg5[%c0_47, %c0_48] : memref<1x10xf32, #tpu.memory_space<vmem>>, vector<1x10xf32>
    %74 = vector.broadcast %73 : vector<1x10xf32> to vector<64x10xf32>
    %75 = arith.addf %72, %74 : vector<64x10xf32>
    %cst_49 = arith.constant 5.000000e-01 : f32
    %76 = vector.broadcast %cst_49 : f32 to vector<64x10xf32>
    %77 = arith.mulf %76, %75 : vector<64x10xf32>
    %cst_50 = arith.constant 5.000000e-01 : f32
    %78 = vector.broadcast %cst_50 : f32 to vector<64x10xf32>
    %79 = arith.mulf %78, %75 : vector<64x10xf32>
    %80 = math.tanh %79 : vector<64x10xf32>
    %cst_51 = arith.constant 1.000000e+00 : f32
    %81 = vector.broadcast %cst_51 : f32 to vector<64x10xf32>
    %82 = arith.addf %80, %81 : vector<64x10xf32>
    %83 = arith.mulf %77, %82 : vector<64x10xf32>
    %c0_52 = arith.constant 0 : index
    %c0_53 = arith.constant 0 : index
    %84 = vector.load %arg6[%c0_52, %c0_53] : memref<10x384xf32, #tpu.memory_space<vmem>>, vector<10x384xf32>
    %cst_54 = arith.constant dense<0.000000e+00> : vector<64x384xf32>
    %85 = tpu.matmul %83, %84, %cst_54 {dimension_numbers = #tpu.dot_dimension_numbers<[1], [0], [0], [1], [0, 0, 1, 1], [], []>} : vector<64x10xf32>, vector<10x384xf32>, vector<64x384xf32> -> vector<64x384xf32>
    %c0_55 = arith.constant 0 : index
    %c0_56 = arith.constant 0 : index
    %86 = vector.load %arg7[%c0_55, %c0_56] : memref<1x384xf32, #tpu.memory_space<vmem>>, vector<1x384xf32>
    %87 = vector.broadcast %86 : vector<1x384xf32> to vector<64x384xf32>
    %88 = arith.addf %85, %87 : vector<64x384xf32>
    %cst_57 = arith.constant 5.000000e-01 : f32
    %89 = vector.broadcast %cst_57 : f32 to vector<64x384xf32>
    %90 = arith.mulf %89, %88 : vector<64x384xf32>
    %cst_58 = arith.constant 5.000000e-01 : f32
    %91 = vector.broadcast %cst_58 : f32 to vector<64x384xf32>
    %92 = arith.mulf %91, %88 : vector<64x384xf32>
    %93 = math.tanh %92 : vector<64x384xf32>
    %cst_59 = arith.constant 1.000000e+00 : f32
    %94 = vector.broadcast %cst_59 : f32 to vector<64x384xf32>
    %95 = arith.addf %93, %94 : vector<64x384xf32>
    %96 = arith.mulf %90, %95 : vector<64x384xf32>
    %c0_60 = arith.constant 0 : index
    %c768 = arith.constant 768 : index
    %97 = vector.load %arg8[%c0_60, %c768] : memref<64x3072xf32, #tpu.memory_space<vmem>>, vector<64x384xf32>
    tpu.vector_store %arg8[%c0_60, %c768], %96 {strides = array<i32>} : memref<64x3072xf32, #tpu.memory_space<vmem>>, vector<64x384xf32>,
    %c3 = arith.constant 3 : index
    %c0_61 = arith.constant 0 : index
    %c0_62 = arith.constant 0 : index
    %98 = vector.load %arg4[%c3, %c0_61, %c0_62] : memref<8x50x10xf32, #tpu.memory_space<vmem>>, vector<1x50x10xf32>
    %99 = vector.shape_cast %98 : vector<1x50x10xf32> to vector<50x10xf32>
    %cst_63 = arith.constant dense<0.000000e+00> : vector<64x10xf32>
    %100 = tpu.matmul %13, %99, %cst_63 {dimension_numbers = #tpu.dot_dimension_numbers<[1], [0], [0], [1], [0, 0, 1, 1], [], []>} : vector<64x50xf32>, vector<50x10xf32>, vector<64x10xf32> -> vector<64x10xf32>
    %c0_64 = arith.constant 0 : index
    %c0_65 = arith.constant 0 : index
    %101 = vector.load %arg5[%c0_64, %c0_65] : memref<1x10xf32, #tpu.memory_space<vmem>>, vector<1x10xf32>
    %102 = vector.broadcast %101 : vector<1x10xf32> to vector<64x10xf32>
    %103 = arith.addf %100, %102 : vector<64x10xf32>
    %cst_66 = arith.constant 5.000000e-01 : f32
    %104 = vector.broadcast %cst_66 : f32 to vector<64x10xf32>
    %105 = arith.mulf %104, %103 : vector<64x10xf32>
    %cst_67 = arith.constant 5.000000e-01 : f32
    %106 = vector.broadcast %cst_67 : f32 to vector<64x10xf32>
    %107 = arith.mulf %106, %103 : vector<64x10xf32>
    %108 = math.tanh %107 : vector<64x10xf32>
    %cst_68 = arith.constant 1.000000e+00 : f32
    %109 = vector.broadcast %cst_68 : f32 to vector<64x10xf32>
    %110 = arith.addf %108, %109 : vector<64x10xf32>
    %111 = arith.mulf %105, %110 : vector<64x10xf32>
    %c0_69 = arith.constant 0 : index
    %c0_70 = arith.constant 0 : index
    %112 = vector.load %arg6[%c0_69, %c0_70] : memref<10x384xf32, #tpu.memory_space<vmem>>, vector<10x384xf32>
    %cst_71 = arith.constant dense<0.000000e+00> : vector<64x384xf32>
    %113 = tpu.matmul %111, %112, %cst_71 {dimension_numbers = #tpu.dot_dimension_numbers<[1], [0], [0], [1], [0, 0, 1, 1], [], []>} : vector<64x10xf32>, vector<10x384xf32>, vector<64x384xf32> -> vector<64x384xf32>
    %c0_72 = arith.constant 0 : index
    %c0_73 = arith.constant 0 : index
    %114 = vector.load %arg7[%c0_72, %c0_73] : memref<1x384xf32, #tpu.memory_space<vmem>>, vector<1x384xf32>
    %115 = vector.broadcast %114 : vector<1x384xf32> to vector<64x384xf32>
    %116 = arith.addf %113, %115 : vector<64x384xf32>
    %cst_74 = arith.constant 5.000000e-01 : f32
    %117 = vector.broadcast %cst_74 : f32 to vector<64x384xf32>
    %118 = arith.mulf %117, %116 : vector<64x384xf32>
    %cst_75 = arith.constant 5.000000e-01 : f32
    %119 = vector.broadcast %cst_75 : f32 to vector<64x384xf32>
    %120 = arith.mulf %119, %116 : vector<64x384xf32>
    %121 = math.tanh %120 : vector<64x384xf32>
    %cst_76 = arith.constant 1.000000e+00 : f32
    %122 = vector.broadcast %cst_76 : f32 to vector<64x384xf32>
    %123 = arith.addf %121, %122 : vector<64x384xf32>
    %124 = arith.mulf %118, %123 : vector<64x384xf32>
    %c0_77 = arith.constant 0 : index
    %c1152 = arith.constant 1152 : index
    %125 = vector.load %arg8[%c0_77, %c1152] : memref<64x3072xf32, #tpu.memory_space<vmem>>, vector<64x384xf32>
    tpu.vector_store %arg8[%c0_77, %c1152], %124 {strides = array<i32>} : memref<64x3072xf32, #tpu.memory_space<vmem>>, vector<64x384xf32>,
    %c4 = arith.constant 4 : index
    %c0_78 = arith.constant 0 : index
    %c0_79 = arith.constant 0 : index
    %126 = vector.load %arg4[%c4, %c0_78, %c0_79] : memref<8x50x10xf32, #tpu.memory_space<vmem>>, vector<1x50x10xf32>
    %127 = vector.shape_cast %126 : vector<1x50x10xf32> to vector<50x10xf32>
    %cst_80 = arith.constant dense<0.000000e+00> : vector<64x10xf32>
    %128 = tpu.matmul %13, %127, %cst_80 {dimension_numbers = #tpu.dot_dimension_numbers<[1], [0], [0], [1], [0, 0, 1, 1], [], []>} : vector<64x50xf32>, vector<50x10xf32>, vector<64x10xf32> -> vector<64x10xf32>
    %c0_81 = arith.constant 0 : index
    %c0_82 = arith.constant 0 : index
    %129 = vector.load %arg5[%c0_81, %c0_82] : memref<1x10xf32, #tpu.memory_space<vmem>>, vector<1x10xf32>
    %130 = vector.broadcast %129 : vector<1x10xf32> to vector<64x10xf32>
    %131 = arith.addf %128, %130 : vector<64x10xf32>
    %cst_83 = arith.constant 5.000000e-01 : f32
    %132 = vector.broadcast %cst_83 : f32 to vector<64x10xf32>
    %133 = arith.mulf %132, %131 : vector<64x10xf32>
    %cst_84 = arith.constant 5.000000e-01 : f32
    %134 = vector.broadcast %cst_84 : f32 to vector<64x10xf32>
    %135 = arith.mulf %134, %131 : vector<64x10xf32>
    %136 = math.tanh %135 : vector<64x10xf32>
    %cst_85 = arith.constant 1.000000e+00 : f32
    %137 = vector.broadcast %cst_85 : f32 to vector<64x10xf32>
    %138 = arith.addf %136, %137 : vector<64x10xf32>
    %139 = arith.mulf %133, %138 : vector<64x10xf32>
    %c0_86 = arith.constant 0 : index
    %c0_87 = arith.constant 0 : index
    %140 = vector.load %arg6[%c0_86, %c0_87] : memref<10x384xf32, #tpu.memory_space<vmem>>, vector<10x384xf32>
    %cst_88 = arith.constant dense<0.000000e+00> : vector<64x384xf32>
    %141 = tpu.matmul %139, %140, %cst_88 {dimension_numbers = #tpu.dot_dimension_numbers<[1], [0], [0], [1], [0, 0, 1, 1], [], []>} : vector<64x10xf32>, vector<10x384xf32>, vector<64x384xf32> -> vector<64x384xf32>
    %c0_89 = arith.constant 0 : index
    %c0_90 = arith.constant 0 : index
    %142 = vector.load %arg7[%c0_89, %c0_90] : memref<1x384xf32, #tpu.memory_space<vmem>>, vector<1x384xf32>
    %143 = vector.broadcast %142 : vector<1x384xf32> to vector<64x384xf32>
    %144 = arith.addf %141, %143 : vector<64x384xf32>
    %cst_91 = arith.constant 5.000000e-01 : f32
    %145 = vector.broadcast %cst_91 : f32 to vector<64x384xf32>
    %146 = arith.mulf %145, %144 : vector<64x384xf32>
    %cst_92 = arith.constant 5.000000e-01 : f32
    %147 = vector.broadcast %cst_92 : f32 to vector<64x384xf32>
    %148 = arith.mulf %147, %144 : vector<64x384xf32>
    %149 = math.tanh %148 : vector<64x384xf32>
    %cst_93 = arith.constant 1.000000e+00 : f32
    %150 = vector.broadcast %cst_93 : f32 to vector<64x384xf32>
    %151 = arith.addf %149, %150 : vector<64x384xf32>
    %152 = arith.mulf %146, %151 : vector<64x384xf32>
    %c0_94 = arith.constant 0 : index
    %c1536 = arith.constant 1536 : index
    %153 = vector.load %arg8[%c0_94, %c1536] : memref<64x3072xf32, #tpu.memory_space<vmem>>, vector<64x384xf32>
    tpu.vector_store %arg8[%c0_94, %c1536], %152 {strides = array<i32>} : memref<64x3072xf32, #tpu.memory_space<vmem>>, vector<64x384xf32>,
    %c5 = arith.constant 5 : index
    %c0_95 = arith.constant 0 : index
    %c0_96 = arith.constant 0 : index
    %154 = vector.load %arg4[%c5, %c0_95, %c0_96] : memref<8x50x10xf32, #tpu.memory_space<vmem>>, vector<1x50x10xf32>
    %155 = vector.shape_cast %154 : vector<1x50x10xf32> to vector<50x10xf32>
    %cst_97 = arith.constant dense<0.000000e+00> : vector<64x10xf32>
    %156 = tpu.matmul %13, %155, %cst_97 {dimension_numbers = #tpu.dot_dimension_numbers<[1], [0], [0], [1], [0, 0, 1, 1], [], []>} : vector<64x50xf32>, vector<50x10xf32>, vector<64x10xf32> -> vector<64x10xf32>
    %c0_98 = arith.constant 0 : index
    %c0_99 = arith.constant 0 : index
    %157 = vector.load %arg5[%c0_98, %c0_99] : memref<1x10xf32, #tpu.memory_space<vmem>>, vector<1x10xf32>
    %158 = vector.broadcast %157 : vector<1x10xf32> to vector<64x10xf32>
    %159 = arith.addf %156, %158 : vector<64x10xf32>
    %cst_100 = arith.constant 5.000000e-01 : f32
    %160 = vector.broadcast %cst_100 : f32 to vector<64x10xf32>
    %161 = arith.mulf %160, %159 : vector<64x10xf32>
    %cst_101 = arith.constant 5.000000e-01 : f32
    %162 = vector.broadcast %cst_101 : f32 to vector<64x10xf32>
    %163 = arith.mulf %162, %159 : vector<64x10xf32>
    %164 = math.tanh %163 : vector<64x10xf32>
    %cst_102 = arith.constant 1.000000e+00 : f32
    %165 = vector.broadcast %cst_102 : f32 to vector<64x10xf32>
    %166 = arith.addf %164, %165 : vector<64x10xf32>
    %167 = arith.mulf %161, %166 : vector<64x10xf32>
    %c0_103 = arith.constant 0 : index
    %c0_104 = arith.constant 0 : index
    %168 = vector.load %arg6[%c0_103, %c0_104] : memref<10x384xf32, #tpu.memory_space<vmem>>, vector<10x384xf32>
    %cst_105 = arith.constant dense<0.000000e+00> : vector<64x384xf32>
    %169 = tpu.matmul %167, %168, %cst_105 {dimension_numbers = #tpu.dot_dimension_numbers<[1], [0], [0], [1], [0, 0, 1, 1], [], []>} : vector<64x10xf32>, vector<10x384xf32>, vector<64x384xf32> -> vector<64x384xf32>
    %c0_106 = arith.constant 0 : index
    %c0_107 = arith.constant 0 : index
    %170 = vector.load %arg7[%c0_106, %c0_107] : memref<1x384xf32, #tpu.memory_space<vmem>>, vector<1x384xf32>
    %171 = vector.broadcast %170 : vector<1x384xf32> to vector<64x384xf32>
    %172 = arith.addf %169, %171 : vector<64x384xf32>
    %cst_108 = arith.constant 5.000000e-01 : f32
    %173 = vector.broadcast %cst_108 : f32 to vector<64x384xf32>
    %174 = arith.mulf %173, %172 : vector<64x384xf32>
    %cst_109 = arith.constant 5.000000e-01 : f32
    %175 = vector.broadcast %cst_109 : f32 to vector<64x384xf32>
    %176 = arith.mulf %175, %172 : vector<64x384xf32>
    %177 = math.tanh %176 : vector<64x384xf32>
    %cst_110 = arith.constant 1.000000e+00 : f32
    %178 = vector.broadcast %cst_110 : f32 to vector<64x384xf32>
    %179 = arith.addf %177, %178 : vector<64x384xf32>
    %180 = arith.mulf %174, %179 : vector<64x384xf32>
    %c0_111 = arith.constant 0 : index
    %c1920 = arith.constant 1920 : index
    %181 = vector.load %arg8[%c0_111, %c1920] : memref<64x3072xf32, #tpu.memory_space<vmem>>, vector<64x384xf32>
    tpu.vector_store %arg8[%c0_111, %c1920], %180 {strides = array<i32>} : memref<64x3072xf32, #tpu.memory_space<vmem>>, vector<64x384xf32>,
    %c6 = arith.constant 6 : index
    %c0_112 = arith.constant 0 : index
    %c0_113 = arith.constant 0 : index
    %182 = vector.load %arg4[%c6, %c0_112, %c0_113] : memref<8x50x10xf32, #tpu.memory_space<vmem>>, vector<1x50x10xf32>
    %183 = vector.shape_cast %182 : vector<1x50x10xf32> to vector<50x10xf32>
    %cst_114 = arith.constant dense<0.000000e+00> : vector<64x10xf32>
    %184 = tpu.matmul %13, %183, %cst_114 {dimension_numbers = #tpu.dot_dimension_numbers<[1], [0], [0], [1], [0, 0, 1, 1], [], []>} : vector<64x50xf32>, vector<50x10xf32>, vector<64x10xf32> -> vector<64x10xf32>
    %c0_115 = arith.constant 0 : index
    %c0_116 = arith.constant 0 : index
    %185 = vector.load %arg5[%c0_115, %c0_116] : memref<1x10xf32, #tpu.memory_space<vmem>>, vector<1x10xf32>
    %186 = vector.broadcast %185 : vector<1x10xf32> to vector<64x10xf32>
    %187 = arith.addf %184, %186 : vector<64x10xf32>
    %cst_117 = arith.constant 5.000000e-01 : f32
    %188 = vector.broadcast %cst_117 : f32 to vector<64x10xf32>
    %189 = arith.mulf %188, %187 : vector<64x10xf32>
    %cst_118 = arith.constant 5.000000e-01 : f32
    %190 = vector.broadcast %cst_118 : f32 to vector<64x10xf32>
    %191 = arith.mulf %190, %187 : vector<64x10xf32>
    %192 = math.tanh %191 : vector<64x10xf32>
    %cst_119 = arith.constant 1.000000e+00 : f32
    %193 = vector.broadcast %cst_119 : f32 to vector<64x10xf32>
    %194 = arith.addf %192, %193 : vector<64x10xf32>
    %195 = arith.mulf %189, %194 : vector<64x10xf32>
    %c0_120 = arith.constant 0 : index
    %c0_121 = arith.constant 0 : index
    %196 = vector.load %arg6[%c0_120, %c0_121] : memref<10x384xf32, #tpu.memory_space<vmem>>, vector<10x384xf32>
    %cst_122 = arith.constant dense<0.000000e+00> : vector<64x384xf32>
    %197 = tpu.matmul %195, %196, %cst_122 {dimension_numbers = #tpu.dot_dimension_numbers<[1], [0], [0], [1], [0, 0, 1, 1], [], []>} : vector<64x10xf32>, vector<10x384xf32>, vector<64x384xf32> -> vector<64x384xf32>
    %c0_123 = arith.constant 0 : index
    %c0_124 = arith.constant 0 : index
    %198 = vector.load %arg7[%c0_123, %c0_124] : memref<1x384xf32, #tpu.memory_space<vmem>>, vector<1x384xf32>
    %199 = vector.broadcast %198 : vector<1x384xf32> to vector<64x384xf32>
    %200 = arith.addf %197, %199 : vector<64x384xf32>
    %cst_125 = arith.constant 5.000000e-01 : f32
    %201 = vector.broadcast %cst_125 : f32 to vector<64x384xf32>
    %202 = arith.mulf %201, %200 : vector<64x384xf32>
    %cst_126 = arith.constant 5.000000e-01 : f32
    %203 = vector.broadcast %cst_126 : f32 to vector<64x384xf32>
    %204 = arith.mulf %203, %200 : vector<64x384xf32>
    %205 = math.tanh %204 : vector<64x384xf32>
    %cst_127 = arith.constant 1.000000e+00 : f32
    %206 = vector.broadcast %cst_127 : f32 to vector<64x384xf32>
    %207 = arith.addf %205, %206 : vector<64x384xf32>
    %208 = arith.mulf %202, %207 : vector<64x384xf32>
    %c0_128 = arith.constant 0 : index
    %c2304 = arith.constant 2304 : index
    %209 = vector.load %arg8[%c0_128, %c2304] : memref<64x3072xf32, #tpu.memory_space<vmem>>, vector<64x384xf32>
    tpu.vector_store %arg8[%c0_128, %c2304], %208 {strides = array<i32>} : memref<64x3072xf32, #tpu.memory_space<vmem>>, vector<64x384xf32>,
    %c7 = arith.constant 7 : index
    %c0_129 = arith.constant 0 : index
    %c0_130 = arith.constant 0 : index
    %210 = vector.load %arg4[%c7, %c0_129, %c0_130] : memref<8x50x10xf32, #tpu.memory_space<vmem>>, vector<1x50x10xf32>
    %211 = vector.shape_cast %210 : vector<1x50x10xf32> to vector<50x10xf32>
    %cst_131 = arith.constant dense<0.000000e+00> : vector<64x10xf32>
    %212 = tpu.matmul %13, %211, %cst_131 {dimension_numbers = #tpu.dot_dimension_numbers<[1], [0], [0], [1], [0, 0, 1, 1], [], []>} : vector<64x50xf32>, vector<50x10xf32>, vector<64x10xf32> -> vector<64x10xf32>
    %c0_132 = arith.constant 0 : index
    %c0_133 = arith.constant 0 : index
    %213 = vector.load %arg5[%c0_132, %c0_133] : memref<1x10xf32, #tpu.memory_space<vmem>>, vector<1x10xf32>
    %214 = vector.broadcast %213 : vector<1x10xf32> to vector<64x10xf32>
    %215 = arith.addf %212, %214 : vector<64x10xf32>
    %cst_134 = arith.constant 5.000000e-01 : f32
    %216 = vector.broadcast %cst_134 : f32 to vector<64x10xf32>
    %217 = arith.mulf %216, %215 : vector<64x10xf32>
    %cst_135 = arith.constant 5.000000e-01 : f32
    %218 = vector.broadcast %cst_135 : f32 to vector<64x10xf32>
    %219 = arith.mulf %218, %215 : vector<64x10xf32>
    %220 = math.tanh %219 : vector<64x10xf32>
    %cst_136 = arith.constant 1.000000e+00 : f32
    %221 = vector.broadcast %cst_136 : f32 to vector<64x10xf32>
    %222 = arith.addf %220, %221 : vector<64x10xf32>
    %223 = arith.mulf %217, %222 : vector<64x10xf32>
    %c0_137 = arith.constant 0 : index
    %c0_138 = arith.constant 0 : index
    %224 = vector.load %arg6[%c0_137, %c0_138] : memref<10x384xf32, #tpu.memory_space<vmem>>, vector<10x384xf32>
    %cst_139 = arith.constant dense<0.000000e+00> : vector<64x384xf32>
    %225 = tpu.matmul %223, %224, %cst_139 {dimension_numbers = #tpu.dot_dimension_numbers<[1], [0], [0], [1], [0, 0, 1, 1], [], []>} : vector<64x10xf32>, vector<10x384xf32>, vector<64x384xf32> -> vector<64x384xf32>
    %c0_140 = arith.constant 0 : index
    %c0_141 = arith.constant 0 : index
    %226 = vector.load %arg7[%c0_140, %c0_141] : memref<1x384xf32, #tpu.memory_space<vmem>>, vector<1x384xf32>
    %227 = vector.broadcast %226 : vector<1x384xf32> to vector<64x384xf32>
    %228 = arith.addf %225, %227 : vector<64x384xf32>
    %cst_142 = arith.constant 5.000000e-01 : f32
    %229 = vector.broadcast %cst_142 : f32 to vector<64x384xf32>
    %230 = arith.mulf %229, %228 : vector<64x384xf32>
    %cst_143 = arith.constant 5.000000e-01 : f32
    %231 = vector.broadcast %cst_143 : f32 to vector<64x384xf32>
    %232 = arith.mulf %231, %228 : vector<64x384xf32>
    %233 = math.tanh %232 : vector<64x384xf32>
    %cst_144 = arith.constant 1.000000e+00 : f32
    %234 = vector.broadcast %cst_144 : f32 to vector<64x384xf32>
    %235 = arith.addf %233, %234 : vector<64x384xf32>
    %236 = arith.mulf %230, %235 : vector<64x384xf32>
    %c0_145 = arith.constant 0 : index
    %c2688 = arith.constant 2688 : index
    %237 = vector.load %arg8[%c0_145, %c2688] : memref<64x3072xf32, #tpu.memory_space<vmem>>, vector<64x384xf32>
    tpu.vector_store %arg8[%c0_145, %c2688], %236 {strides = array<i32>} : memref<64x3072xf32, #tpu.memory_space<vmem>>, vector<64x384xf32>,
    return
  }
  func.func @transform_0(%arg0: i32) -> (i32, i32) {
    %c0_i32 = arith.constant 0 : i32
    %c0_i32_0 = arith.constant 0 : i32
    return %arg0, %c0_i32 : i32, i32
  }
  func.func @transform_1(%arg0: i32) -> (i32, i32) {
    %c0_i32 = arith.constant 0 : i32
    %c0_i32_0 = arith.constant 0 : i32
    %c0_i32_1 = arith.constant 0 : i32
    return %c0_i32, %c0_i32_0 : i32, i32
  }
  func.func @transform_2(%arg0: i32) -> (i32, i32) {
    %c0_i32 = arith.constant 0 : i32
    %c0_i32_0 = arith.constant 0 : i32
    %c0_i32_1 = arith.constant 0 : i32
    return %c0_i32, %c0_i32_0 : i32, i32
  }
  func.func @transform_3(%arg0: i32) -> (i32, i32, i32) {
    %c0_i32 = arith.constant 0 : i32
    %c0_i32_0 = arith.constant 0 : i32
    %c0_i32_1 = arith.constant 0 : i32
    %c0_i32_2 = arith.constant 0 : i32
    return %c0_i32, %c0_i32_0, %c0_i32_1 : i32, i32, i32
  }
  func.func @transform_4(%arg0: i32) -> (i32, i32) {
    %c0_i32 = arith.constant 0 : i32
    %c0_i32_0 = arith.constant 0 : i32
    %c0_i32_1 = arith.constant 0 : i32
    return %c0_i32, %c0_i32_0 : i32, i32
  }
  func.func @transform_5(%arg0: i32) -> (i32, i32) {
    %c0_i32 = arith.constant 0 : i32
    %c0_i32_0 = arith.constant 0 : i32
    %c0_i32_1 = arith.constant 0 : i32
    return %c0_i32, %c0_i32_0 : i32, i32
  }
  func.func @transform_6(%arg0: i32) -> (i32, i32) {
    %c0_i32 = arith.constant 0 : i32
    %c0_i32_0 = arith.constant 0 : i32
    %c0_i32_1 = arith.constant 0 : i32
    return %c0_i32, %c0_i32_0 : i32, i32
  }
  func.func @transform_7(%arg0: i32) -> (i32, i32) {
    %c0_i32 = arith.constant 0 : i32
    %c0_i32_0 = arith.constant 0 : i32
    return %arg0, %c0_i32 : i32, i32
  }
}

</mosaic_0001>

<bundles_post_ra>
// kernel: model_forward.1
= control target key start
LH: loop header
LB: loop body
LE: loop exit
PB: predicated region body
PF: predicated region fallthrough
CT: control target
= control target key end

     0   :  { %s10161_s0 = inlined_call_operand.hbm [shape: f32[120,20], index: 0, kind: input, shape index: {}]   ;;  %s10162_s1 = inlined_call_operand.hbm [shape: f32[20,50], index: 1, kind: input, shape index: {}]   ;;  %s10163_s2 = inlined_call_operand.hbm [shape: f32[1,50], index: 2, kind: input, shape index: {}]   ;;  %s10164_s3 = inlined_call_operand.vmem [shape: f32[8,50,10], index: 3, kind: input, shape index: {}]   ;;  %s10165_s4 = inlined_call_operand.hbm [shape: f32[1,10], index: 4, kind: input, shape index: {}]   ;;  %s10166_s5 = inlined_call_operand.hbm [shape: f32[10,384], index: 5, kind: input, shape index: {}]   ;;  %s10167_s6 = inlined_call_operand.hbm [shape: f32[1,384], index: 6, kind: input, shape index: {}]   ;;  %s10168_s7 = inlined_call_operand.vmem [shape: f32[120,3072], index: 7, kind: output, shape index: {}]  }
   0x1   :  { %10174 = sst [smem:[#allocation19_spill]] %s10168_s7 }
   0x2   :  { %12 = vsyncpa [#allocation3], 0 }
   0x3   :  { %14 = vsyncpa [#allocation3 + $0x1], 0 }
   0x4   :  { %15 = vsyncpa [#allocation5], 0 }
   0x5   :  { %16 = vsyncpa [#allocation8], 0 }
   0x6   :  { %17 = vsyncpa [#allocation11], 0  ;;  %s7498_s24 = smov 0   ;;  %s7500_s25 = smov 0  }
   0x7   :  { %s7502_s26 = smov 0   ;;  %s7504_s27 = smov 0  }
   0x8 LB: > { %s7517_s28 = sadd.s32 4294967295, %s7410_s27   ;;  %s7520_s29 = sadd.s32 1, %s7410_s27   ;;  %s7410_s27 = sphi %s7504_s27, %s10205_s27   ;;  %s7406_s26 = sphi %s7502_s26, %s10209_s26   ;;  %s7402_s25 = sphi %s7500_s25, %s10208_s25   ;;  %s7398_s24 = sphi %s7498_s24, %s10207_s24  }
   0x9   : > { %10175 = sst [smem:[#allocation17_spill]] %s7520_s29  ;;  %s27_s30 = ssub.s32 %s7410_s27, %s7520_s29 }
   0xa   : > { %s30_s8 = sadd.s32 1, %s7406_s26  ;;  %p28_p0 = scmp.eq.s32.totalorder %s27_s30, 0 }
   0xb   : > { %p37_p1 = scmp.ne.s32.totalorder %s7406_s26, %s7402_s25  ;;  %p38_p2 = scmp.eq.s32.totalorder %s7410_s27, 0 }
   0xc   : > { %p43_p3 = scmp.ne.s32.totalorder %s7402_s25, %s7398_s24  ;;  %p10169_p5 = scmp.eq.s32.totalorder %s7517_s28, 0 }
   0xd   : > { %s7530_s9 = scalar_select %p28_p0, %s7406_s26, %s30_s8  }
   0xe   : > { %p7532_p4 = por %p38_p2, %p37_p1  ;;  %p193_p6 = scmp.eq.s32.totalorder %s7517_s28, 1 }
   0xf   : > { %10176 = sst [smem:[#allocation18_spill]] %s7530_s9  ;;  %p5384_p7 = scmp.ge.s32.totalorder %s7410_s27, 1 }
  0x10   : > { %s10177_s10 = scalar_select %p7532_p4, 1, 0 }
  0x11   : > { %p7541_p8 = por %p10169_p5, %p43_p3  ;;  %p206_p9 = scmp.lt.s32.totalorder %s7410_s27, 3 }
  0x12   : > { %p7546_p10 = por %p193_p6, %p37_p1  ;;  %s7444_s14 = smov [#allocation4]  }
  0x13   : > { %s10178_s11 = scalar_select %p7541_p8, 1, 0 }
  0x14   : > { %s10179_s12 = scalar_select %p7546_p10, 1, 0 }
  0x15   : > { %p7550_p11 = pnand %p5384_p7, %p206_p9  ;;  %s218_s15 = sshll.u32 %s7444_s14, 4  ;;  %s7556_s15 = int_to_ptr.vmem [resolvable:$true] %s218_s15 }
  0x16   : > { %s7445_s17 = smov [#allocation7]   ;;  %s7446_s19 = smov [#allocation6]  }
  0x17   : > { %s10180_s13 = scalar_select %p7550_p11, 1, 0 }
  0x18   : > { %p6496_p12 = pneg %p7550_p11  ;;  %s246_s18 = sshll.u32 %s7445_s17, 4  ;;  %s7564_s18 = int_to_ptr.vmem [resolvable:$true] %s246_s18 }
  0x19   : > { %s7566_s20 = sshll.u32 %s7446_s19, 4  ;;  %s7164_s23 = scalar_lea.hbm %s10162_s1, 384  ;;  %s233_s20 = int_to_ptr.vmem [resolvable:$true] %s7566_s20 }
  0x1a   : > { %p7560_p13 = pnand %p6496_p12, %p10169_p5  ;;  %p7165_p0 = scmp.ne.s32.totalorder %s10162_s1, %s7164_s23 }
  0x1b   : > { %p7171_p6 = scmp.lt.u32.totalorder %s7164_s23, %s10162_s1 }
  0x1c   : > { %p7576_p1 = pneg %p7560_p13 }
  0x1e   : > { %p7167_p2 = pnand %p7576_p1, %p7165_p0 }
  0x20   : > { %p7168_p3 = pneg %p7167_p2 }
  0x22   : > { %p7173_p7 = pnand %p7171_p6, %p7168_p3 }
  0x24   : > { %7176 = shalt.err (!%p7173_p7)
}
  0x25   : > { %s7177_s19 = scalar_lea.vmem %s7556_s15, 384  ;;  %p7185_p10 = scmp.lt.s32.totalorder %s7556_s15, %s7556_s15 }
  0x26   : > { %p7178_p9 = scmp.ne.s32.totalorder %s7556_s15, %s7177_s19  ;;  %p7186_p8 = scmp.lt.s32.totalorder %s7177_s19, %s7177_s19 }
  0x28   : > { %p7180_p12 = pnand %p7178_p9, %p7576_p1  ;;  %p7187_p0 = por %p7186_p8, %p7185_p10 }
  0x2a   : > { %p7181_p5 = pneg %p7180_p12 }
  0x2c   : > { %p7188_p2 = pnand %p7187_p0, %p7181_p5 }
  0x2e   : > { %7191 = shalt.err (!%p7188_p2)
}
  0x2f   : > { %s7447_s21 = smov 128   ;;  %s7448_s22 = smov 8  }
  0x30   : > { %6499 = dma.hbm_to_vmem [thread:$0]  (!%p7560_p13), %s10162_s1, 384, %s7556_s15, [#allocation5], %s7447_s21, %s7447_s21, %s7448_s22  }
  0x31   : > { %s7192_s17 = scalar_lea.hbm %s10165_s4, 16 }
  0x32   : > { %p7193_p8 = scmp.ne.s32.totalorder %s10165_s4, %s7192_s17  ;;  %p7199_p3 = scmp.lt.u32.totalorder %s7192_s17, %s10165_s4 }
  0x34   : > { %p7195_p5 = pnand %p7193_p8, %p7576_p1 }
  0x36   : > { %p7196_p10 = pneg %p7195_p5 }
  0x38   : > { %p7201_p6 = pnand %p7199_p3, %p7196_p10 }
  0x3a   : > { %7204 = shalt.err (!%p7201_p6)
}
  0x3b   : > { %s7205_s15 = scalar_lea.vmem %s7564_s18, 16  ;;  %s7212_s29 = scalar_lea.vmem %s7564_s18, 32 }
  0x3c   : > { %p7206_p7 = scmp.ne.s32.totalorder %s7564_s18, %s7205_s15  ;;  %p7213_p0 = scmp.lt.s32.totalorder %s7564_s18, %s7564_s18 }
  0x3d   : > { %p7214_p2 = scmp.lt.s32.totalorder %s7212_s29, %s7205_s15 }
  0x3e   : > { %p7208_p9 = pnand %p7206_p7, %p7576_p1 }
  0x3f   : > { %p7215_p8 = por %p7214_p2, %p7213_p0 }
  0x40   : > { %p7209_p12 = pneg %p7208_p9 }
  0x42   : > { %p7216_p5 = pnand %p7215_p8, %p7209_p12 }
  0x44   : > { %7219 = shalt.err (!%p7216_p5)
}
  0x45   : > { %6505 = dma.hbm_to_vmem [thread:$0]  (!%p7560_p13), %s10165_s4, 16, %s7564_s18, [#allocation8]  }
  0x46   : > { %s7220_s23 = scalar_lea.hbm %s10163_s2, 16 }
  0x47   : > { %p7221_p10 = scmp.ne.s32.totalorder %s10163_s2, %s7220_s23  ;;  %p7227_p7 = scmp.lt.u32.totalorder %s7220_s23, %s10163_s2 }
  0x49   : > { %p7223_p3 = pnand %p7221_p10, %p7576_p1 }
  0x4b   : > { %p7224_p6 = pneg %p7223_p3 }
  0x4d   : > { %p7229_p9 = pnand %p7227_p7, %p7224_p6 }
  0x4f   : > { %7232 = shalt.err (!%p7229_p9)
}
  0x50   : > { %s7233_s19 = scalar_lea.vmem %s233_s20, 16  ;;  %s7240_s18 = scalar_lea.vmem %s233_s20, 32 }
  0x51   : > { %p7234_p12 = scmp.ne.s32.totalorder %s233_s20, %s7233_s19  ;;  %p7241_p8 = scmp.lt.s32.totalorder %s233_s20, %s233_s20 }
  0x52   : > { %p7242_p5 = scmp.lt.s32.totalorder %s7240_s18, %s7233_s19 }
  0x53   : > { %p7236_p0 = pnand %p7234_p12, %p7576_p1 }
  0x54   : > { %p7243_p11 = por %p7242_p5, %p7241_p8 }
  0x55   : > { %p7237_p2 = pneg %p7236_p0 }
  0x57   : > { %p7244_p4 = pnand %p7243_p11, %p7237_p2 }
  0x59   : > { %7247 = shalt.err (!%p7244_p4)
}
  0x5a   : > { %6502 = dma.hbm_to_vmem [thread:$0]  (!%p7560_p13), %s10163_s2, 16, %s233_s20, [#allocation5]  }
  0x5b   : > { %s7449_s7 = smov [#allocation9]   ;;  %s7248_s23 = scalar_lea.hbm %s10166_s5, 768 }
  0x5c   : > { %s256_s9 = sshll.u32 %s7449_s7, 4  ;;  %p7249_p10 = scmp.ne.s32.totalorder %s10166_s5, %s7248_s23  ;;  %s257_s9 = int_to_ptr.vmem [resolvable:$true] %s256_s9 }
  0x5d   : > { %p7255_p3 = scmp.lt.u32.totalorder %s7248_s23, %s10166_s5 }
  0x5e   : > { %p7251_p4 = pnand %p7249_p10, %p7576_p1 }
  0x60   : > { %p7252_p11 = pneg %p7251_p4 }
  0x62   : > { %p7257_p6 = pnand %p7255_p3, %p7252_p11 }
  0x64   : > { %7260 = shalt.err (!%p7257_p6)
}
  0x65   : > { %s7261_s20 = scalar_lea.vmem %s257_s9, 768  ;;  %p7269_p0 = scmp.lt.s32.totalorder %s257_s9, %s257_s9 }
  0x66   : > { %p7262_p7 = scmp.ne.s32.totalorder %s257_s9, %s7261_s20  ;;  %p7270_p2 = scmp.lt.s32.totalorder %s7261_s20, %s7261_s20 }
  0x68   : > { %p7264_p9 = pnand %p7262_p7, %p7576_p1  ;;  %p7271_p8 = por %p7270_p2, %p7269_p0 }
  0x6a   : > { %p7265_p12 = pneg %p7264_p9 }
  0x6c   : > { %p7272_p5 = pnand %p7271_p8, %p7265_p12 }
  0x6e   : > { %7275 = shalt.err (!%p7272_p5)
}
  0x6f   : > { %s7450_s19 = smov 384   ;;  %s7451_s18 = smov 24  }
  0x70   : > { %6508 = dma.hbm_to_vmem [thread:$0]  (!%p7560_p13), %s10166_s5, 768, %s257_s9, [#allocation8], %s7450_s19, %s7450_s19, %s7451_s18  }
  0x71   : > { %s7452_s7 = smov [#allocation10]   ;;  %s7276_s24 = scalar_lea.hbm %s10167_s6, 48 }
  0x72   : > { %s270_s21 = sshll.u32 %s7452_s7, 4  ;;  %p7277_p10 = scmp.ne.s32.totalorder %s10167_s6, %s7276_s24  ;;  %s271_s21 = int_to_ptr.vmem [resolvable:$true] %s270_s21 }
  0x73   : > { %p7283_p3 = scmp.lt.u32.totalorder %s7276_s24, %s10167_s6 }
  0x74   : > { %p7279_p4 = pnand %p7277_p10, %p7576_p1 }
  0x76   : > { %p7280_p11 = pneg %p7279_p4 }
  0x78   : > { %p7285_p6 = pnand %p7283_p3, %p7280_p11 }
  0x7a   : > { %7288 = shalt.err (!%p7285_p6)
}
  0x7b   : > { %s7289_s9 = scalar_lea.vmem %s271_s21, 48  ;;  %s7296_s19 = scalar_lea.vmem %s271_s21, 64 }
  0x7c   : > { %p7290_p7 = scmp.ne.s32.totalorder %s271_s21, %s7289_s9  ;;  %p7297_p0 = scmp.lt.s32.totalorder %s271_s21, %s271_s21 }
  0x7d   : > { %p7298_p2 = scmp.lt.s32.totalorder %s7296_s19, %s7289_s9 }
  0x7e   : > { %p7292_p9 = pnand %p7290_p7, %p7576_p1 }
  0x7f   : > { %p7299_p8 = por %p7298_p2, %p7297_p0 }
  0x80   : > { %p7293_p12 = pneg %p7292_p9 }
  0x82   : > { %p7300_p5 = pnand %p7299_p8, %p7293_p12 }
  0x84   : > { %7303 = shalt.err (!%p7300_p5)
}
  0x85   : > { %6511 = dma.hbm_to_vmem [thread:$0]  (!%p7560_p13), %s10167_s6, 48, %s271_s21, [#allocation11]  }
  0x86   : > { %p5390_p10 = scmp.ge.s32.totalorder %s7410_s27, 2 }
  0x87   : > { %p10183_p4 = scmp.ne.s32.totalorder (!%p5390_p10), %s10177_s10, 0 }
  0x88   : > { %277 = sbr.rel (%p5390_p10) target bundleno = 178 (0xb2), region = 40 }
  0x8f   : > { %280 = sbr.rel (!%p10183_p4) target bundleno = 178 (0xb2), region = 44  ;;  %s281_s8 = sand.u32 (%p10183_p4), 1, %s7406_s26  }
  0x90   : > { %s5392_s29 = sshll.u32 (%p10183_p4), %s7410_s27, 3  ;;  %s5391_s7 = sshll.u32 (%p10183_p4), %s281_s8, 6 }
  0x91   : > { %s287_s22 = ssub.s32 (%p10183_p4), 15, %s5392_s29  ;;  %s7684_s24 = scalar_lea.sflag (%p10183_p4), [#allocation3], %s281_s8 }
  0x92   : > { %p288_p1 = scmp.lt.s32.totalorder (%p10183_p4), %s287_s22, 8  ;;  %s285_s21 = scalar_lea.vmem (%p10183_p4), [#allocation2], %s5391_s7 }
  0x96   : > { %s10211_s22 = smov (!%p288_p1, %s287_s22), 8 }
  0x97   : > { %s7681_s23 = sshll.u32 %s10211_s22, 7 }
  0x98   : > { %s292_s16 = ssub.s32 1024, %s7681_s23 }
  0x99   : > { %293 = vsyncadd %s7684_s24, %s292_s16  ;;  %p5394_p13 = scmp.ne.s32.totalorder %s7681_s23, 0  ;;  %s5709_s10 = sshll.u32 %s7410_s27, 10 }
  0x9a   : > { %s7692_s17 = scalar_lea.hbm %s10161_s0, %s5709_s10  ;;  %s298_s20 = sshll.u32 %s285_s21, 4  ;;  %s7694_s20 = int_to_ptr.vmem [resolvable:$true] %s298_s20 }
  0x9b   : > { %s7304_s9 = scalar_lea.hbm %s7692_s17, %s7681_s23  ;;  %s7308_s27 = scalar_lea.hbm %s10161_s0, 1920 }
  0x9c   : > { %p7305_p11 = scmp.ne.s32.totalorder %s7692_s17, %s7304_s9  ;;  %p7309_p7 = scmp.lt.u32.totalorder %s7692_s17, %s10161_s0 }
  0x9d   : > { %p7310_p9 = scmp.lt.u32.totalorder %s7308_s27, %s7304_s9  ;;  %p7312_p0 = scmp.lt.u32.totalorder %s7304_s9, %s7692_s17 }
  0x9e   : > { %p7306_p3 = pnand %p7305_p11, %p5394_p13 }
  0x9f   : > { %p7311_p12 = por %p7310_p9, %p7309_p7 }
  0xa0   : > { %p7307_p6 = pneg %p7306_p3 }
  0xa1   : > { %p7313_p2 = por %p7312_p0, %p7311_p12 }
  0xa3   : > { %p7314_p8 = pnand %p7313_p2, %p7307_p6 }
  0xa5   : > { %7317 = shalt.err (!%p7314_p8)
}
  0xa6   : > { %s7318_s29 = scalar_lea.vmem %s7694_s20, %s7681_s23  ;;  %s7453_s7 = smov [#allocation2]  }
  0xa7   : > { %p7319_p5 = scmp.ne.s32.totalorder %s7694_s20, %s7318_s29  ;;  %s7322_s22 = sshll.u32 %s7453_s7, 4  ;;  %s7323_s22 = int_to_ptr.vmem [resolvable:$false] %s7322_s22 }
  0xa8   : > { %s7324_s16 = scalar_lea.vmem %s7323_s22, 2048  ;;  %p7325_p1 = scmp.lt.s32.totalorder %s7694_s20, %s7323_s22 }
  0xa9   : > { %p7320_p10 = pnand %p7319_p5, %p5394_p13  ;;  %p7326_p11 = scmp.lt.s32.totalorder %s7324_s16, %s7318_s29 }
  0xab   : > { %p7321_p4 = pneg %p7320_p10  ;;  %p7327_p3 = por %p7326_p11, %p7325_p1 }
  0xad   : > { %p7328_p7 = pnand %p7327_p3, %p7321_p4 }
  0xaf   : > { %7331 = shalt.err (!%p7328_p7)
}
  0xb0   : > { %s7454_s21 = smov 128   ;;  %s7455_s10 = smov 8  }
  0xb1   : > { %304 = dma.hbm_to_vmem [thread:$0]  (%p5394_p13), %s7692_s17, %s7681_s23, %s7694_s20, %s7684_s24, %s7454_s21, %s7454_s21, %s7455_s10  }
  0xb2 PF: > { %p10184_p6 = scmp.ne.s32.totalorder %s10180_s13, 0 }
  0xb3   : > { %s7724_s30 = sand.u32 (!%p10184_p6), 1, %s7402_s25   ;;  %p10185_p9 = scmp.ne.s32.totalorder (!%p10184_p6), %s10178_s11, 0 }
  0xb4   : > { %310 = sbr.rel (%p10184_p6) target bundleno = 2811 (0xafb), region = 48  ;;  %s5399_s14 = sshll.u32 (!%p10184_p6), %s7724_s30, 6 }
  0xb5   : > { %s313_s9 = scalar_lea.sflag (!%p10184_p6), [#allocation3], %s7724_s30  ;;  %s7728_s19 = scalar_lea.vmem (!%p10184_p6), [#allocation2], %s5399_s14 }
  0xbb   : > { %7381 = dma.done.wait (%p10185_p9), %s313_s9, 1024  }
  0xbc   : > { %7383 = vsyncadd (%p10185_p9), %s313_s9, 4294966272  ;;  %p10186_p13 = scmp.eq.s32.totalorder %s7517_s28, 0 }
  0xbe   : > { %7385 = dma.done.wait (%p10186_p13), [#allocation5], 400   ;;  %p10187_p12 = pmov %p10186_p13 }
  0xc0   : > { %7387 = vsyncadd (%p10187_p12), [#allocation5], 4294966896  ;;  %p10188_p0 = pmov %p10187_p12 }
  0xc2   : > { %7389 = dma.done.wait (%p10188_p0), [#allocation8], 784   ;;  %p10189_p2 = pmov %p10188_p0 }
  0xc3   : > { %p10190_p8 = pmov %p10188_p0 }
  0xc4   : > { %7391 = vsyncadd (%p10189_p2), [#allocation8], 4294966512 }
  0xc5   : > { %7393 = dma.done.wait (%p10190_p8), [#allocation11], 48   ;;  %p10191_p5 = pmov %p10188_p0 }
  0xc6   : > { %vm395_vm0 = vcmask 162816   ;;  %v385_v0 = vld [vmem:[#allocation4] sm:$0xff]  ;;  %v386_v1 = vld [vmem:[#allocation4 + $0x8] sm:$0xff]  ;;  %v387_v4 = vld [vmem:[#allocation4 + $0x10] sm:$0xf]  ;;  %vm420_vm1 = vcmask 1043456  }
  0xc7   : > { %7395 = vsyncadd (%p10191_p5), [#allocation11], 4294967248  ;;  %v6275_v2 = vpack.c.bf16 %v386_v1, %v385_v0  ;;  %v377_v3 = vld [vmem:[%s7728_s19] sm:$0xff]  ;;  %v378_v5 = vld [vmem:[%s7728_s19 + $0x8] sm:$0xff]  ;;  %vm600_vm2 = vcmask 1041408   ;;  %vm575_vm3 = vcmask 408576  }
  0xc8   : > { %5927 = vmatprep.mubr.msk.f32.mxu0 %vm395_vm0, %v377_v3  ;;  %v379_v6 = vld [vmem:[%s7728_s19 + $0x10] sm:$0xff]  ;;  %v380_v7 = vld [vmem:[%s7728_s19 + $0x18] sm:$0xff]  ;;  %v381_v8 = vld [vmem:[%s7728_s19 + $0x20] sm:$0xff]  ;;  %vm7456_vm4 = vmmov 1   ;;  %vm764_vm6 = vcmask 80896   ;;  %s6473_s16 = smul.u32 1536, %s7724_s30 }
  0xc9   : > { %6276 = vmatprep.subr.bf16.mxu0 %v6275_v2  ;;  %v382_v9 = vld [vmem:[%s7728_s19 + $0x28] sm:$0xff]  ;;  %v383_v10 = vld [vmem:[%s7728_s19 + $0x30] sm:$0xff]  ;;  %v384_v11 = vld [vmem:[%s7728_s19 + $0x38] sm:$0xff]  ;;  %p10194_p10 = scmp.ne.s32.totalorder %s10179_s12, 0 }
  0xca   : > { %6278 = vmatpush3.bf16.msra.mxu0 %v6275_v2  ;;  %v561_v12 = vld [vmem:[%s10164_s3] sm:$0xff]  ;;  %v562_v13 = vld [vmem:[%s10164_s3 + $0x8] sm:$0xff]  ;;  %v563_v15 = vld [vmem:[%s10164_s3 + $0x10] sm:$0xff]  ;;  %s8003_s21 = scalar_lea.vmem [#allocation12], %s6473_s16   ;;  %s5696_s19 = sshll.u32 (%p10194_p10), %s7517_s28, 3 }
  0xcb   : > { %5925 = vmatprep.subr.msk.mxu0 %vm420_vm1, %v387_v4  ;;  %v6279_v14 = vpack.c.bf16 %v562_v13, %v561_v12  ;;  %v564_v16 = vld [vmem:[%s10164_s3 + $0x18] sm:$0xff]  ;;  %v565_v18 = vld [vmem:[%s10164_s3 + $0x20] sm:$0xff]  ;;  %v566_v19 = vld [vmem:[%s10164_s3 + $0x28] sm:$0xff]  ;;  %s6474_s11 = smul.u32 (%p10194_p10), 1536, %s7517_s28  ;;  %s4987_s13 = ssub.s32 (%p10194_p10), 15, %s5696_s19 }
  0xcc   : > { %v6283_v17 = vpack.c.bf16 %v564_v16, %v563_v15  ;;  %v6287_v20 = vpack.c.bf16 %v566_v19, %v565_v18  ;;  %v567_v21 = vld [vmem:[%s10164_s3 + $0x30] sm:$0x3]  ;;  %v5405_v22 = vld [vmem:[#allocation6] ss:$0 sm:$0xff]  ;;  %vm7818_vm5 = vmpackc.low %vm600_vm2, %vm7456_vm4  ;;  %p4988_p4 = scmp.lt.s32.totalorder (%p10194_p10), %s4987_s13, 8  ;;  %s10195_s17 = sld [smem:[#allocation19_spill]] (%p10194_p10) }
  0xcd   : > { %6280 = vmatprep.subr.bf16.mxu1 %v6279_v14  ;;  %v744_v12 = vld [vmem:[#allocation9 + $0x18] sm:$0x3]  ;;  %v7838_v15 = vld [vmem:[#allocation9 + $0x10] sm:$0xff]  ;;  %v746_v16 = vld [vmem:[#allocation9 + $0x28] sm:$0x3] }
  0xce   : > { %5926 = vmatpush3.msk.msra.mxu0 %vm420_vm1, %v387_v4  ;;  %6282 = vmatpush3.bf16.msra.mxu1 %v6279_v14  ;;  %v7457_v14 = vmov 0.0   ;;  %v7846_v18 = vld [vmem:[#allocation7] ss:$0 sm:$0xff] }
  0xcf   : > { %5928 = vmatmul.mubr.msk.f32.vlgmr.msra.gmra.mrb[0].mxu0 %vm395_vm0, %v378_v5  ;;  %6284 = vmatprep.subr.bf16.mxu1 %v6283_v17 }
  0xd0   : > { %5930 = vmatprep.mubr.msk.f32.mxu0 %vm395_vm0, %v379_v6 }
  0xd2   : > { %6286 = vmatpush3.bf16.msra.mxu1 %v6283_v17  ;;  %v7841_v17 = vpack.c.bf16 %v746_v16, %v7838_v15  ;;  %s9856_s20 = scalar_lea.vmem (%p10194_p10), %s10195_s17, %s6474_s11  }
  0xd3   : > { %5931 = vmatmul.mubr.msk.f32.gmra.mrb[2].mxu0 %vm395_vm0, %v380_v7  ;;  %6288 = vmatprep.subr.bf16.mxu1 %v6287_v20 }
  0xd4   : > { %5933 = vmatprep.mubr.msk.f32.mxu0 %vm395_vm0, %v381_v8  ;;  %v7822_v8 = vld [vmem:[#allocation9 + $0x8] sm:$0xff] }
  0xd6   : > { %6290 = vmatpush3.bf16.msra.mxu1 %v6287_v20 }
  0xd7   : > { %5934 = vmatmul.mubr.msk.f32.gmra.mrb[4].mxu0 %vm395_vm0, %v382_v9  ;;  %5951 = vmatprep.subr.msk.mxu1 %vm600_vm2, %v567_v21  ;;  %v745_v9 = vld [vmem:[#allocation9 + $0x20] sm:$0x3] }
  0xd8   : > { %5936 = vmatprep.mubr.msk.f32.mxu0 %vm395_vm0, %v383_v10  ;;  %v6291_v10 = vpack.c.bf16 %v745_v9, %v7822_v8  ;;  %v5446_v9 = vld [vmem:[%s10164_s3 + $0x48] sm:$0xff] }
  0xda   : > { %5952 = vmatpush3.msk.msra.mxu1 %vm600_vm2, %v567_v21  ;;  %6293 = vmatprep.subr.msk.bf16.mxu0 %vm7818_vm5, %v6291_v10 }
  0xdb   : > { %5937 = vmatmul.mubr.msk.f32.gmra.mrb[6].mxu0 %vm395_vm0, %v384_v11  ;;  %v7825_v11 = vld [vmem:[#allocation9] sm:$0xff]  ;;  %6471 = vmatprep.subr.msk.bf16.mxu1 %vm7818_vm5, %v6291_v10  ;;  %v5447_v10 = vld [vmem:[%s10164_s3 + $0x50] sm:$0xff] }
  0xdc   : > { %v6294_v13 = vpack.c.bf16 %v744_v12, %v7825_v11  ;;  %862 = vmatprep.mubr.f32.mxu0 %v7457_v14 }
  0xde   : > { %6296 = vmatpush1.bf16.msk.msra.mxu0 %vm7818_vm5, %v6294_v13 }
 0x1a2   : > { %v5929_v23 = vpop.f32.mrb[0].mxu0 }
 0x1a3   : > { %v496_v24 = vadd.f32 %v5929_v23, %v5405_v22  ;;  %v490_v25 = vpop.f32.mrb[1].mxu0 }
 0x1a4   : > { %v491_v26 = vadd.f32 %v5405_v22, %v490_v25 }
 0x1a5   : > { %v530_v27 = vmul.f32 0.5, %v496_v24 }
 0x1a6   : > { %v529_v28 = vmul.f32 0.5, %v491_v26  ;;  %v5932_v29 = vpop.f32.mrb[2].mxu0 }
 0x1a7   : > { %6632 = vtanh.f32 %v530_v27  ;;  %v506_v30 = vadd.f32 %v5932_v29, %v5405_v22  ;;  %v500_v31 = vpop.f32.mrb[3].mxu0 }
 0x1a8   : > { %6634 = vtanh.f32 %v529_v28  ;;  %v501_v32 = vadd.f32 %v5405_v22, %v500_v31 }
 0x1a9   : > { %v532_v33 = vmul.f32 0.5, %v506_v30 }
 0x1aa   : > { %v531_v34 = vmul.f32 0.5, %v501_v32  ;;  %v5935_v35 = vpop.f32.mrb[4].mxu0 }
 0x1ab   : > { %6636 = vtanh.f32 %v532_v33  ;;  %v516_v36 = vadd.f32 %v5935_v35, %v5405_v22  ;;  %v510_v37 = vpop.f32.mrb[5].mxu0 }
 0x1ac   : > { %6638 = vtanh.f32 %v531_v34  ;;  %v511_v38 = vadd.f32 %v5405_v22, %v510_v37 }
 0x1ad   : > { %v534_v39 = vmul.f32 0.5, %v516_v36 }
 0x1ae   : > { %v533_v40 = vmul.f32 0.5, %v511_v38  ;;  %v5938_v41 = vpop.f32.mrb[6].mxu0 }
 0x1af   : > { %6640 = vtanh.f32 %v534_v39  ;;  %v526_v42 = vadd.f32 %v5938_v41, %v5405_v22  ;;  %v520_v43 = vpop.f32.mrb[7].mxu0 }
 0x1b0   : > { %6642 = vtanh.f32 %v533_v40  ;;  %v521_v44 = vadd.f32 %v5405_v22, %v520_v43 }
 0x1b1   : > { %v6633_v45 = vpop.eup %6632  ;;  %v536_v46 = vmul.f32 0.5, %v526_v42 }
 0x1b2   : > { %v6635_v47 = vpop.eup %6634  ;;  %v546_v48 = vadd.f32 1.0, %v6633_v45  ;;  %v535_v49 = vmul.f32 0.5, %v521_v44 }
 0x1b3   : > { %v545_v50 = vadd.f32 1.0, %v6635_v47  ;;  %6644 = vtanh.f32 %v536_v46 }
 0x1b4   : > { %6646 = vtanh.f32 %v535_v49  ;;  %v7787_v54 = vmul.f32 %v546_v48, %v530_v27 }
 0x1b5   : > { %v6637_v51 = vpop.eup %6636  ;;  %v7785_v52 = vmul.f32 %v545_v50, %v529_v28 }
 0x1b6   : > { %v6639_v53 = vpop.eup %6638  ;;  %v548_v55 = vadd.f32 1.0, %v6637_v51 }
 0x1b7   : > { %v547_v56 = vadd.f32 1.0, %v6639_v53  ;;  %5953 = vmatprep.mubr.msk.f32.mxu1 %vm575_vm3, %v7785_v52 }
 0x1b8   : > { %5954 = vmatmul.mubr.msk.f32.vlgmr.msra.gmra.mrb[0].mxu1 %vm575_vm3, %v7787_v54  ;;  %v7795_v60 = vmul.f32 %v548_v55, %v532_v33 }
 0x1b9   : > { %v6641_v57 = vpop.eup %6640  ;;  %v7793_v58 = vmul.f32 %v547_v56, %v531_v34  ;;  %6472 = vmatpush1.bf16.msk.msra.mxu1 %vm7818_vm5, %v6294_v13  ;;  %v6307_v13 = vpack.c.bf16 %v5447_v10, %v5446_v9 }
 0x1ba   : > { %v6643_v59 = vpop.eup %6642  ;;  %v550_v61 = vadd.f32 1.0, %v6641_v57  ;;  %6299 = vmatprep.subr.msk.bf16.mxu1 %vm7818_vm5, %v7841_v17  ;;  %v5444_v57 = vld [vmem:[%s10164_s3 + $0x38] sm:$0xff] }
 0x1bb   : > { %v549_v62 = vadd.f32 1.0, %v6643_v59  ;;  %5956 = vmatprep.mubr.msk.f32.mxu1 %vm575_vm3, %v7793_v58  ;;  %v5445_v59 = vld [vmem:[%s10164_s3 + $0x40] sm:$0xff] }
 0x1bc   : > { %5957 = vmatmul.mubr.msk.f32.gmra.mrb[2].mxu1 %vm575_vm3, %v7795_v60  ;;  %v7803_v2 = vmul.f32 %v550_v61, %v534_v39 }
 0x1bd   : > { %v6645_v63 = vpop.eup %6644  ;;  %v7801_v0 = vmul.f32 %v549_v62, %v533_v40 }
 0x1be   : > { %v6647_v1 = vpop.eup %6646  ;;  %v552_v3 = vadd.f32 1.0, %v6645_v63 }
 0x1bf   : > { %v551_v4 = vadd.f32 1.0, %v6647_v1  ;;  %5959 = vmatprep.mubr.msk.f32.mxu1 %vm575_vm3, %v7801_v0  ;;  %v6303_v1 = vpack.c.bf16 %v5445_v59, %v5444_v57 }
 0x1c0   : > { %5960 = vmatmul.mubr.msk.f32.gmra.mrb[4].mxu1 %vm575_vm3, %v7803_v2  ;;  %v7811_v6 = vmul.f32 %v552_v3, %v536_v46 }
 0x1c1   : > { %v7809_v5 = vmul.f32 %v551_v4, %v535_v49 }
 0x1c3   : > { %5962 = vmatprep.mubr.msk.f32.mxu1 %vm575_vm3, %v7809_v5 }
 0x1c4   : > { %5963 = vmatmul.mubr.msk.f32.gmra.mrb[6].mxu1 %vm575_vm3, %v7811_v6 }
 0x1c5   : > { %904 = vmatprep.mubr.f32.mxu1 %v7457_v14 }
 0x28b   : > { %v5955_v19 = vpop.f32.mrb[0].mxu1 }
 0x28c   : > { %v676_v20 = vadd.f32 %v5955_v19, %v7846_v18  ;;  %v670_v21 = vpop.f32.mrb[1].mxu1 }
 0x28d   : > { %v671_v22 = vadd.f32 %v7846_v18, %v670_v21  ;;  %v5449_v21 = vld [vmem:[%s10164_s3 + $0x60] sm:$0xff] }
 0x28e   : > { %v710_v23 = vmul.f32 0.5, %v676_v20  ;;  %v5448_v20 = vld [vmem:[%s10164_s3 + $0x58] sm:$0xff] }
 0x28f   : > { %v709_v24 = vmul.f32 0.5, %v671_v22  ;;  %v5958_v25 = vpop.f32.mrb[2].mxu1 }
 0x290   : > { %6648 = vtanh.f32 %v710_v23  ;;  %v680_v26 = vpop.f32.mrb[3].mxu1  ;;  %v686_v27 = vadd.f32 %v5958_v25, %v7846_v18 }
 0x291   : > { %6650 = vtanh.f32 %v709_v24  ;;  %v681_v28 = vadd.f32 %v7846_v18, %v680_v26  ;;  %v5450_v26 = vld [vmem:[%s10164_s3 + $0x68] sm:$0x3] }
 0x292   : > { %v712_v32 = vmul.f32 0.5, %v686_v27  ;;  %v1295_v27 = vld [vmem:[#allocation9 + $0x20] sm:$0x3] }
 0x293   : > { %v711_v29 = vmul.f32 0.5, %v681_v28  ;;  %v5961_v30 = vpop.f32.mrb[4].mxu1  ;;  %v1296_v28 = vld [vmem:[#allocation9 + $0x28] sm:$0x3] }
 0x294   : > { %v690_v31 = vpop.f32.mrb[5].mxu1  ;;  %v696_v37 = vadd.f32 %v5961_v30, %v7846_v18  ;;  %v1294_v30 = vld [vmem:[#allocation9 + $0x18] sm:$0x3] }
 0x295   : > { %6652 = vtanh.f32 %v711_v29  ;;  %v691_v33 = vadd.f32 %v7846_v18, %v690_v31  ;;  %v6321_v31 = vpack.c.bf16 %v1296_v28, %v7838_v15 }
 0x296   : > { %6654 = vtanh.f32 %v712_v32  ;;  %v714_v43 = vmul.f32 0.5, %v696_v37  ;;  %v747_v37 = vld [vmem:[#allocation10] sm:$0x7] }
 0x297   : > { %v5964_v34 = vpop.f32.mrb[6].mxu1  ;;  %v713_v38 = vmul.f32 0.5, %v691_v33 }
 0x298   : > { %v706_v35 = vadd.f32 %v5964_v34, %v7846_v18  ;;  %v700_v36 = vpop.f32.mrb[7].mxu1  ;;  %v749_v34 = vlaneseq }
 0x299   : > { %v701_v44 = vadd.f32 %v7846_v18, %v700_v36 }
 0x29a   : > { %v6649_v39 = vpop.eup %6648  ;;  %v716_v40 = vmul.f32 0.5, %v706_v35  ;;  %v750_v35 = vshrl.u32 %v749_v34, 7 }
 0x29b   : > { %v6651_v41 = vpop.eup %6650  ;;  %v726_v45 = vadd.f32 1.0, %v6649_v39  ;;  %v715_v48 = vmul.f32 0.5, %v701_v44 }
 0x29c   : > { %v725_v42 = vadd.f32 1.0, %v6651_v41  ;;  %6656 = vtanh.f32 %v716_v40  ;;  %v7941_v36 = vsub.s32 0, %v750_v35 }
 0x29d   : > { %6658 = vtanh.f32 %v713_v38  ;;  %v734_v49 = vmul.f32 %v726_v45, %v710_v23 }
 0x29e   : > { %v733_v46 = vmul.f32 %v725_v42, %v709_v24  ;;  %6660 = vtanh.f32 %v714_v43  ;;  %v7946_v39 = vrot.slane %v747_v37, %v7941_v36 }
 0x29f   : > { %v6653_v47 = vpop.eup %6652  ;;  %6662 = vtanh.f32 %v715_v48 }
 0x2a0   : > { %5427 = vmatmul.mubr.msk.f32.vlgmr.msra.gmra.mrb[8].mxu0 %vm764_vm6, %v733_v46  ;;  %v727_v50 = vadd.f32 1.0, %v6653_v47  ;;  %v6655_v51 = vpop.eup %6654 }
 0x2a1   : > { %868 = vmatprep.mubr.f32.mxu0 %v7457_v14  ;;  %v728_v55 = vadd.f32 1.0, %v6655_v51 }
 0x2a2   : > { %v735_v56 = vmul.f32 %v727_v50, %v711_v29  ;;  %v6315_v29 = vpack.c.bf16 %v1295_v27, %v7822_v8  ;;  %v5480_v8 = vld [vmem:[%s10164_s3 + $0x70] sm:$0xff] }
 0x2a3   : > { %v736_v3 = vmul.f32 %v728_v55, %v712_v32  ;;  %v6318_v32 = vpack.c.bf16 %v1294_v30, %v7825_v11  ;;  %v5481_v11 = vld [vmem:[%s10164_s3 + $0x78] sm:$0xff] }
 0x2a4   : > { %5428 = vmatmul.mubr.msk.f32.gmra.mrb[10].mxu0 %vm764_vm6, %v734_v49  ;;  %6317 = vmatprep.subr.msk.bf16.mxu0 %vm7818_vm5, %v6315_v29  ;;  %v7938_v33 = vpack.c.bf16 %v5481_v11, %v5480_v8 }
 0x2a5   : > { %874 = vmatprep.mubr.f32.mxu0 %v7457_v14  ;;  %6320 = vmatpush1.bf16.msk.msra.mxu0 %vm7818_vm5, %v6318_v32 }
 0x2a6   : > { %v6657_v53 = vpop.eup %6656 }
 0x2a7   : > { %v6659_v61 = vpop.eup %6658  ;;  %v732_v62 = vadd.f32 1.0, %v6657_v53 }
 0x2a8   : > { %5429 = vmatmul.mubr.msk.f32.gmra.mrb[12].mxu0 %vm764_vm6, %v735_v56  ;;  %v729_v4 = vadd.f32 1.0, %v6659_v61  ;;  %v6661_v12 = vpop.eup %6660 }
 0x2a9   : > { %v740_v63 = vmul.f32 %v732_v62, %v716_v40  ;;  %880 = vmatprep.mubr.f32.mxu0 %v7457_v14  ;;  %v730_v16 = vadd.f32 1.0, %v6661_v12  ;;  %v6663_v22 = vpop.eup %6662 }
 0x2aa   : > { %v737_v19 = vmul.f32 %v729_v4, %v713_v38  ;;  %v731_v24 = vadd.f32 1.0, %v6663_v22  ;;  %v7943_v38 = vsub.s32 1, %v750_v35 }
 0x2ab   : > { %5434 = vmatmul.mubr.msk.f32.vlgmr.msra.gmra.mrb[8].mxu1 %vm764_vm6, %v740_v63  ;;  %v738_v23 = vmul.f32 %v730_v16, %v714_v43 }
 0x2ac   : > { %6302 = vmatpush3.bf16.msk.msra.mxu1 %vm7818_vm5, %v7841_v17  ;;  %5430 = vmatmul.mubr.msk.f32.gmra.mrb[14].mxu0 %vm764_vm6, %v736_v3  ;;  %v6311_v17 = vpack.c.bf16 %v5449_v21, %v5448_v20  ;;  %v739_v25 = vmul.f32 %v731_v24, %v715_v48  ;;  %v7949_v40 = vrot.slane %v747_v37, %v7943_v38 }
 0x2ad   : > { %5969 = vmatprep.mubr.msk.f32.mxu1 %vm764_vm6, %v733_v46  ;;  %6304 = vmatprep.subr.bf16.mxu1 %v6303_v1 }
 0x2ae   : > { %886 = vmatprep.mubr.f32.mxu0 %v7457_v14 }
 0x2af   : > { %5970 = vmatmul.mubr.msk.f32.vlgmr.msra.gmra.mrb[10].mxu1 %vm764_vm6, %v734_v49 }
 0x2b0   : > { %6306 = vmatpush3.bf16.msra.mxu1 %v6303_v1  ;;  %5431 = vmatmul.mubr.msk.f32.gmra.mrb[16].mxu0 %vm764_vm6, %v737_v19 }
 0x2b1   : > { %5972 = vmatprep.mubr.msk.f32.mxu1 %vm764_vm6, %v735_v56  ;;  %6308 = vmatprep.subr.bf16.mxu1 %v6307_v13  ;;  %v7959_v56 = vsub.s32 2, %v750_v35 }
 0x2b2   : > { %892 = vmatprep.mubr.f32.mxu0 %v7457_v14 }
 0x2b3   : > { %5973 = vmatmul.mubr.msk.f32.gmra.mrb[12].mxu1 %vm764_vm6, %v736_v3  ;;  %v7971_v10 = vrot.slane %v747_v37, %v7959_v56 }
 0x2b4   : > { %6310 = vmatpush3.bf16.msra.mxu1 %v6307_v13  ;;  %5432 = vmatmul.mubr.msk.f32.gmra.mrb[18].mxu0 %vm764_vm6, %v738_v23 }
 0x2b5   : > { %5975 = vmatprep.mubr.msk.f32.mxu1 %vm764_vm6, %v737_v19  ;;  %6312 = vmatprep.subr.bf16.mxu1 %v6311_v17 }
 0x2b6   : > { %898 = vmatprep.mubr.f32.mxu0 %v7457_v14 }
 0x2b7   : > { %5976 = vmatmul.mubr.msk.f32.gmra.mrb[14].mxu1 %vm764_vm6, %v738_v23 }
 0x2b8   : > { %6314 = vmatpush3.bf16.msra.mxu1 %v6311_v17  ;;  %5433 = vmatmul.mubr.msk.f32.gmra.mrb[20].mxu0 %vm764_vm6, %v739_v25 }
 0x2b9   : > { %5978 = vmatprep.mubr.msk.f32.mxu1 %vm764_vm6, %v739_v25  ;;  %5993 = vmatprep.subr.msk.mxu1 %vm600_vm2, %v5450_v26 }
 0x2ba   : > { %1411 = vmatprep.mubr.f32.mxu0 %v7457_v14 }
 0x2bb   : > { %5979 = vmatmul.mubr.msk.f32.gmra.mrb[16].mxu1 %vm764_vm6, %v740_v63 }
 0x2bc   : > { %5994 = vmatpush3.msk.msra.mxu1 %vm600_vm2, %v5450_v26  ;;  %5995 = vmatprep.mubr.msk.f32.mxu1 %vm575_vm3, %v7785_v52 }
 0x2bd   : > { %6323 = vmatprep.subr.msk.bf16.mxu1 %vm7818_vm5, %v6321_v31 }
 0x2bf   : > { %5996 = vmatmul.mubr.msk.f32.vlgmr.msra.gmra.mrb[18].mxu1 %vm575_vm3, %v7787_v54 }
 0x2c0   : > { %5998 = vmatprep.mubr.msk.f32.mxu1 %vm575_vm3, %v7793_v58  ;;  %6326 = vmatpush3.bf16.msk.msra.mxu1 %vm7818_vm5, %v6321_v31 }
 0x2c1   : > { %6328 = vmatprep.subr.bf16.mxu1 %v7938_v33 }
 0x2c3   : > { %5999 = vmatmul.mubr.msk.f32.gmra.mrb[20].mxu1 %vm575_vm3, %v7795_v60 }
 0x2c4   : > { %6001 = vmatprep.mubr.msk.f32.mxu1 %vm575_vm3, %v7801_v0 }
 0x2c7   : > { %6002 = vmatmul.mubr.msk.f32.gmra.mrb[22].mxu1 %vm575_vm3, %v7803_v2 }
 0x2c8   : > { %6004 = vmatprep.mubr.msk.f32.mxu1 %vm575_vm3, %v7809_v5 }
 0x2cb   : > { %6005 = vmatmul.mubr.msk.f32.gmra.mrb[24].mxu1 %vm575_vm3, %v7811_v6 }
 0x373   : > { %v864_v41 = vpop.f32.mrb[8].mxu0 }
 0x374   : > { %v865_v42 = vadd.f32 %v864_v41, %v7946_v39  ;;  %v866_v43 = vpop.f32.mrb[9].mxu0 }
 0x375   : > { %v867_v44 = vadd.f32 %v866_v43, %v7949_v40 }
 0x376   : > { %v1016_v45 = vmul.f32 0.5, %v865_v42 }
 0x377   : > { %v1017_v46 = vmul.f32 0.5, %v867_v44  ;;  %v870_v47 = vpop.f32.mrb[10].mxu0 }
 0x378   : > { %6664 = vtanh.f32 %v1016_v45  ;;  %v871_v48 = vadd.f32 %v870_v47, %v7946_v39  ;;  %v872_v49 = vpop.f32.mrb[11].mxu0 }
 0x379   : > { %6666 = vtanh.f32 %v1017_v46  ;;  %v873_v50 = vadd.f32 %v872_v49, %v7949_v40 }
 0x37a   : > { %v7955_v51 = vmul.f32 0.5, %v871_v48 }
 0x37b   : > { %v7957_v53 = vmul.f32 0.5, %v873_v50  ;;  %v876_v55 = vpop.f32.mrb[12].mxu0 }
 0x37c   : > { %6668 = vtanh.f32 %v7955_v51  ;;  %v877_v57 = vadd.f32 %v876_v55, %v7946_v39  ;;  %v878_v59 = vpop.f32.mrb[13].mxu0 }
 0x37d   : > { %6670 = vtanh.f32 %v7957_v53  ;;  %v879_v61 = vadd.f32 %v878_v59, %v7949_v40 }
 0x37e   : > { %v7965_v62 = vmul.f32 0.5, %v877_v57  ;;  %v906_v63 = vpop.f32.mrb[8].mxu1 }
 0x37f   : > { %v7967_v1 = vmul.f32 0.5, %v879_v61  ;;  %v907_v3 = vadd.f32 %v906_v63, %v7946_v39  ;;  %v882_v4 = vpop.f32.mrb[14].mxu0  ;;  %v908_v9 = vpop.f32.mrb[9].mxu1 }
 0x380   : > { %6672 = vtanh.f32 %v7965_v62  ;;  %v883_v12 = vadd.f32 %v882_v4, %v7946_v39  ;;  %v909_v13 = vadd.f32 %v908_v9, %v7949_v40  ;;  %v884_v16 = vpop.f32.mrb[15].mxu0 }
 0x381   : > { %6674 = vtanh.f32 %v7967_v1  ;;  %v7978_v19 = vmul.f32 0.5, %v907_v3  ;;  %v885_v20 = vadd.f32 %v884_v16, %v7949_v40 }
 0x382   : > { %v6665_v21 = vpop.eup %6664  ;;  %v7981_v22 = vmul.f32 0.5, %v883_v12  ;;  %v7983_v17 = vmul.f32 0.5, %v909_v13  ;;  %v5971_v23 = vpop.f32.mrb[10].mxu1 }
 0x383   : > { %v6667_v24 = vpop.eup %6666  ;;  %v1064_v25 = vadd.f32 1.0, %v6665_v21  ;;  %6676 = vtanh.f32 %v7978_v19  ;;  %v7986_v26 = vmul.f32 0.5, %v885_v20  ;;  %v983_v27 = vadd.f32 %v5971_v23, %v7971_v10  ;;  %v888_v28 = vpop.f32.mrb[16].mxu0 }
 0x384   : > { %v977_v29 = vpop.f32.mrb[11].mxu1  ;;  %v1065_v30 = vadd.f32 1.0, %v6667_v24  ;;  %6678 = vtanh.f32 %v7981_v22  ;;  %v889_v31 = vadd.f32 %v888_v28, %v7946_v39  ;;  %v890_v8 = vpop.f32.mrb[17].mxu0 }
 0x385   : > { %v978_v32 = vadd.f32 %v977_v29, %v7971_v10  ;;  %v1088_v11 = vmul.f32 %v1064_v25, %v1016_v45  ;;  %6680 = vtanh.f32 %v7983_v17  ;;  %v7993_v34 = vmul.f32 0.5, %v983_v27 }
 0x386   : > { %v891_v35 = vadd.f32 %v890_v8, %v7949_v40  ;;  %v6669_v37 = vpop.eup %6668  ;;  %v1089_v41 = vmul.f32 %v1065_v30, %v1017_v46  ;;  %6682 = vtanh.f32 %v7986_v26  ;;  %v7997_v42 = vmul.f32 0.5, %v889_v31  ;;  %v5974_v44 = vpop.f32.mrb[12].mxu1 }
 0x387   : > { %v7999_v43 = vmul.f32 0.5, %v978_v32  ;;  %v6671_v47 = vpop.eup %6670  ;;  %1112 = vst [vmem:[%s8003_s21] sm:$0xff] %v1088_v11  ;;  %v1067_v45 = vadd.f32 1.0, %v6669_v37  ;;  %6684 = vtanh.f32 %v7993_v34  ;;  %v993_v46 = vadd.f32 %v5974_v44, %v7971_v10  ;;  %v894_v49 = vpop.f32.mrb[18].mxu0 }
 0x388   : > { %v8007_v48 = vmul.f32 0.5, %v891_v35  ;;  %v987_v50 = vpop.f32.mrb[13].mxu1  ;;  %1113 = vst [vmem:[%s8003_s21 + $0x8] sm:$0xff] %v1089_v41  ;;  %v1068_v55 = vadd.f32 1.0, %v6671_v47  ;;  %6686 = vtanh.f32 %v7997_v42  ;;  %v895_v57 = vadd.f32 %v894_v49, %v7946_v39  ;;  %v896_v61 = vpop.f32.mrb[19].mxu0 }
 0x389   : > { %v988_v59 = vadd.f32 %v987_v50, %v7971_v10  ;;  %v1091_v63 = vmul.f32 %v1067_v45, %v7955_v51  ;;  %6688 = vtanh.f32 %v7999_v43  ;;  %v8016_v3 = vmul.f32 0.5, %v993_v46 }
 0x38a   : > { %v897_v4 = vadd.f32 %v896_v61, %v7949_v40  ;;  %v6673_v9 = vpop.eup %6672  ;;  %v1092_v12 = vmul.f32 %v1068_v55, %v7957_v53  ;;  %6690 = vtanh.f32 %v8007_v48  ;;  %v8021_v13 = vmul.f32 0.5, %v895_v57  ;;  %v5977_v20 = vpop.f32.mrb[14].mxu1 }
 0x38b   : > { %v8023_v16 = vmul.f32 0.5, %v988_v59  ;;  %v6675_v21 = vpop.eup %6674  ;;  %1115 = vst [vmem:[%s8003_s21 + $0xc0] sm:$0xff] %v1091_v63  ;;  %v1070_v51 = vadd.f32 1.0, %v6673_v9  ;;  %6692 = vtanh.f32 %v8016_v3  ;;  %v1003_v24 = vadd.f32 %v5977_v20, %v7971_v10  ;;  %v900_v25 = vpop.f32.mrb[20].mxu0 }
 0x38c   : > { %v8027_v23 = vmul.f32 0.5, %v897_v4  ;;  %v997_v27 = vpop.f32.mrb[15].mxu1  ;;  %1116 = vst [vmem:[%s8003_s21 + $0xc8] sm:$0xff] %v1092_v12  ;;  %v1071_v53 = vadd.f32 1.0, %v6675_v21  ;;  %6694 = vtanh.f32 %v8021_v13  ;;  %v901_v28 = vadd.f32 %v900_v25, %v7946_v39  ;;  %v902_v30 = vpop.f32.mrb[21].mxu0 }
 0x38d   : > { %v998_v29 = vadd.f32 %v997_v27, %v7971_v10  ;;  %v6677_v31 = vpop.eup %6676  ;;  %v1094_v32 = vmul.f32 %v1070_v51, %v7965_v62  ;;  %6696 = vtanh.f32 %v8023_v16  ;;  %v8036_v8 = vmul.f32 0.5, %v1003_v24 }
 0x38e   : > { %v903_v11 = vadd.f32 %v902_v30, %v7949_v40  ;;  %v6679_v35 = vpop.eup %6678  ;;  %v1095_v37 = vmul.f32 %v1071_v53, %v7967_v1  ;;  %v1085_v41 = vadd.f32 1.0, %v6677_v31  ;;  %6698 = vtanh.f32 %v8027_v23  ;;  %v5980_v44 = vpop.f32.mrb[16].mxu1 }
 0x38f   : > { %v8041_v39 = vmul.f32 0.5, %v901_v28  ;;  %v6681_v47 = vpop.eup %6680  ;;  %1118 = vst [vmem:[%s8003_s21 + $0x180] sm:$0xff] %v1094_v32  ;;  %v1073_v45 = vadd.f32 1.0, %v6679_v35  ;;  %6700 = vtanh.f32 %v8036_v8  ;;  %v8045_v62 = vmul.f32 0.5, %v998_v29  ;;  %v1007_v40 = vpop.f32.mrb[17].mxu1 }
 0x390   : > { %v8047_v46 = vmul.f32 0.5, %v903_v11  ;;  %v6683_v49 = vpop.eup %6682  ;;  %1119 = vst [vmem:[%s8003_s21 + $0x188] sm:$0xff] %v1095_v37  ;;  %v1109_v1 = vmul.f32 %v1085_v41, %v7978_v19  ;;  %v1086_v50 = vadd.f32 1.0, %v6681_v47  ;;  %v1013_v55 = vadd.f32 %v5980_v44, %v7971_v10 }
 0x391   : > { %6702 = vtanh.f32 %v8041_v39  ;;  %v6685_v57 = vpop.eup %6684  ;;  %v1097_v59 = vmul.f32 %v1073_v45, %v7981_v22  ;;  %v1074_v61 = vadd.f32 1.0, %v6683_v49  ;;  %v1008_v63 = vadd.f32 %v1007_v40, %v7971_v10 }
 0x392   : > { %6704 = vtanh.f32 %v8045_v62  ;;  %v6687_v4 = vpop.eup %6686  ;;  %1133 = vst [vmem:[%s8003_s21 + $0x540] sm:$0xff] %v1109_v1  ;;  %v1110_v9 = vmul.f32 %v1086_v50, %v7983_v17  ;;  %v1069_v19 = vadd.f32 1.0, %v6685_v57  ;;  %v8059_v12 = vmul.f32 0.5, %v1013_v55  ;;  %v5997_v20 = vpop.f32.mrb[18].mxu1 }
 0x393   : > { %6706 = vtanh.f32 %v8047_v46  ;;  %v6689_v21 = vpop.eup %6688  ;;  %1121 = vst [vmem:[%s8003_s21 + $0x240] sm:$0xff] %v1097_v59  ;;  %v1098_v22 = vmul.f32 %v1074_v61, %v7986_v26  ;;  %v1076_v51 = vadd.f32 1.0, %v6687_v4  ;;  %v8063_v24 = vmul.f32 0.5, %v1008_v63  ;;  %v1220_v25 = vpop.f32.mrb[19].mxu1 }
 0x394   : > { %v1226_v10 = vadd.f32 %v5997_v20, %v7846_v18  ;;  %v6691_v27 = vpop.eup %6690  ;;  %1134 = vst [vmem:[%s8003_s21 + $0x548] sm:$0xff] %v1110_v9  ;;  %v1093_v17 = vmul.f32 %v1069_v19, %v7993_v34  ;;  %v1066_v53 = vadd.f32 1.0, %v6689_v21  ;;  %6708 = vtanh.f32 %v8059_v12 }
 0x395   : > { %v1221_v28 = vadd.f32 %v7846_v18, %v1220_v25  ;;  %v6693_v29 = vpop.eup %6692  ;;  %1122 = vst [vmem:[%s8003_s21 + $0x248] sm:$0xff] %v1098_v22  ;;  %v1100_v26 = vmul.f32 %v1076_v51, %v7997_v42  ;;  %v1077_v30 = vadd.f32 1.0, %v6691_v27  ;;  %6710 = vtanh.f32 %v8063_v24 }
 0x396   : > { %v8073_v31 = vmul.f32 0.5, %v1226_v10  ;;  %v6695_v32 = vpop.eup %6694  ;;  %1117 = vst [vmem:[%s8003_s21 + $0xd0] sm:$0xff] %v1093_v17  ;;  %v1090_v34 = vmul.f32 %v1066_v53, %v7999_v43  ;;  %v1075_v11 = vadd.f32 1.0, %v6693_v29  ;;  %v6000_v37 = vpop.f32.mrb[20].mxu1 }
 0x397   : > { %v8077_v35 = vmul.f32 0.5, %v1221_v28  ;;  %v6697_v41 = vpop.eup %6696  ;;  %1124 = vst [vmem:[%s8003_s21 + $0x300] sm:$0xff] %v1100_v26  ;;  %v1101_v44 = vmul.f32 %v1077_v30, %v8007_v48  ;;  %v1079_v42 = vadd.f32 1.0, %v6695_v32  ;;  %v1236_v47 = vadd.f32 %v6000_v37, %v7846_v18  ;;  %v1230_v45 = vpop.f32.mrb[21].mxu1 }
 0x398   : > { %6712 = vtanh.f32 %v8073_v31  ;;  %v6699_v40 = vpop.eup %6698  ;;  %1114 = vst [vmem:[%s8003_s21 + $0x10] sm:$0xff] %v1090_v34  ;;  %v1099_v43 = vmul.f32 %v1075_v11, %v8016_v3  ;;  %v1072_v49 = vadd.f32 1.0, %v6697_v41  ;;  %v1231_v1 = vadd.f32 %v7846_v18, %v1230_v45 }
 0x399   : > { %6714 = vtanh.f32 %v8077_v35  ;;  %v6701_v50 = vpop.eup %6700  ;;  %1125 = vst [vmem:[%s8003_s21 + $0x308] sm:$0xff] %v1101_v44  ;;  %v1103_v48 = vmul.f32 %v1079_v42, %v8021_v13  ;;  %v1080_v55 = vadd.f32 1.0, %v6699_v40  ;;  %v8089_v57 = vmul.f32 0.5, %v1236_v47  ;;  %v5482_v40 = vld [vmem:[%s10164_s3 + $0x80] sm:$0xff] }
 0x39a   : > { %1123 = vst [vmem:[%s8003_s21 + $0x250] sm:$0xff] %v1099_v43  ;;  %v1096_v61 = vmul.f32 %v1072_v49, %v8023_v16  ;;  %v1081_v63 = vadd.f32 1.0, %v6701_v50  ;;  %v8093_v3 = vmul.f32 0.5, %v1231_v1  ;;  %v6003_v4 = vpop.f32.mrb[22].mxu1 }
 0x39b   : > { %v6703_v59 = vpop.eup %6702  ;;  %1127 = vst [vmem:[%s8003_s21 + $0x3c0] sm:$0xff] %v1103_v48  ;;  %v1104_v19 = vmul.f32 %v1080_v55, %v8027_v23  ;;  %6716 = vtanh.f32 %v8089_v57  ;;  %v1246_v13 = vadd.f32 %v6003_v4, %v7846_v18  ;;  %v1240_v21 = vpop.f32.mrb[23].mxu1  ;;  %v5484_v55 = vld [vmem:[%s10164_s3 + $0x90] sm:$0xff] }
 0x39c   : > { %v6705_v9 = vpop.eup %6704  ;;  %v1082_v20 = vadd.f32 1.0, %v6703_v59  ;;  %1120 = vst [vmem:[%s8003_s21 + $0x190] sm:$0xff] %v1096_v61  ;;  %v1105_v16 = vmul.f32 %v1081_v63, %v8036_v8  ;;  %6718 = vtanh.f32 %v8093_v3  ;;  %v1241_v10 = vadd.f32 %v7846_v18, %v1240_v21  ;;  %v5485_v59 = vld [vmem:[%s10164_s3 + $0x98] sm:$0xff] }
 0x39d   : > { %v6707_v22 = vpop.eup %6706  ;;  %v1078_v51 = vadd.f32 1.0, %v6705_v9  ;;  %1128 = vst [vmem:[%s8003_s21 + $0x3c8] sm:$0xff] %v1104_v19  ;;  %v1264_v27 = vmul.f32 0.5, %v1246_v13  ;;  %v6335_v9 = vpack.c.bf16 %v5485_v59, %v5484_v55 }
 0x39e   : > { %v1106_v23 = vmul.f32 %v1082_v20, %v8041_v39  ;;  %v1083_v25 = vadd.f32 1.0, %v6707_v22  ;;  %v6709_v17 = vpop.eup %6708  ;;  %1129 = vst [vmem:[%s8003_s21 + $0x3d0] sm:$0xff] %v1105_v16  ;;  %v1263_v28 = vmul.f32 0.5, %v1241_v10  ;;  %v6006_v29 = vpop.f32.mrb[24].mxu1  ;;  %v5486_v22 = vld [vmem:[%s10164_s3 + $0xa0] sm:$0x3] }
 0x39f   : > { %v1102_v53 = vmul.f32 %v1078_v51, %v8045_v62  ;;  %v6711_v26 = vpop.eup %6710  ;;  %v1087_v30 = vadd.f32 1.0, %v6709_v17  ;;  %6720 = vtanh.f32 %v1264_v27  ;;  %v1256_v32 = vadd.f32 %v6006_v29, %v7846_v18  ;;  %v1250_v34 = vpop.f32.mrb[25].mxu1  ;;  %v1845_v10 = vld [vmem:[#allocation9 + $0x28] sm:$0x3] }
 0x3a0   : > { %1130 = vst [vmem:[%s8003_s21 + $0x480] sm:$0xff] %v1106_v23  ;;  %v1107_v8 = vmul.f32 %v1083_v25, %v8047_v46  ;;  %v1084_v39 = vadd.f32 1.0, %v6711_v26  ;;  %6722 = vtanh.f32 %v1263_v28  ;;  %v1251_v11 = vadd.f32 %v7846_v18, %v1250_v34  ;;  %v5483_v18 = vld [vmem:[%s10164_s3 + $0x88] sm:$0xff]  ;;  %v5517_v26 = vld [vmem:[%s10164_s3 + $0xb0] sm:$0xff] }
 0x3a1   : > { %1126 = vst [vmem:[%s8003_s21 + $0x310] sm:$0xff] %v1102_v53  ;;  %v1111_v62 = vmul.f32 %v1087_v30, %v8059_v12  ;;  %v1266_v41 = vmul.f32 0.5, %v1256_v32  ;;  %v6331_v50 = vpack.c.bf16 %v5483_v18, %v5482_v40  ;;  %v6345_v23 = vpack.c.bf16 %v1845_v10, %v7838_v15  ;;  %v8180_v25 = vld [vmem:[#allocation9 + $0x8] sm:$0xff]  ;;  %v8183_v53 = vld [vmem:[#allocation9] sm:$0xff]  ;;  %v1297_v30 = vld [vmem:[#allocation10] sm:$0x7] }
 0x3a2   : > { %v6713_v37 = vpop.eup %6712  ;;  %1131 = vst [vmem:[%s8003_s21 + $0x488] sm:$0xff] %v1107_v8  ;;  %v1108_v46 = vmul.f32 %v1084_v39, %v8063_v24  ;;  %v1265_v47 = vmul.f32 0.5, %v1251_v11  ;;  %v5516_v15 = vld [vmem:[%s10164_s3 + $0xa8] sm:$0xff]  ;;  %v8204_v32 = vrot.slane %v1297_v30, %v7941_v36  ;;  %v8207_v34 = vrot.slane %v1297_v30, %v7943_v38 }
 0x3a3   : > { %v6715_v44 = vpop.eup %6714  ;;  %v1276_v42 = vadd.f32 1.0, %v6713_v37  ;;  %1135 = vst [vmem:[%s8003_s21 + $0x550] sm:$0xff] %v1111_v62  ;;  %6724 = vtanh.f32 %v1266_v41  ;;  %v8200_v8 = vpack.c.bf16 %v5517_v26, %v5516_v15  ;;  %v1310_v39 = vrot.slane %v1297_v30, %v7959_v56 }
 0x3a4   : > { %v1275_v45 = vadd.f32 1.0, %v6715_v44  ;;  %1132 = vst [vmem:[%s8003_s21 + $0x490] sm:$0xff] %v1108_v46  ;;  %6726 = vtanh.f32 %v1265_v47 }
 0x3a5   : > { %v6717_v12 = vpop.eup %6716  ;;  %v1284_v24 = vmul.f32 %v1276_v42, %v8073_v31 }
 0x3a6   : > { %v1283_v43 = vmul.f32 %v1275_v45, %v8077_v35  ;;  %v6719_v49 = vpop.eup %6718  ;;  %v1278_v1 = vadd.f32 1.0, %v6717_v12 }
 0x3a7   : > { %v1277_v48 = vadd.f32 1.0, %v6719_v49 }
 0x3a8   : > { %5463 = vmatmul.mubr.msk.f32.vlgmr.msra.gmra.mrb[22].mxu0 %vm764_vm6, %v1283_v43  ;;  %6011 = vmatprep.mubr.msk.f32.mxu1 %vm764_vm6, %v1283_v43  ;;  %v1286_v63 = vmul.f32 %v1278_v1, %v8089_v57 }
 0x3a9   : > { %6012 = vmatmul.mubr.msk.f32.vlgmr.msra.gmra.mrb[26].mxu1 %vm764_vm6, %v1284_v24  ;;  %1417 = vmatprep.mubr.f32.mxu0 %v7457_v14  ;;  %v6721_v31 = vpop.eup %6720  ;;  %v1285_v35 = vmul.f32 %v1277_v48, %v8093_v3 }
 0x3aa   : > { %6330 = vmatpush3.bf16.msra.mxu1 %v7938_v33  ;;  %v6723_v61 = vpop.eup %6722  ;;  %v1280_v4 = vadd.f32 1.0, %v6721_v31 }
 0x3ab   : > { %6332 = vmatprep.subr.bf16.mxu1 %v6331_v50  ;;  %v1279_v19 = vadd.f32 1.0, %v6723_v61  ;;  %6014 = vmatprep.mubr.msk.f32.mxu1 %vm764_vm6, %v1285_v35 }
 0x3ac   : > { %5464 = vmatmul.mubr.msk.f32.gmra.mrb[24].mxu0 %vm764_vm6, %v1284_v24  ;;  %v1288_v33 = vmul.f32 %v1280_v4, %v1264_v27  ;;  %v1844_v27 = vld [vmem:[#allocation9 + $0x20] sm:$0x3] }
 0x3ad   : > { %6015 = vmatmul.mubr.msk.f32.gmra.mrb[28].mxu1 %vm764_vm6, %v1286_v63  ;;  %1423 = vmatprep.mubr.f32.mxu0 %v7457_v14  ;;  %v6725_v20 = vpop.eup %6724  ;;  %v1287_v13 = vmul.f32 %v1279_v19, %v1263_v28  ;;  %v6339_v17 = vpack.c.bf16 %v1844_v27, %v8180_v25  ;;  %v1843_v28 = vld [vmem:[#allocation9 + $0x18] sm:$0x3] }
 0x3ae   : > { %6334 = vmatpush3.bf16.msra.mxu1 %v6331_v50  ;;  %v6727_v3 = vpop.eup %6726  ;;  %v1282_v21 = vadd.f32 1.0, %v6725_v20  ;;  %v6342_v29 = vpack.c.bf16 %v1843_v28, %v8183_v53 }
 0x3af   : > { %6336 = vmatprep.subr.bf16.mxu1 %v6335_v9  ;;  %v1281_v57 = vadd.f32 1.0, %v6727_v3  ;;  %6017 = vmatprep.mubr.msk.f32.mxu1 %vm764_vm6, %v1287_v13 }
 0x3b0   : > { %5465 = vmatmul.mubr.msk.f32.gmra.mrb[26].mxu0 %vm764_vm6, %v1285_v35  ;;  %v1290_v51 = vmul.f32 %v1282_v21, %v1266_v41  ;;  %6341 = vmatprep.subr.msk.bf16.mxu0 %vm7818_vm5, %v6339_v17 }
 0x3b1   : > { %6018 = vmatmul.mubr.msk.f32.gmra.mrb[30].mxu1 %vm764_vm6, %v1288_v33  ;;  %1429 = vmatprep.mubr.f32.mxu0 %v7457_v14  ;;  %v1289_v16 = vmul.f32 %v1281_v57, %v1265_v47 }
 0x3b2   : > { %6338 = vmatpush3.bf16.msra.mxu1 %v6335_v9  ;;  %6344 = vmatpush1.bf16.msk.msra.mxu0 %vm7818_vm5, %v6342_v29 }
 0x3b3   : > { %6035 = vmatprep.subr.msk.mxu1 %vm600_vm2, %v5486_v22  ;;  %6020 = vmatprep.mubr.msk.f32.mxu1 %vm764_vm6, %v1289_v16 }
 0x3b4   : > { %5466 = vmatmul.mubr.msk.f32.gmra.mrb[28].mxu0 %vm764_vm6, %v1286_v63 }
 0x3b5   : > { %6021 = vmatmul.mubr.msk.f32.gmra.mrb[32].mxu1 %vm764_vm6, %v1290_v51  ;;  %1435 = vmatprep.mubr.f32.mxu0 %v7457_v14 }
 0x3b6   : > { %6036 = vmatpush3.msk.msra.mxu1 %vm600_vm2, %v5486_v22  ;;  %6037 = vmatprep.mubr.msk.f32.mxu1 %vm575_vm3, %v7785_v52 }
 0x3b7   : > { %6347 = vmatprep.subr.msk.bf16.mxu1 %vm7818_vm5, %v6345_v23 }
 0x3b8   : > { %5467 = vmatmul.mubr.msk.f32.gmra.mrb[30].mxu0 %vm764_vm6, %v1287_v13 }
 0x3b9   : > { %6038 = vmatmul.mubr.msk.f32.vlgmr.msra.gmra.mrb[34].mxu1 %vm575_vm3, %v7787_v54  ;;  %1441 = vmatprep.mubr.f32.mxu0 %v7457_v14 }
 0x3ba   : > { %6040 = vmatprep.mubr.msk.f32.mxu1 %vm575_vm3, %v7793_v58  ;;  %6350 = vmatpush3.bf16.msk.msra.mxu1 %vm7818_vm5, %v6345_v23 }
 0x3bb   : > { %6352 = vmatprep.subr.bf16.mxu1 %v8200_v8 }
 0x3bc   : > { %5468 = vmatmul.mubr.msk.f32.gmra.mrb[32].mxu0 %vm764_vm6, %v1288_v33 }
 0x3bd   : > { %6041 = vmatmul.mubr.msk.f32.gmra.mrb[36].mxu1 %vm575_vm3, %v7795_v60  ;;  %1447 = vmatprep.mubr.f32.mxu0 %v7457_v14 }
 0x3be   : > { %6043 = vmatprep.mubr.msk.f32.mxu1 %vm575_vm3, %v7801_v0 }
 0x3c0   : > { %5469 = vmatmul.mubr.msk.f32.gmra.mrb[34].mxu0 %vm764_vm6, %v1289_v16 }
 0x3c1   : > { %6044 = vmatmul.mubr.msk.f32.gmra.mrb[38].mxu1 %vm575_vm3, %v7803_v2  ;;  %1453 = vmatprep.mubr.f32.mxu0 %v7457_v14 }
 0x3c2   : > { %6046 = vmatprep.mubr.msk.f32.mxu1 %vm575_vm3, %v7809_v5 }
 0x3c4   : > { %5470 = vmatmul.mubr.msk.f32.gmra.mrb[36].mxu0 %vm764_vm6, %v1290_v51 }
 0x3c5   : > { %6047 = vmatmul.mubr.msk.f32.gmra.mrb[40].mxu1 %vm575_vm3, %v7811_v6  ;;  %1960 = vmatprep.mubr.f32.mxu0 %v7457_v14 }
 0x47b   : > { %v1413_v11 = vpop.f32.mrb[22].mxu0 }
 0x47c   : > { %v1414_v37 = vadd.f32 %v1413_v11, %v8204_v32  ;;  %v1415_v62 = vpop.f32.mrb[23].mxu0  ;;  %v6013_v41 = vpop.f32.mrb[26].mxu1 }
 0x47d   : > { %v1416_v44 = vadd.f32 %v1415_v62, %v8207_v34  ;;  %v1532_v46 = vadd.f32 %v6013_v41, %v1310_v39  ;;  %v1526_v42 = vpop.f32.mrb[27].mxu1 }
 0x47e   : > { %v8212_v47 = vmul.f32 0.5, %v1414_v37  ;;  %v1527_v45 = vadd.f32 %v1526_v42, %v1310_v39 }
 0x47f   : > { %v8214_v40 = vmul.f32 0.5, %v1416_v44  ;;  %v8216_v18 = vmul.f32 0.5, %v1532_v46  ;;  %v1419_v12 = vpop.f32.mrb[24].mxu0 }
 0x480   : > { %6728 = vtanh.f32 %v8212_v47  ;;  %v8219_v43 = vmul.f32 0.5, %v1527_v45  ;;  %v1420_v49 = vadd.f32 %v1419_v12, %v8204_v32  ;;  %v1421_v24 = vpop.f32.mrb[25].mxu0  ;;  %v6016_v1 = vpop.f32.mrb[28].mxu1 }
 0x481   : > { %6730 = vtanh.f32 %v8214_v40  ;;  %v1422_v50 = vadd.f32 %v1421_v24, %v8207_v34  ;;  %v1542_v48 = vadd.f32 %v6016_v1, %v1310_v39  ;;  %v1536_v55 = vpop.f32.mrb[29].mxu1 }
 0x482   : > { %6732 = vtanh.f32 %v8216_v18  ;;  %v8225_v59 = vmul.f32 0.5, %v1420_v49  ;;  %v1537_v31 = vadd.f32 %v1536_v55, %v1310_v39 }
 0x483   : > { %6734 = vtanh.f32 %v8219_v43  ;;  %v8228_v35 = vmul.f32 0.5, %v1422_v50  ;;  %v8230_v61 = vmul.f32 0.5, %v1542_v48  ;;  %v1425_v63 = vpop.f32.mrb[26].mxu0 }
 0x484   : > { %6736 = vtanh.f32 %v8225_v59  ;;  %v8233_v4 = vmul.f32 0.5, %v1537_v31  ;;  %v1426_v9 = vadd.f32 %v1425_v63, %v8204_v32  ;;  %v1427_v19 = vpop.f32.mrb[27].mxu0  ;;  %v6019_v20 = vpop.f32.mrb[30].mxu1  ;;  %v8267_v31 = vld [vmem:[#allocation7] ss:$0 sm:$0xff] }
 0x485   : > { %6738 = vtanh.f32 %v8228_v35  ;;  %v1428_v13 = vadd.f32 %v1427_v19, %v8207_v34  ;;  %v1552_v3 = vadd.f32 %v6019_v20, %v1310_v39  ;;  %v1546_v33 = vpop.f32.mrb[31].mxu1 }
 0x486   : > { %6740 = vtanh.f32 %v8230_v61  ;;  %v8239_v21 = vmul.f32 0.5, %v1426_v9  ;;  %v1547_v57 = vadd.f32 %v1546_v33, %v1310_v39 }
 0x487   : > { %6742 = vtanh.f32 %v8233_v4  ;;  %v8242_v22 = vmul.f32 0.5, %v1428_v13  ;;  %v8244_v16 = vmul.f32 0.5, %v1552_v3  ;;  %v1431_v51 = vpop.f32.mrb[28].mxu0 }
 0x488   : > { %6744 = vtanh.f32 %v8239_v21  ;;  %v8247_v10 = vmul.f32 0.5, %v1547_v57  ;;  %v1432_v23 = vadd.f32 %v1431_v51, %v8204_v32  ;;  %v1433_v27 = vpop.f32.mrb[29].mxu0  ;;  %v6022_v17 = vpop.f32.mrb[32].mxu1 }
 0x489   : > { %6746 = vtanh.f32 %v8242_v22  ;;  %v1434_v28 = vadd.f32 %v1433_v27, %v8207_v34  ;;  %v1562_v29 = vadd.f32 %v6022_v17, %v1310_v39  ;;  %v1556_v15 = vpop.f32.mrb[33].mxu1 }
 0x48a   : > { %v6729_v26 = vpop.eup %6728  ;;  %6748 = vtanh.f32 %v8244_v16  ;;  %v8253_v30 = vmul.f32 0.5, %v1432_v23  ;;  %v1557_v11 = vadd.f32 %v1556_v15, %v1310_v39 }
 0x48b   : > { %v6731_v37 = vpop.eup %6730  ;;  %v1613_v62 = vadd.f32 1.0, %v6729_v26  ;;  %6750 = vtanh.f32 %v8247_v10  ;;  %v8256_v41 = vmul.f32 0.5, %v1434_v28  ;;  %v8258_v44 = vmul.f32 0.5, %v1562_v29  ;;  %v1437_v46 = vpop.f32.mrb[30].mxu0 }
 0x48c   : > { %v6733_v42 = vpop.eup %6732  ;;  %v1614_v45 = vadd.f32 1.0, %v6731_v37  ;;  %6752 = vtanh.f32 %v8253_v30  ;;  %v8261_v12 = vmul.f32 0.5, %v1557_v11  ;;  %v1438_v49 = vadd.f32 %v1437_v46, %v8204_v32  ;;  %v1439_v24 = vpop.f32.mrb[31].mxu0 }
 0x48d   : > { %v6039_v39 = vpop.f32.mrb[34].mxu1  ;;  %v6735_v1 = vpop.eup %6734  ;;  %v1637_v50 = vmul.f32 %v1613_v62, %v8212_v47  ;;  %v1618_v48 = vadd.f32 1.0, %v6733_v42  ;;  %6754 = vtanh.f32 %v8256_v41  ;;  %v1440_v55 = vadd.f32 %v1439_v24, %v8207_v34 }
 0x48e   : > { %v1769_v63 = vpop.f32.mrb[35].mxu1  ;;  %v6737_v9 = vpop.eup %6736  ;;  %v1638_v19 = vmul.f32 %v1614_v45, %v8214_v40  ;;  %v1615_v20 = vadd.f32 1.0, %v6735_v1  ;;  %6756 = vtanh.f32 %v8258_v44  ;;  %v8271_v13 = vmul.f32 0.5, %v1438_v49 }
 0x48f   : > { %v6739_v3 = vpop.eup %6738  ;;  %1661 = vst [vmem:[%s8003_s21 + $0x18] sm:$0xff] %v1637_v50  ;;  %v1642_v47 = vmul.f32 %v1618_v48, %v8216_v18  ;;  %v1616_v33 = vadd.f32 1.0, %v6737_v9  ;;  %6758 = vtanh.f32 %v8261_v12  ;;  %v8276_v57 = vmul.f32 0.5, %v1440_v55  ;;  %v1443_v51 = vpop.f32.mrb[32].mxu0 }
 0x490   : > { %v6741_v23 = vpop.eup %6740  ;;  %1662 = vst [vmem:[%s8003_s21 + $0x20] sm:$0xff] %v1638_v19  ;;  %v1639_v40 = vmul.f32 %v1615_v20, %v8219_v43  ;;  %v1617_v27 = vadd.f32 1.0, %v6739_v3  ;;  %6760 = vtanh.f32 %v8271_v13  ;;  %v1775_v17 = vadd.f32 %v6039_v39, %v8267_v31  ;;  %v1445_v28 = vpop.f32.mrb[33].mxu0 }
 0x491   : > { %v6042_v29 = vpop.f32.mrb[36].mxu1  ;;  %v6743_v18 = vpop.eup %6742  ;;  %1666 = vst [vmem:[%s8003_s21 + $0xe8] sm:$0xff] %v1642_v47  ;;  %v1640_v15 = vmul.f32 %v1616_v33, %v8225_v59  ;;  %v1624_v26 = vadd.f32 1.0, %v6741_v23  ;;  %6762 = vtanh.f32 %v8276_v57  ;;  %v1770_v11 = vadd.f32 %v8267_v31, %v1769_v63 }
 0x492   : > { %v1779_v37 = vpop.f32.mrb[37].mxu1  ;;  %v6745_v43 = vpop.eup %6744  ;;  %1663 = vst [vmem:[%s8003_s21 + $0x28] sm:$0xff] %v1639_v40  ;;  %v1641_v62 = vmul.f32 %v1617_v27, %v8228_v35  ;;  %v1621_v46 = vadd.f32 1.0, %v6743_v18  ;;  %v8288_v42 = vmul.f32 0.5, %v1775_v17  ;;  %v1444_v45 = vadd.f32 %v1443_v51, %v8204_v32 }
 0x493   : > { %v6747_v49 = vpop.eup %6746  ;;  %1664 = vst [vmem:[%s8003_s21 + $0xd8] sm:$0xff] %v1640_v15  ;;  %v1648_v59 = vmul.f32 %v1624_v26, %v8230_v61  ;;  %v1619_v24 = vadd.f32 1.0, %v6745_v43  ;;  %v8293_v39 = vmul.f32 0.5, %v1770_v11  ;;  %v1446_v1 = vadd.f32 %v1445_v28, %v8207_v34  ;;  %v1449_v50 = vpop.f32.mrb[34].mxu0 }
 0x494   : > { %v6749_v48 = vpop.eup %6748  ;;  %1665 = vst [vmem:[%s8003_s21 + $0xe0] sm:$0xff] %v1641_v62  ;;  %v1645_v35 = vmul.f32 %v1621_v46, %v8233_v4  ;;  %v1620_v55 = vadd.f32 1.0, %v6747_v49  ;;  %6764 = vtanh.f32 %v8288_v42  ;;  %v8299_v63 = vmul.f32 0.5, %v1444_v45  ;;  %v1451_v9 = vpop.f32.mrb[35].mxu0 }
 0x495   : > { %v6045_v19 = vpop.f32.mrb[38].mxu1  ;;  %v6751_v61 = vpop.eup %6750  ;;  %1672 = vst [vmem:[%s8003_s21 + $0x268] sm:$0xff] %v1648_v59  ;;  %v1643_v20 = vmul.f32 %v1619_v24, %v8239_v21  ;;  %v1630_v3 = vadd.f32 1.0, %v6749_v48  ;;  %6766 = vtanh.f32 %v8293_v39  ;;  %v8304_v47 = vmul.f32 0.5, %v1446_v1 }
 0x496   : > { %v1789_v33 = vpop.f32.mrb[39].mxu1  ;;  %v6753_v4 = vpop.eup %6752  ;;  %1669 = vst [vmem:[%s8003_s21 + $0x1a8] sm:$0xff] %v1645_v35  ;;  %v1644_v51 = vmul.f32 %v1620_v55, %v8242_v22  ;;  %v1627_v23 = vadd.f32 1.0, %v6751_v61  ;;  %6768 = vtanh.f32 %v8299_v63  ;;  %v1785_v40 = vadd.f32 %v6042_v29, %v8267_v31 }
 0x497   : > { %v6755_v27 = vpop.eup %6754  ;;  %1667 = vst [vmem:[%s8003_s21 + $0x198] sm:$0xff] %v1643_v20  ;;  %v1654_v21 = vmul.f32 %v1630_v3, %v8244_v16  ;;  %v1622_v17 = vadd.f32 1.0, %v6753_v4  ;;  %6770 = vtanh.f32 %v8304_v47  ;;  %v1780_v28 = vadd.f32 %v8267_v31, %v1779_v37  ;;  %v1455_v18 = vpop.f32.mrb[36].mxu0 }
 0x498   : > { %v6757_v15 = vpop.eup %6756  ;;  %1668 = vst [vmem:[%s8003_s21 + $0x1a0] sm:$0xff] %v1644_v51  ;;  %v1651_v22 = vmul.f32 %v1627_v23, %v8247_v10  ;;  %v1623_v26 = vadd.f32 1.0, %v6755_v27  ;;  %v8316_v11 = vmul.f32 0.5, %v1785_v40  ;;  %v1450_v29 = vadd.f32 %v1449_v50, %v8204_v32  ;;  %v1457_v43 = vpop.f32.mrb[37].mxu0 }
 0x499   : > { %v6048_v62 = vpop.f32.mrb[40].mxu1  ;;  %v6759_v16 = vpop.eup %6758  ;;  %1678 = vst [vmem:[%s8003_s21 + $0x3e8] sm:$0xff] %v1654_v21  ;;  %v1646_v46 = vmul.f32 %v1622_v17, %v8253_v30  ;;  %v1636_v45 = vadd.f32 1.0, %v6757_v15  ;;  %v8321_v37 = vmul.f32 0.5, %v1780_v28  ;;  %v1452_v49 = vadd.f32 %v1451_v9, %v8207_v34 }
 0x49a   : > { %v1799_v59 = vpop.f32.mrb[41].mxu1  ;;  %v6761_v10 = vpop.eup %6760  ;;  %1675 = vst [vmem:[%s8003_s21 + $0x328] sm:$0xff] %v1651_v22  ;;  %v1647_v24 = vmul.f32 %v1623_v26, %v8256_v41  ;;  %v1633_v1 = vadd.f32 1.0, %v6759_v16  ;;  %6772 = vtanh.f32 %v8316_v11  ;;  %v8327_v50 = vmul.f32 0.5, %v1450_v29 }
 0x49b   : > { %v6763_v48 = vpop.eup %6762  ;;  %1670 = vst [vmem:[%s8003_s21 + $0x258] sm:$0xff] %v1646_v46  ;;  %v1660_v30 = vmul.f32 %v1636_v45, %v8258_v44  ;;  %v1625_v35 = vadd.f32 1.0, %v6761_v10  ;;  %6774 = vtanh.f32 %v8321_v37  ;;  %v8332_v55 = vmul.f32 0.5, %v1452_v49 }
 0x49c   : > { %1671 = vst [vmem:[%s8003_s21 + $0x260] sm:$0xff] %v1647_v24  ;;  %v1657_v9 = vmul.f32 %v1633_v1, %v8261_v12  ;;  %v1626_v41 = vadd.f32 1.0, %v6763_v48  ;;  %6776 = vtanh.f32 %v8327_v50  ;;  %v1795_v61 = vadd.f32 %v6045_v19, %v8267_v31 }
 0x49d   : > { %1684 = vst [vmem:[%s8003_s21 + $0x568] sm:$0xff] %v1660_v30  ;;  %v1649_v20 = vmul.f32 %v1625_v35, %v8271_v13  ;;  %6778 = vtanh.f32 %v8332_v55  ;;  %v1790_v44 = vadd.f32 %v8267_v31, %v1789_v33  ;;  %v1456_v3 = vadd.f32 %v1455_v18, %v8204_v32  ;;  %v5519_v18 = vld [vmem:[%s10164_s3 + $0xc0] sm:$0xff] }
 0x49e   : > { %v6765_v4 = vpop.eup %6764  ;;  %1681 = vst [vmem:[%s8003_s21 + $0x4a8] sm:$0xff] %v1657_v9  ;;  %v1650_v12 = vmul.f32 %v1626_v41, %v8276_v57  ;;  %v8345_v51 = vmul.f32 0.5, %v1795_v61  ;;  %v1458_v23 = vadd.f32 %v1457_v43, %v8207_v34  ;;  %v1805_v19 = vadd.f32 %v6048_v62, %v8267_v31  ;;  %v5518_v34 = vld [vmem:[%s10164_s3 + $0xb8] sm:$0xff] }
 0x49f   : > { %v6767_v40 = vpop.eup %6766  ;;  %1673 = vst [vmem:[%s8003_s21 + $0x318] sm:$0xff] %v1649_v20  ;;  %v1825_v13 = vadd.f32 1.0, %v6765_v4  ;;  %v8350_v27 = vmul.f32 0.5, %v1790_v44  ;;  %v8352_v21 = vmul.f32 0.5, %v1456_v3  ;;  %v1800_v33 = vadd.f32 %v8267_v31, %v1799_v59 }
 0x4a0   : > { %v6769_v32 = vpop.eup %6768  ;;  %1674 = vst [vmem:[%s8003_s21 + $0x320] sm:$0xff] %v1650_v12  ;;  %v1824_v17 = vadd.f32 1.0, %v6767_v40  ;;  %6780 = vtanh.f32 %v8345_v51  ;;  %v8357_v57 = vmul.f32 0.5, %v1458_v23  ;;  %v8359_v28 = vmul.f32 0.5, %v1805_v19 }
 0x4a1   : > { %v6771_v15 = vpop.eup %6770  ;;  %v1628_v22 = vadd.f32 1.0, %v6769_v32  ;;  %6782 = vtanh.f32 %v8350_v27  ;;  %v8368_v26 = vmul.f32 0.5, %v1800_v33  ;;  %v1833_v62 = vmul.f32 %v1825_v13, %v8288_v42  ;;  %v5521_v42 = vld [vmem:[%s10164_s3 + $0xd0] sm:$0xff] }
 0x4a2   : > { %v1832_v29 = vmul.f32 %v1824_v17, %v8293_v39  ;;  %v1629_v43 = vadd.f32 1.0, %v6771_v15  ;;  %6784 = vtanh.f32 %v8352_v21  ;;  %v6355_v46 = vpack.c.bf16 %v5519_v18, %v5518_v34  ;;  %v5520_v39 = vld [vmem:[%s10164_s3 + $0xc8] sm:$0xff]  ;;  %v2393_v34 = vld [vmem:[#allocation9 + $0x20] sm:$0x3]  ;;  %v2392_v15 = vld [vmem:[#allocation9 + $0x18] sm:$0x3] }
 0x4a3   : > { %v1652_v16 = vmul.f32 %v1628_v22, %v8299_v63  ;;  %6786 = vtanh.f32 %v8357_v57  ;;  %v6359_v48 = vpack.c.bf16 %v5521_v42, %v5520_v39  ;;  %v6363_v18 = vpack.c.bf16 %v2393_v34, %v8180_v25  ;;  %v5553_v25 = vld [vmem:[%s10164_s3 + $0xe8] sm:$0xff] }
 0x4a4   : > { %v6773_v45 = vpop.eup %6772  ;;  %v1653_v49 = vmul.f32 %v1629_v43, %v8304_v47  ;;  %6788 = vtanh.f32 %v8359_v28  ;;  %5499 = vmatmul.mubr.msk.f32.vlgmr.msra.gmra.mrb[38].mxu0 %vm764_vm6, %v1832_v29  ;;  %6053 = vmatprep.mubr.msk.f32.mxu1 %vm764_vm6, %v1832_v29  ;;  %v6366_v22 = vpack.c.bf16 %v2392_v15, %v8183_v53  ;;  %v1846_v53 = vld [vmem:[#allocation10] sm:$0x7] }
 0x4a5   : > { %v6775_v63 = vpop.eup %6774  ;;  %1676 = vst [vmem:[%s8003_s21 + $0x3d8] sm:$0xff] %v1652_v16  ;;  %v1827_v59 = vadd.f32 1.0, %v6773_v45  ;;  %6790 = vtanh.f32 %v8368_v26  ;;  %6054 = vmatmul.mubr.msk.f32.vlgmr.msra.gmra.mrb[42].mxu1 %vm764_vm6, %v1833_v62  ;;  %1966 = vmatprep.mubr.f32.mxu0 %v7457_v14  ;;  %v8469_v43 = vrot.slane %v1846_v53, %v7941_v36  ;;  %v8475_v16 = vrot.slane %v1846_v53, %v7959_v56 }
 0x4a6   : > { %v6777_v47 = vpop.eup %6776  ;;  %1677 = vst [vmem:[%s8003_s21 + $0x3e0] sm:$0xff] %v1653_v49  ;;  %v1826_v10 = vadd.f32 1.0, %v6775_v63  ;;  %6354 = vmatpush3.bf16.msra.mxu1 %v8200_v8  ;;  %6365 = vmatprep.subr.msk.bf16.mxu0 %vm7818_vm5, %v6363_v18 }
 0x4a7   : > { %v6779_v24 = vpop.eup %6778  ;;  %v1631_v1 = vadd.f32 1.0, %v6777_v47  ;;  %6356 = vmatprep.subr.bf16.mxu1 %v6355_v46  ;;  %v1835_v9 = vmul.f32 %v1827_v59, %v8316_v11  ;;  %v5522_v11 = vld [vmem:[%s10164_s3 + $0xd8] sm:$0x3]  ;;  %6368 = vmatpush1.bf16.msk.msra.mxu0 %vm7818_vm5, %v6366_v22 }
 0x4a8   : > { %v1834_v30 = vmul.f32 %v1826_v10, %v8321_v37  ;;  %v1632_v35 = vadd.f32 1.0, %v6779_v24  ;;  %5500 = vmatmul.mubr.msk.f32.gmra.mrb[40].mxu0 %vm764_vm6, %v1833_v62  ;;  %v8472_v62 = vrot.slane %v1846_v53, %v7943_v38 }
 0x4a9   : > { %v1655_v41 = vmul.f32 %v1631_v1, %v8327_v50  ;;  %1972 = vmatprep.mubr.f32.mxu0 %v7457_v14 }
 0x4aa   : > { %v6781_v61 = vpop.eup %6780  ;;  %v1656_v8 = vmul.f32 %v1632_v35, %v8332_v55  ;;  %6056 = vmatprep.mubr.msk.f32.mxu1 %vm764_vm6, %v1834_v30  ;;  %6358 = vmatpush3.bf16.msra.mxu1 %v6355_v46 }
 0x4ab   : > { %v6783_v20 = vpop.eup %6782  ;;  %1679 = vst [vmem:[%s8003_s21 + $0x498] sm:$0xff] %v1655_v41  ;;  %v1829_v44 = vadd.f32 1.0, %v6781_v61  ;;  %6057 = vmatmul.mubr.msk.f32.gmra.mrb[44].mxu1 %vm764_vm6, %v1835_v9  ;;  %6360 = vmatprep.subr.bf16.mxu1 %v6359_v48 }
 0x4ac   : > { %v6785_v37 = vpop.eup %6784  ;;  %1680 = vst [vmem:[%s8003_s21 + $0x4a0] sm:$0xff] %v1656_v8  ;;  %v1828_v3 = vadd.f32 1.0, %v6783_v20  ;;  %5501 = vmatmul.mubr.msk.f32.gmra.mrb[42].mxu0 %vm764_vm6, %v1834_v30 }
 0x4ad   : > { %v6787_v50 = vpop.eup %6786  ;;  %v1634_v55 = vadd.f32 1.0, %v6785_v37  ;;  %1978 = vmatprep.mubr.f32.mxu0 %v7457_v14  ;;  %v1837_v40 = vmul.f32 %v1829_v44, %v8345_v51 }
 0x4ae   : > { %v6789_v4 = vpop.eup %6788  ;;  %v1836_v12 = vmul.f32 %v1828_v3, %v8350_v27  ;;  %v1635_v23 = vadd.f32 1.0, %v6787_v50  ;;  %6362 = vmatpush3.bf16.msra.mxu1 %v6359_v48 }
 0x4af   : > { %v6791_v19 = vpop.eup %6790  ;;  %v1658_v13 = vmul.f32 %v1634_v55, %v8352_v21  ;;  %v1831_v33 = vadd.f32 1.0, %v6789_v4  ;;  %6077 = vmatprep.subr.msk.mxu1 %vm600_vm2, %v5522_v11  ;;  %v8446_v21 = vld [vmem:[#allocation9 + $0x10] sm:$0xff] }
 0x4b0   : > { %v1659_v32 = vmul.f32 %v1635_v23, %v8357_v57  ;;  %v1830_v17 = vadd.f32 1.0, %v6791_v19  ;;  %6059 = vmatprep.mubr.msk.f32.mxu1 %vm764_vm6, %v1836_v12  ;;  %5502 = vmatmul.mubr.msk.f32.gmra.mrb[44].mxu0 %vm764_vm6, %v1835_v9  ;;  %v2394_v57 = vld [vmem:[#allocation9 + $0x28] sm:$0x3] }
 0x4b1   : > { %1682 = vst [vmem:[%s8003_s21 + $0x558] sm:$0xff] %v1658_v13  ;;  %6060 = vmatmul.mubr.msk.f32.gmra.mrb[46].mxu1 %vm764_vm6, %v1837_v40  ;;  %1984 = vmatprep.mubr.f32.mxu0 %v7457_v14  ;;  %v1839_v27 = vmul.f32 %v1831_v33, %v8359_v28  ;;  %v6369_v28 = vpack.c.bf16 %v2394_v57, %v8446_v21 }
 0x4b2   : > { %1683 = vst [vmem:[%s8003_s21 + $0x560] sm:$0xff] %v1659_v32  ;;  %v1838_v51 = vmul.f32 %v1830_v17, %v8368_v26  ;;  %6078 = vmatpush3.msk.msra.mxu1 %vm600_vm2, %v5522_v11  ;;  %v5552_v26 = vld [vmem:[%s10164_s3 + $0xe0] sm:$0xff] }
 0x4b3   : > { %6371 = vmatprep.subr.msk.bf16.mxu1 %vm7818_vm5, %v6369_v28  ;;  %v8465_v29 = vpack.c.bf16 %v5553_v25, %v5552_v26 }
 0x4b4   : > { %6062 = vmatprep.mubr.msk.f32.mxu1 %vm764_vm6, %v1838_v51  ;;  %5503 = vmatmul.mubr.msk.f32.gmra.mrb[46].mxu0 %vm764_vm6, %v1836_v12 }
 0x4b5   : > { %6063 = vmatmul.mubr.msk.f32.gmra.mrb[48].mxu1 %vm764_vm6, %v1839_v27  ;;  %1990 = vmatprep.mubr.f32.mxu0 %v7457_v14 }
 0x4b6   : > { %6079 = vmatprep.mubr.msk.f32.mxu1 %vm575_vm3, %v7785_v52 }
 0x4b8   : > { %5504 = vmatmul.mubr.msk.f32.gmra.mrb[48].mxu0 %vm764_vm6, %v1837_v40 }
 0x4b9   : > { %6080 = vmatmul.mubr.msk.f32.vlgmr.msra.gmra.mrb[50].mxu1 %vm575_vm3, %v7787_v54  ;;  %1996 = vmatprep.mubr.f32.mxu0 %v7457_v14 }
 0x4ba   : > { %6082 = vmatprep.mubr.msk.f32.mxu1 %vm575_vm3, %v7793_v58  ;;  %6374 = vmatpush3.bf16.msk.msra.mxu1 %vm7818_vm5, %v6369_v28 }
 0x4bb   : > { %6376 = vmatprep.subr.bf16.mxu1 %v8465_v29 }
 0x4bc   : > { %5505 = vmatmul.mubr.msk.f32.gmra.mrb[50].mxu0 %vm764_vm6, %v1838_v51 }
 0x4bd   : > { %6083 = vmatmul.mubr.msk.f32.gmra.mrb[52].mxu1 %vm575_vm3, %v7795_v60  ;;  %2002 = vmatprep.mubr.f32.mxu0 %v7457_v14 }
 0x4be   : > { %6085 = vmatprep.mubr.msk.f32.mxu1 %vm575_vm3, %v7801_v0 }
 0x4c0   : > { %5506 = vmatmul.mubr.msk.f32.gmra.mrb[52].mxu0 %vm764_vm6, %v1839_v27 }
 0x4c1   : > { %6086 = vmatmul.mubr.msk.f32.gmra.mrb[54].mxu1 %vm575_vm3, %v7803_v2  ;;  %2509 = vmatprep.mubr.f32.mxu0 %v7457_v14 }
 0x4c2   : > { %6088 = vmatprep.mubr.msk.f32.mxu1 %vm575_vm3, %v7809_v5 }
 0x4c5   : > { %6089 = vmatmul.mubr.msk.f32.gmra.mrb[56].mxu1 %vm575_vm3, %v7811_v6 }
 0x577   : > { %v1962_v46 = vpop.f32.mrb[38].mxu0 }
 0x578   : > { %v1963_v45 = vadd.f32 %v1962_v46, %v8469_v43  ;;  %v1964_v49 = vpop.f32.mrb[39].mxu0  ;;  %v6055_v39 = vpop.f32.mrb[42].mxu1 }
 0x579   : > { %v1965_v42 = vadd.f32 %v1964_v49, %v8472_v62  ;;  %v2081_v63 = vadd.f32 %v6055_v39, %v8475_v16  ;;  %v2075_v59 = vpop.f32.mrb[43].mxu1 }
 0x57a   : > { %v2114_v47 = vmul.f32 0.5, %v1963_v45  ;;  %v2076_v10 = vadd.f32 %v2075_v59, %v8475_v16 }
 0x57b   : > { %v2115_v24 = vmul.f32 0.5, %v1965_v42  ;;  %v8481_v1 = vmul.f32 0.5, %v2081_v63  ;;  %v1968_v48 = vpop.f32.mrb[40].mxu0 }
 0x57c   : > { %6792 = vtanh.f32 %v2114_v47  ;;  %v8483_v30 = vmul.f32 0.5, %v2076_v10  ;;  %v1969_v35 = vadd.f32 %v1968_v48, %v8469_v43  ;;  %v1970_v9 = vpop.f32.mrb[41].mxu0 }
 0x57d   : > { %6794 = vtanh.f32 %v2115_v24  ;;  %v1971_v41 = vadd.f32 %v1970_v9, %v8472_v62 }
 0x57e   : > { %6796 = vtanh.f32 %v8481_v1  ;;  %v8488_v61 = vmul.f32 0.5, %v1969_v35  ;;  %v6058_v8 = vpop.f32.mrb[44].mxu1 }
 0x57f   : > { %6798 = vtanh.f32 %v8483_v30  ;;  %v8491_v20 = vmul.f32 0.5, %v1971_v41  ;;  %v2091_v44 = vadd.f32 %v6058_v8, %v8475_v16  ;;  %v2085_v37 = vpop.f32.mrb[45].mxu1  ;;  %v1974_v3 = vpop.f32.mrb[42].mxu0 }
 0x580   : > { %6800 = vtanh.f32 %v8488_v61  ;;  %v2086_v11 = vadd.f32 %v2085_v37, %v8475_v16  ;;  %v1975_v50 = vadd.f32 %v1974_v3, %v8469_v43  ;;  %v1976_v55 = vpop.f32.mrb[43].mxu0 }
 0x581   : > { %6802 = vtanh.f32 %v8491_v20  ;;  %v8498_v4 = vmul.f32 0.5, %v2091_v44  ;;  %v1977_v12 = vadd.f32 %v1976_v55, %v8472_v62 }
 0x582   : > { %v8501_v23 = vmul.f32 0.5, %v2086_v11  ;;  %v8503_v19 = vmul.f32 0.5, %v1975_v50 }
 0x583   : > { %6804 = vtanh.f32 %v8498_v4  ;;  %v8506_v40 = vmul.f32 0.5, %v1977_v12  ;;  %v1980_v13 = vpop.f32.mrb[44].mxu0 }
 0x584   : > { %6806 = vtanh.f32 %v8501_v23  ;;  %v6061_v33 = vpop.f32.mrb[46].mxu1  ;;  %v1981_v32 = vadd.f32 %v1980_v13, %v8469_v43  ;;  %v1982_v17 = vpop.f32.mrb[45].mxu0 }
 0x585   : > { %6808 = vtanh.f32 %v8503_v19  ;;  %v2101_v51 = vadd.f32 %v6061_v33, %v8475_v16  ;;  %v2095_v27 = vpop.f32.mrb[47].mxu1  ;;  %v1983_v57 = vadd.f32 %v1982_v17, %v8472_v62 }
 0x586   : > { %v6793_v28 = vpop.eup %6792  ;;  %6810 = vtanh.f32 %v8506_v40  ;;  %v2096_v34 = vadd.f32 %v2095_v27, %v8475_v16  ;;  %v8515_v18 = vmul.f32 0.5, %v1981_v32 }
 0x587   : > { %v6795_v15 = vpop.eup %6794  ;;  %v2162_v22 = vadd.f32 1.0, %v6793_v28  ;;  %v8517_v26 = vmul.f32 0.5, %v2101_v51  ;;  %v8519_v25 = vmul.f32 0.5, %v1983_v57  ;;  %v1986_v53 = vpop.f32.mrb[46].mxu0 }
 0x588   : > { %v6797_v46 = vpop.eup %6796  ;;  %v2163_v45 = vadd.f32 1.0, %v6795_v15  ;;  %v8521_v49 = vmul.f32 0.5, %v2096_v34  ;;  %6812 = vtanh.f32 %v8515_v18  ;;  %v6064_v39 = vpop.f32.mrb[48].mxu1  ;;  %v1987_v42 = vadd.f32 %v1986_v53, %v8469_v43 }
 0x589   : > { %v1988_v63 = vpop.f32.mrb[47].mxu0  ;;  %v6799_v59 = vpop.eup %6798  ;;  %v2186_v10 = vmul.f32 %v2162_v22, %v2114_v47  ;;  %v2167_v48 = vadd.f32 1.0, %v6797_v46  ;;  %6814 = vtanh.f32 %v8517_v26  ;;  %v2111_v35 = vadd.f32 %v6064_v39, %v8475_v16 }
 0x58a   : > { %v2105_v9 = vpop.f32.mrb[49].mxu1  ;;  %v6801_v41 = vpop.eup %6800  ;;  %v2187_v8 = vmul.f32 %v2163_v45, %v2115_v24  ;;  %v2164_v44 = vadd.f32 1.0, %v6799_v59  ;;  %6816 = vtanh.f32 %v8521_v49  ;;  %v8538_v33 = vmul.f32 0.5, %v1987_v42 }
 0x58b   : > { %v2106_v37 = vadd.f32 %v2105_v9, %v8475_v16  ;;  %v6803_v3 = vpop.eup %6802  ;;  %2210 = vst [vmem:[%s8003_s21 + $0x30] sm:$0xff] %v2186_v10  ;;  %v2191_v11 = vmul.f32 %v2167_v48, %v8481_v1  ;;  %v2165_v47 = vadd.f32 1.0, %v6801_v41  ;;  %6818 = vtanh.f32 %v8519_v25  ;;  %v1992_v55 = vpop.f32.mrb[48].mxu0 }
 0x58c   : > { %v8532_v50 = vmul.f32 0.5, %v2111_v35  ;;  %2211 = vst [vmem:[%s8003_s21 + $0x38] sm:$0xff] %v2187_v8  ;;  %v2188_v24 = vmul.f32 %v2164_v44, %v8483_v30  ;;  %v2166_v12 = vadd.f32 1.0, %v6803_v3  ;;  %v6081_v16 = vpop.f32.mrb[50].mxu1  ;;  %v1994_v32 = vpop.f32.mrb[49].mxu0  ;;  %v1989_v51 = vadd.f32 %v1988_v63, %v8472_v62 }
 0x58d   : > { %v8536_v13 = vmul.f32 0.5, %v2106_v37  ;;  %v6805_v17 = vpop.eup %6804  ;;  %2215 = vst [vmem:[%s8003_s21 + $0x100] sm:$0xff] %v2191_v11  ;;  %v2189_v1 = vmul.f32 %v2165_v47, %v8488_v61  ;;  %v2324_v27 = vadd.f32 %v6081_v16, %v8267_v31  ;;  %v2318_v30 = vpop.f32.mrb[51].mxu1  ;;  %v1993_v59 = vadd.f32 %v1992_v55, %v8469_v43 }
 0x58e   : > { %6820 = vtanh.f32 %v8532_v50  ;;  %v6807_v57 = vpop.eup %6806  ;;  %2212 = vst [vmem:[%s8003_s21 + $0x40] sm:$0xff] %v2188_v24  ;;  %v2190_v28 = vmul.f32 %v2166_v12, %v8491_v20  ;;  %v2173_v34 = vadd.f32 1.0, %v6805_v17  ;;  %v2319_v15 = vadd.f32 %v8267_v31, %v2318_v30 }
 0x58f   : > { %6822 = vtanh.f32 %v8536_v13  ;;  %v6809_v22 = vpop.eup %6808  ;;  %2213 = vst [vmem:[%s8003_s21 + $0xf0] sm:$0xff] %v2189_v1  ;;  %v2170_v61 = vadd.f32 1.0, %v6807_v57  ;;  %v8551_v53 = vmul.f32 0.5, %v1989_v51  ;;  %v8553_v46 = vmul.f32 0.5, %v2324_v27  ;;  %v1998_v45 = vpop.f32.mrb[50].mxu0 }
 0x590   : > { %6824 = vtanh.f32 %v8538_v33  ;;  %v6811_v39 = vpop.eup %6810  ;;  %2214 = vst [vmem:[%s8003_s21 + $0xf8] sm:$0xff] %v2190_v28  ;;  %v2197_v20 = vmul.f32 %v2173_v34, %v8498_v4  ;;  %v2168_v42 = vadd.f32 1.0, %v6809_v22  ;;  %v8557_v63 = vmul.f32 0.5, %v2319_v15  ;;  %v6084_v10 = vpop.f32.mrb[52].mxu1 }
 0x591   : > { %v2000_v48 = vpop.f32.mrb[51].mxu0  ;;  %v2194_v35 = vmul.f32 %v2170_v61, %v8501_v23  ;;  %v2169_v9 = vadd.f32 1.0, %v6811_v39  ;;  %6826 = vtanh.f32 %v8551_v53  ;;  %v1995_v41 = vadd.f32 %v1994_v32, %v8472_v62  ;;  %v2328_v8 = vpop.f32.mrb[53].mxu1 }
 0x592   : > { %v6813_v44 = vpop.eup %6812  ;;  %2221 = vst [vmem:[%s8003_s21 + $0x280] sm:$0xff] %v2197_v20  ;;  %v2192_v4 = vmul.f32 %v2168_v42, %v8503_v19  ;;  %6828 = vtanh.f32 %v8553_v46  ;;  %v8566_v37 = vmul.f32 0.5, %v1993_v59  ;;  %v2334_v3 = vadd.f32 %v6084_v10, %v8267_v31 }
 0x593   : > { %v6815_v11 = vpop.eup %6814  ;;  %2218 = vst [vmem:[%s8003_s21 + $0x1c0] sm:$0xff] %v2194_v35  ;;  %v2193_v23 = vmul.f32 %v2169_v9, %v8506_v40  ;;  %v2171_v47 = vadd.f32 1.0, %v6813_v44  ;;  %6830 = vtanh.f32 %v8557_v63  ;;  %v8572_v55 = vmul.f32 0.5, %v1995_v41  ;;  %v2004_v24 = vpop.f32.mrb[52].mxu0 }
 0x594   : > { %v6817_v12 = vpop.eup %6816  ;;  %2216 = vst [vmem:[%s8003_s21 + $0x1b0] sm:$0xff] %v2192_v4  ;;  %v2179_v19 = vadd.f32 1.0, %v6815_v11  ;;  %6832 = vtanh.f32 %v8566_v37  ;;  %v8576_v16 = vmul.f32 0.5, %v2334_v3  ;;  %v2329_v32 = vadd.f32 %v8267_v31, %v2328_v8  ;;  %v6087_v17 = vpop.f32.mrb[54].mxu1 }
 0x595   : > { %v2006_v1 = vpop.f32.mrb[53].mxu0  ;;  %v6819_v51 = vpop.eup %6818  ;;  %2217 = vst [vmem:[%s8003_s21 + $0x1b8] sm:$0xff] %v2193_v23  ;;  %v2176_v40 = vadd.f32 1.0, %v6817_v12  ;;  %v2195_v27 = vmul.f32 %v2171_v47, %v8515_v18  ;;  %6834 = vtanh.f32 %v8572_v55  ;;  %v1999_v30 = vadd.f32 %v1998_v45, %v8469_v43 }
 0x596   : > { %v2338_v57 = vpop.f32.mrb[55].mxu1  ;;  %v2203_v28 = vmul.f32 %v2179_v19, %v8517_v26  ;;  %v2172_v34 = vadd.f32 1.0, %v6819_v51  ;;  %6836 = vtanh.f32 %v8576_v16  ;;  %v8585_v15 = vmul.f32 0.5, %v2329_v32 }
 0x597   : > { %v2200_v61 = vmul.f32 %v2176_v40, %v8521_v49  ;;  %2219 = vst [vmem:[%s8003_s21 + $0x270] sm:$0xff] %v2195_v27  ;;  %v8589_v39 = vmul.f32 0.5, %v1999_v30  ;;  %v2001_v18 = vadd.f32 %v2000_v48, %v8472_v62  ;;  %v2344_v45 = vadd.f32 %v6087_v17, %v8267_v31  ;;  %v5554_v40 = vld [vmem:[%s10164_s3 + $0xf0] sm:$0xff]  ;;  %v5555_v27 = vld [vmem:[%s10164_s3 + $0xf8] sm:$0xff] }
 0x598   : > { %v6821_v22 = vpop.eup %6820  ;;  %2227 = vst [vmem:[%s8003_s21 + $0x400] sm:$0xff] %v2203_v28  ;;  %v2196_v26 = vmul.f32 %v2172_v34, %v8519_v25  ;;  %6838 = vtanh.f32 %v8585_v15  ;;  %v2339_v59 = vadd.f32 %v8267_v31, %v2338_v57  ;;  %v6090_v10 = vpop.f32.mrb[56].mxu1  ;;  %v2005_v4 = vadd.f32 %v2004_v24, %v8469_v43 }
 0x599   : > { %v6823_v20 = vpop.eup %6822  ;;  %v2185_v42 = vadd.f32 1.0, %v6821_v22  ;;  %2224 = vst [vmem:[%s8003_s21 + $0x340] sm:$0xff] %v2200_v61  ;;  %6840 = vtanh.f32 %v8589_v39  ;;  %v8599_v48 = vmul.f32 0.5, %v2001_v18  ;;  %v8601_v9 = vmul.f32 0.5, %v2344_v45  ;;  %v2348_v41 = vpop.f32.mrb[57].mxu1 }
 0x59a   : > { %v6825_v35 = vpop.eup %6824  ;;  %v2182_v49 = vadd.f32 1.0, %v6823_v20  ;;  %2220 = vst [vmem:[%s8003_s21 + $0x278] sm:$0xff] %v2196_v26  ;;  %v8605_v44 = vmul.f32 0.5, %v2339_v59  ;;  %v2007_v23 = vadd.f32 %v2006_v1, %v8472_v62  ;;  %v2354_v47 = vadd.f32 %v6090_v10, %v8267_v31 }
 0x59b   : > { %v2209_v25 = vmul.f32 %v2185_v42, %v8532_v50  ;;  %v2174_v8 = vadd.f32 1.0, %v6825_v35  ;;  %v6827_v3 = vpop.eup %6826  ;;  %6842 = vtanh.f32 %v8599_v48  ;;  %v8615_v32 = vmul.f32 0.5, %v2005_v4 }
 0x59c   : > { %v2206_v11 = vmul.f32 %v2182_v49, %v8536_v13  ;;  %v6829_v12 = vpop.eup %6828  ;;  %v2175_v19 = vadd.f32 1.0, %v6827_v3  ;;  %6844 = vtanh.f32 %v8601_v9  ;;  %v8619_v13 = vmul.f32 0.5, %v2007_v23 }
 0x59d   : > { %2233 = vst [vmem:[%s8003_s21 + $0x580] sm:$0xff] %v2209_v25  ;;  %v2198_v50 = vmul.f32 %v2174_v8, %v8538_v33  ;;  %v6831_v43 = vpop.eup %6830  ;;  %v2374_v24 = vadd.f32 1.0, %v6829_v12  ;;  %6846 = vtanh.f32 %v8605_v44  ;;  %v8621_v62 = vmul.f32 0.5, %v2354_v47 }
 0x59e   : > { %2230 = vst [vmem:[%s8003_s21 + $0x4c0] sm:$0xff] %v2206_v11  ;;  %v6833_v17 = vpop.eup %6832  ;;  %v2199_v1 = vmul.f32 %v2175_v19, %v8551_v53  ;;  %v2373_v33 = vadd.f32 1.0, %v6831_v43  ;;  %6848 = vtanh.f32 %v8615_v32  ;;  %v2349_v51 = vadd.f32 %v8267_v31, %v2348_v41 }
 0x59f   : > { %2222 = vst [vmem:[%s8003_s21 + $0x330] sm:$0xff] %v2198_v50  ;;  %v6835_v30 = vpop.eup %6834  ;;  %v2177_v57 = vadd.f32 1.0, %v6833_v17  ;;  %6850 = vtanh.f32 %v8619_v13  ;;  %v2382_v22 = vmul.f32 %v2374_v24, %v8553_v46  ;;  %v6379_v18 = vpack.c.bf16 %v5555_v27, %v5554_v40  ;;  %v5556_v46 = vld [vmem:[%s10164_s3 + $0x100] sm:$0xff]  ;;  %v2941_v27 = vld [vmem:[#allocation9 + $0x18] sm:$0x3] }
 0x5a0   : > { %v6837_v28 = vpop.eup %6836  ;;  %2223 = vst [vmem:[%s8003_s21 + $0x338] sm:$0xff] %v2199_v1  ;;  %v2381_v53 = vmul.f32 %v2373_v33, %v8557_v63  ;;  %v2178_v34 = vadd.f32 1.0, %v6835_v30  ;;  %6852 = vtanh.f32 %v8621_v62  ;;  %v2363_v31 = vmul.f32 0.5, %v2349_v51  ;;  %v8708_v1 = vld [vmem:[#allocation9 + $0x8] sm:$0xff]  ;;  %v2942_v33 = vld [vmem:[#allocation9 + $0x20] sm:$0x3] }
 0x5a1   : > { %v2201_v61 = vmul.f32 %v2177_v57, %v8566_v37  ;;  %v2376_v26 = vadd.f32 1.0, %v6837_v28  ;;  %v5557_v37 = vld [vmem:[%s10164_s3 + $0x108] sm:$0xff]  ;;  %v6387_v51 = vpack.c.bf16 %v2942_v33, %v8708_v1  ;;  %v8711_v40 = vld [vmem:[#allocation9] sm:$0xff] }
 0x5a2   : > { %v6839_v45 = vpop.eup %6838  ;;  %v2202_v20 = vmul.f32 %v2178_v34, %v8572_v55  ;;  %6854 = vtanh.f32 %v2363_v31  ;;  %5535 = vmatmul.mubr.msk.f32.vlgmr.msra.gmra.mrb[54].mxu0 %vm764_vm6, %v2381_v53  ;;  %6095 = vmatprep.mubr.msk.f32.mxu1 %vm764_vm6, %v2381_v53  ;;  %v6383_v8 = vpack.c.bf16 %v5557_v37, %v5556_v46  ;;  %v6390_v30 = vpack.c.bf16 %v2941_v27, %v8711_v40  ;;  %v5589_v57 = vld [vmem:[%s10164_s3 + $0x120] sm:$0xff]  ;;  %v2395_v53 = vld [vmem:[#allocation10] sm:$0x7] }
 0x5a3   : > { %v6841_v63 = vpop.eup %6840  ;;  %2225 = vst [vmem:[%s8003_s21 + $0x3f0] sm:$0xff] %v2201_v61  ;;  %v2375_v42 = vadd.f32 1.0, %v6839_v45  ;;  %6096 = vmatmul.mubr.msk.f32.vlgmr.msra.gmra.mrb[58].mxu1 %vm764_vm6, %v2382_v22  ;;  %2515 = vmatprep.mubr.f32.mxu0 %v7457_v14  ;;  %v2384_v49 = vmul.f32 %v2376_v26, %v8576_v16  ;;  %v8732_v34 = vrot.slane %v2395_v53, %v7941_v36 }
 0x5a4   : > { %2226 = vst [vmem:[%s8003_s21 + $0x3f8] sm:$0xff] %v2202_v20  ;;  %v2180_v55 = vadd.f32 1.0, %v6841_v63  ;;  %6378 = vmatpush3.bf16.msra.mxu1 %v8465_v29  ;;  %6389 = vmatprep.subr.msk.bf16.mxu0 %vm7818_vm5, %v6387_v51 }
 0x5a5   : > { %v6843_v59 = vpop.eup %6842  ;;  %v2383_v10 = vmul.f32 %v2375_v42, %v8585_v15  ;;  %6380 = vmatprep.subr.bf16.mxu1 %v6379_v18  ;;  %6392 = vmatpush1.bf16.msk.msra.mxu0 %vm7818_vm5, %v6390_v30 }
 0x5a6   : > { %v6845_v35 = vpop.eup %6844  ;;  %v2204_v41 = vmul.f32 %v2180_v55, %v8589_v39  ;;  %v2181_v25 = vadd.f32 1.0, %v6843_v59  ;;  %5536 = vmatmul.mubr.msk.f32.gmra.mrb[56].mxu0 %vm764_vm6, %v2382_v22  ;;  %v8738_v22 = vrot.slane %v2395_v53, %v7959_v56 }
 0x5a7   : > { %v6847_v4 = vpop.eup %6846  ;;  %v2378_v3 = vadd.f32 1.0, %v6845_v35  ;;  %6098 = vmatprep.mubr.msk.f32.mxu1 %vm764_vm6, %v2383_v10  ;;  %2521 = vmatprep.mubr.f32.mxu0 %v7457_v14 }
 0x5a8   : > { %v6849_v29 = vpop.eup %6848  ;;  %2228 = vst [vmem:[%s8003_s21 + $0x4b0] sm:$0xff] %v2204_v41  ;;  %v2205_v15 = vmul.f32 %v2181_v25, %v8599_v48  ;;  %v2377_v11 = vadd.f32 1.0, %v6847_v4  ;;  %6099 = vmatmul.mubr.msk.f32.gmra.mrb[60].mxu1 %vm764_vm6, %v2384_v49 }
 0x5a9   : > { %v6851_v16 = vpop.eup %6850  ;;  %v2183_v39 = vadd.f32 1.0, %v6849_v29  ;;  %6382 = vmatpush3.bf16.msra.mxu1 %v6379_v18  ;;  %v2386_v50 = vmul.f32 %v2378_v3, %v8601_v9 }
 0x5aa   : > { %v6853_v23 = vpop.eup %6852  ;;  %2229 = vst [vmem:[%s8003_s21 + $0x4b8] sm:$0xff] %v2205_v15  ;;  %v2385_v47 = vmul.f32 %v2377_v11, %v8605_v44  ;;  %v2184_v12 = vadd.f32 1.0, %v6851_v16  ;;  %5537 = vmatmul.mubr.msk.f32.gmra.mrb[58].mxu0 %vm764_vm6, %v2383_v10  ;;  %6384 = vmatprep.subr.bf16.mxu1 %v6383_v8  ;;  %v5558_v44 = vld [vmem:[%s10164_s3 + $0x110] sm:$0x3] }
 0x5ab   : > { %v2207_v48 = vmul.f32 %v2183_v39, %v8615_v32  ;;  %2527 = vmatprep.mubr.f32.mxu0 %v7457_v14  ;;  %v2380_v24 = vadd.f32 1.0, %v6853_v23 }
 0x5ac   : > { %v6855_v19 = vpop.eup %6854  ;;  %v2208_v43 = vmul.f32 %v2184_v12, %v8619_v13  ;;  %6101 = vmatprep.mubr.msk.f32.mxu1 %vm764_vm6, %v2385_v47  ;;  %v2943_v13 = vld [vmem:[#allocation9 + $0x28] sm:$0x3] }
 0x5ad   : > { %2231 = vst [vmem:[%s8003_s21 + $0x570] sm:$0xff] %v2207_v48  ;;  %v2379_v17 = vadd.f32 1.0, %v6855_v19  ;;  %6102 = vmatmul.mubr.msk.f32.gmra.mrb[62].mxu1 %vm764_vm6, %v2386_v50  ;;  %v2388_v32 = vmul.f32 %v2380_v24, %v8621_v62  ;;  %v6393_v62 = vpack.c.bf16 %v2943_v13, %v8446_v21  ;;  %v5588_v21 = vld [vmem:[%s10164_s3 + $0x118] sm:$0xff] }
 0x5ae   : > { %2232 = vst [vmem:[%s8003_s21 + $0x578] sm:$0xff] %v2208_v43  ;;  %6386 = vmatpush3.bf16.msra.mxu1 %v6383_v8  ;;  %5538 = vmatmul.mubr.msk.f32.gmra.mrb[60].mxu0 %vm764_vm6, %v2384_v49  ;;  %v8728_v28 = vpack.c.bf16 %v5589_v57, %v5588_v21 }
 0x5af   : > { %v2387_v9 = vmul.f32 %v2379_v17, %v2363_v31  ;;  %6119 = vmatprep.subr.msk.mxu1 %vm600_vm2, %v5558_v44  ;;  %2533 = vmatprep.mubr.f32.mxu0 %v7457_v14  ;;  %v8735_v31 = vrot.slane %v2395_v53, %v7943_v38 }
 0x5b1   : > { %6104 = vmatprep.mubr.msk.f32.mxu1 %vm764_vm6, %v2387_v9 }
 0x5b2   : > { %6105 = vmatmul.mubr.msk.f32.gmra.mrb[64].mxu1 %vm764_vm6, %v2388_v32  ;;  %5539 = vmatmul.mubr.msk.f32.gmra.mrb[62].mxu0 %vm764_vm6, %v2385_v47 }
 0x5b3   : > { %6120 = vmatpush3.msk.msra.mxu1 %vm600_vm2, %v5558_v44  ;;  %6121 = vmatprep.mubr.msk.f32.mxu1 %vm575_vm3, %v7785_v52 }
 0x5b4   : > { %2539 = vmatprep.mubr.f32.mxu0 %v7457_v14  ;;  %6395 = vmatprep.subr.msk.bf16.mxu1 %vm7818_vm5, %v6393_v62 }
 0x5b6   : > { %6122 = vmatmul.mubr.msk.f32.vlgmr.msra.gmra.mrb[66].mxu1 %vm575_vm3, %v7787_v54  ;;  %5540 = vmatmul.mubr.msk.f32.gmra.mrb[64].mxu0 %vm764_vm6, %v2386_v50 }
 0x5b7   : > { %6124 = vmatprep.mubr.msk.f32.mxu1 %vm575_vm3, %v7793_v58  ;;  %2545 = vmatprep.mubr.f32.mxu0 %v7457_v14 }
 0x5b8   : > { %6398 = vmatpush3.bf16.msk.msra.mxu1 %vm7818_vm5, %v6393_v62 }
 0x5b9   : > { %6400 = vmatprep.subr.bf16.mxu1 %v8728_v28 }
 0x5ba   : > { %6125 = vmatmul.mubr.msk.f32.gmra.mrb[68].mxu1 %vm575_vm3, %v7795_v60  ;;  %5541 = vmatmul.mubr.msk.f32.gmra.mrb[66].mxu0 %vm764_vm6, %v2387_v9 }
 0x5bb   : > { %6127 = vmatprep.mubr.msk.f32.mxu1 %vm575_vm3, %v7801_v0  ;;  %2551 = vmatprep.mubr.f32.mxu0 %v7457_v14 }
 0x5be   : > { %6128 = vmatmul.mubr.msk.f32.gmra.mrb[70].mxu1 %vm575_vm3, %v7803_v2  ;;  %5542 = vmatmul.mubr.msk.f32.gmra.mrb[68].mxu0 %vm764_vm6, %v2388_v32 }
 0x5bf   : > { %6130 = vmatprep.mubr.msk.f32.mxu1 %vm575_vm3, %v7809_v5  ;;  %3058 = vmatprep.mubr.f32.mxu0 %v7457_v14 }
 0x5c2   : > { %6131 = vmatmul.mubr.msk.f32.gmra.mrb[72].mxu1 %vm575_vm3, %v7811_v6 }
 0x675   : > { %v2511_v61 = vpop.f32.mrb[54].mxu0 }
 0x676   : > { %v2512_v18 = vadd.f32 %v2511_v61, %v8732_v34  ;;  %v2513_v45 = vpop.f32.mrb[55].mxu0  ;;  %v6097_v20 = vpop.f32.mrb[58].mxu1 }
 0x677   : > { %v2514_v26 = vadd.f32 %v2513_v45, %v8735_v31  ;;  %v2630_v63 = vadd.f32 %v6097_v20, %v8738_v22  ;;  %v2624_v42 = vpop.f32.mrb[59].mxu1 }
 0x678   : > { %v2663_v46 = vmul.f32 0.5, %v2512_v18  ;;  %v2625_v37 = vadd.f32 %v2624_v42, %v8738_v22 }
 0x679   : > { %v2664_v55 = vmul.f32 0.5, %v2514_v26  ;;  %v8744_v59 = vmul.f32 0.5, %v2630_v63  ;;  %v2517_v10 = vpop.f32.mrb[56].mxu0 }
 0x67a   : > { %6856 = vtanh.f32 %v2663_v46  ;;  %v8746_v35 = vmul.f32 0.5, %v2625_v37  ;;  %v2518_v49 = vadd.f32 %v2517_v10, %v8732_v34  ;;  %v2519_v41 = vpop.f32.mrb[57].mxu0 }
 0x67b   : > { %6858 = vtanh.f32 %v2664_v55  ;;  %v2520_v25 = vadd.f32 %v2519_v41, %v8735_v31  ;;  %v6100_v8 = vpop.f32.mrb[60].mxu1 }
 0x67c   : > { %6860 = vtanh.f32 %v8744_v59  ;;  %v8751_v4 = vmul.f32 0.5, %v2518_v49  ;;  %v2640_v3 = vadd.f32 %v6100_v8, %v8738_v22  ;;  %v2634_v29 = vpop.f32.mrb[61].mxu1 }
 0x67d   : > { %6862 = vtanh.f32 %v8746_v35  ;;  %v8755_v15 = vmul.f32 0.5, %v2520_v25  ;;  %v2635_v11 = vadd.f32 %v2634_v29, %v8738_v22  ;;  %v2523_v16 = vpop.f32.mrb[58].mxu0 }
 0x67e   : > { %6864 = vtanh.f32 %v8751_v4  ;;  %v8759_v39 = vmul.f32 0.5, %v2640_v3  ;;  %v2524_v23 = vadd.f32 %v2523_v16, %v8732_v34  ;;  %v2525_v47 = vpop.f32.mrb[59].mxu0  ;;  %v8795_v16 = vld [vmem:[#allocation7] ss:$0 sm:$0xff] }
 0x67f   : > { %6866 = vtanh.f32 %v8755_v15  ;;  %v8763_v12 = vmul.f32 0.5, %v2635_v11  ;;  %v2526_v50 = vadd.f32 %v2525_v47, %v8735_v31 }
 0x680   : > { %6868 = vtanh.f32 %v8759_v39  ;;  %v8767_v48 = vmul.f32 0.5, %v2524_v23  ;;  %v6103_v19 = vpop.f32.mrb[62].mxu1 }
 0x681   : > { %6870 = vtanh.f32 %v8763_v12  ;;  %v8770_v43 = vmul.f32 0.5, %v2526_v50  ;;  %v2650_v24 = vadd.f32 %v6103_v19, %v8738_v22  ;;  %v2644_v44 = vpop.f32.mrb[63].mxu1  ;;  %v2529_v17 = vpop.f32.mrb[60].mxu0 }
 0x682   : > { %6872 = vtanh.f32 %v8767_v48  ;;  %v2645_v9 = vadd.f32 %v2644_v44, %v8738_v22  ;;  %v2530_v32 = vadd.f32 %v2529_v17, %v8732_v34  ;;  %v2531_v13 = vpop.f32.mrb[61].mxu0 }
 0x683   : > { %6874 = vtanh.f32 %v8770_v43  ;;  %v8777_v62 = vmul.f32 0.5, %v2650_v24  ;;  %v2532_v33 = vadd.f32 %v2531_v13, %v8735_v31 }
 0x684   : > { %v6857_v51 = vpop.eup %6856  ;;  %v8780_v27 = vmul.f32 0.5, %v2645_v9  ;;  %v8782_v30 = vmul.f32 0.5, %v2530_v32 }
 0x685   : > { %v6859_v21 = vpop.eup %6858  ;;  %v2711_v57 = vadd.f32 1.0, %v6857_v51  ;;  %6876 = vtanh.f32 %v8777_v62  ;;  %v8785_v53 = vmul.f32 0.5, %v2532_v33  ;;  %v6106_v61 = vpop.f32.mrb[64].mxu1 }
 0x686   : > { %v2535_v18 = vpop.f32.mrb[62].mxu0  ;;  %v6861_v45 = vpop.eup %6860  ;;  %v2712_v20 = vadd.f32 1.0, %v6859_v21  ;;  %6878 = vtanh.f32 %v8780_v27  ;;  %v2660_v26 = vadd.f32 %v6106_v61, %v8738_v22 }
 0x687   : > { %v2654_v63 = vpop.f32.mrb[65].mxu1  ;;  %v2536_v42 = vadd.f32 %v2535_v18, %v8732_v34  ;;  %v2537_v37 = vpop.f32.mrb[63].mxu0  ;;  %v2735_v49 = vmul.f32 %v2711_v57, %v2663_v46  ;;  %v2716_v41 = vadd.f32 1.0, %v6861_v45  ;;  %6880 = vtanh.f32 %v8782_v30 }
 0x688   : > { %v6863_v10 = vpop.eup %6862  ;;  %v2655_v25 = vadd.f32 %v2654_v63, %v8738_v22  ;;  %v2736_v3 = vmul.f32 %v2712_v20, %v2664_v55  ;;  %6882 = vtanh.f32 %v8785_v53  ;;  %v8793_v11 = vmul.f32 0.5, %v2660_v26 }
 0x689   : > { %v6865_v8 = vpop.eup %6864  ;;  %v2713_v29 = vadd.f32 1.0, %v6863_v10  ;;  %2759 = vst [vmem:[%s8003_s21 + $0x48] sm:$0xff] %v2735_v49  ;;  %v2740_v46 = vmul.f32 %v2716_v41, %v8744_v59  ;;  %v8801_v19 = vmul.f32 0.5, %v2536_v42  ;;  %v6123_v22 = vpop.f32.mrb[66].mxu1  ;;  %v2538_v9 = vadd.f32 %v2537_v37, %v8735_v31 }
 0x68a   : > { %v6867_v23 = vpop.eup %6866  ;;  %v2714_v47 = vadd.f32 1.0, %v6865_v8  ;;  %v8799_v50 = vmul.f32 0.5, %v2655_v25  ;;  %v2541_v24 = vpop.f32.mrb[64].mxu0  ;;  %2760 = vst [vmem:[%s8003_s21 + $0x50] sm:$0xff] %v2736_v3  ;;  %6884 = vtanh.f32 %v8793_v11  ;;  %v2873_v21 = vadd.f32 %v6123_v22, %v8795_v16 }
 0x68b   : > { %v6869_v55 = vpop.eup %6868  ;;  %v2737_v44 = vmul.f32 %v2713_v29, %v8746_v35  ;;  %v2715_v17 = vadd.f32 1.0, %v6867_v23  ;;  %v2867_v32 = vpop.f32.mrb[67].mxu1  ;;  %2764 = vst [vmem:[%s8003_s21 + $0x118] sm:$0xff] %v2740_v46  ;;  %v8814_v18 = vmul.f32 0.5, %v2538_v9  ;;  %v2542_v49 = vadd.f32 %v2541_v24, %v8732_v34 }
 0x68c   : > { %v2543_v59 = vpop.f32.mrb[65].mxu0  ;;  %v6871_v13 = vpop.eup %6870  ;;  %v2738_v33 = vmul.f32 %v2714_v47, %v8751_v4  ;;  %v2722_v51 = vadd.f32 1.0, %v6869_v55  ;;  %6886 = vtanh.f32 %v8799_v50  ;;  %v8818_v26 = vmul.f32 0.5, %v2873_v21 }
 0x68d   : > { %v6873_v57 = vpop.eup %6872  ;;  %2761 = vst [vmem:[%s8003_s21 + $0x58] sm:$0xff] %v2737_v44  ;;  %v2739_v35 = vmul.f32 %v2715_v17, %v8755_v15  ;;  %v2719_v61 = vadd.f32 1.0, %v6871_v13  ;;  %6888 = vtanh.f32 %v8801_v19  ;;  %v2868_v63 = vadd.f32 %v8795_v16, %v2867_v32  ;;  %v6126_v42 = vpop.f32.mrb[68].mxu1 }
 0x68e   : > { %v6875_v45 = vpop.eup %6874  ;;  %2762 = vst [vmem:[%s8003_s21 + $0x108] sm:$0xff] %v2738_v33  ;;  %v2746_v4 = vmul.f32 %v2722_v51, %v8759_v39  ;;  %v2717_v20 = vadd.f32 1.0, %v6873_v57  ;;  %v2547_v37 = vpop.f32.mrb[66].mxu0  ;;  %6890 = vtanh.f32 %v8814_v18  ;;  %v2544_v29 = vadd.f32 %v2543_v59, %v8735_v31 }
 0x68f   : > { %2763 = vst [vmem:[%s8003_s21 + $0x110] sm:$0xff] %v2739_v35  ;;  %v2743_v15 = vmul.f32 %v2719_v61, %v8763_v12  ;;  %v2718_v10 = vadd.f32 1.0, %v6875_v45  ;;  %v2877_v41 = vpop.f32.mrb[69].mxu1  ;;  %v2549_v25 = vpop.f32.mrb[67].mxu0  ;;  %6892 = vtanh.f32 %v8818_v26  ;;  %v8828_v3 = vmul.f32 0.5, %v2868_v63 }
 0x690   : > { %v6877_v39 = vpop.eup %6876  ;;  %2770 = vst [vmem:[%s8003_s21 + $0x298] sm:$0xff] %v2746_v4  ;;  %v2741_v8 = vmul.f32 %v2717_v20, %v8767_v48  ;;  %v8833_v47 = vmul.f32 0.5, %v2542_v49  ;;  %v2883_v22 = vadd.f32 %v6126_v42, %v8795_v16  ;;  %v8838_v48 = vmul.f32 0.5, %v2544_v29 }
 0x691   : > { %v6879_v12 = vpop.eup %6878  ;;  %2767 = vst [vmem:[%s8003_s21 + $0x1d8] sm:$0xff] %v2743_v15  ;;  %v2742_v23 = vmul.f32 %v2718_v10, %v8770_v43  ;;  %v2728_v46 = vadd.f32 1.0, %v6877_v39  ;;  %6894 = vtanh.f32 %v8828_v3  ;;  %v2878_v44 = vadd.f32 %v8795_v16, %v2877_v41  ;;  %v6129_v17 = vpop.f32.mrb[70].mxu1 }
 0x692   : > { %v6881_v24 = vpop.eup %6880  ;;  %2765 = vst [vmem:[%s8003_s21 + $0x1c8] sm:$0xff] %v2741_v8  ;;  %v2725_v55 = vadd.f32 1.0, %v6879_v12  ;;  %v2553_v9 = vpop.f32.mrb[68].mxu0  ;;  %6896 = vtanh.f32 %v8833_v47  ;;  %v8844_v13 = vmul.f32 0.5, %v2883_v22  ;;  %v2548_v45 = vadd.f32 %v2547_v37, %v8732_v34 }
 0x693   : > { %v6883_v32 = vpop.eup %6882  ;;  %2766 = vst [vmem:[%s8003_s21 + $0x1d0] sm:$0xff] %v2742_v23  ;;  %v2752_v43 = vmul.f32 %v2728_v46, %v8777_v62  ;;  %v2720_v59 = vadd.f32 1.0, %v6881_v24  ;;  %v2887_v33 = vpop.f32.mrb[71].mxu1  ;;  %6898 = vtanh.f32 %v8838_v48  ;;  %v8848_v35 = vmul.f32 0.5, %v2878_v44 }
 0x694   : > { %v2555_v51 = vpop.f32.mrb[69].mxu0  ;;  %v2749_v21 = vmul.f32 %v2725_v55, %v8780_v27  ;;  %v2721_v57 = vadd.f32 1.0, %v6883_v32  ;;  %v6885_v61 = vpop.eup %6884  ;;  %6900 = vtanh.f32 %v8844_v13  ;;  %v2550_v4 = vadd.f32 %v2549_v25, %v8735_v31  ;;  %v5590_v32 = vld [vmem:[%s10164_s3 + $0x128] sm:$0xff] }
 0x695   : > { %2776 = vst [vmem:[%s8003_s21 + $0x418] sm:$0xff] %v2752_v43  ;;  %v2744_v62 = vmul.f32 %v2720_v59, %v8782_v30  ;;  %v2734_v63 = vadd.f32 1.0, %v6885_v61  ;;  %6902 = vtanh.f32 %v8848_v35  ;;  %v2893_v42 = vadd.f32 %v6129_v17, %v8795_v16  ;;  %v6132_v15 = vpop.f32.mrb[72].mxu1  ;;  %v5591_v43 = vld [vmem:[%s10164_s3 + $0x130] sm:$0xff] }
 0x696   : > { %v6887_v20 = vpop.eup %6886  ;;  %2773 = vst [vmem:[%s8003_s21 + $0x358] sm:$0xff] %v2749_v21  ;;  %v2745_v27 = vmul.f32 %v2721_v57, %v8785_v53  ;;  %v8860_v49 = vmul.f32 0.5, %v2548_v45  ;;  %v8862_v37 = vmul.f32 0.5, %v2550_v4  ;;  %v2888_v41 = vadd.f32 %v8795_v16, %v2887_v33  ;;  %v2897_v25 = vpop.f32.mrb[73].mxu1 }
 0x697   : > { %v6889_v10 = vpop.eup %6888  ;;  %2768 = vst [vmem:[%s8003_s21 + $0x288] sm:$0xff] %v2744_v62  ;;  %v2731_v30 = vadd.f32 1.0, %v6887_v20  ;;  %v2758_v53 = vmul.f32 %v2734_v63, %v8793_v11  ;;  %v8867_v8 = vmul.f32 0.5, %v2893_v42  ;;  %v2554_v29 = vadd.f32 %v2553_v9, %v8732_v34 }
 0x698   : > { %2769 = vst [vmem:[%s8003_s21 + $0x290] sm:$0xff] %v2745_v27  ;;  %v2723_v39 = vadd.f32 1.0, %v6889_v10  ;;  %v6891_v12 = vpop.eup %6890  ;;  %6904 = vtanh.f32 %v8860_v49  ;;  %v8872_v46 = vmul.f32 0.5, %v2888_v41  ;;  %v2556_v22 = vadd.f32 %v2555_v51, %v8735_v31 }
 0x699   : > { %v2755_v23 = vmul.f32 %v2731_v30, %v8799_v50  ;;  %v6893_v24 = vpop.eup %6892  ;;  %2782 = vst [vmem:[%s8003_s21 + $0x598] sm:$0xff] %v2758_v53  ;;  %v2724_v11 = vadd.f32 1.0, %v6891_v12  ;;  %6906 = vtanh.f32 %v8862_v37  ;;  %v8878_v44 = vmul.f32 0.5, %v2554_v29 }
 0x69a   : > { %v2747_v55 = vmul.f32 %v2723_v39, %v8801_v19  ;;  %6908 = vtanh.f32 %v8867_v8  ;;  %v8882_v34 = vmul.f32 0.5, %v2556_v22  ;;  %v2903_v50 = vadd.f32 %v6132_v15, %v8795_v16 }
 0x69b   : > { %2779 = vst [vmem:[%s8003_s21 + $0x4d8] sm:$0xff] %v2755_v23  ;;  %v6895_v17 = vpop.eup %6894  ;;  %v2748_v31 = vmul.f32 %v2724_v11, %v8814_v18  ;;  %v2923_v9 = vadd.f32 1.0, %v6893_v24  ;;  %6910 = vtanh.f32 %v8872_v46  ;;  %v2898_v19 = vadd.f32 %v8795_v16, %v2897_v25 }
 0x69c   : > { %2771 = vst [vmem:[%s8003_s21 + $0x348] sm:$0xff] %v2747_v55  ;;  %v6897_v59 = vpop.eup %6896  ;;  %v2922_v33 = vadd.f32 1.0, %v6895_v17  ;;  %6912 = vtanh.f32 %v8878_v44  ;;  %v8896_v51 = vmul.f32 0.5, %v2903_v50  ;;  %v6403_v4 = vpack.c.bf16 %v5591_v43, %v5590_v32  ;;  %v5594_v17 = vld [vmem:[%s10164_s3 + $0x148] sm:$0x3] }
 0x69d   : > { %v6899_v18 = vpop.eup %6898  ;;  %2772 = vst [vmem:[%s8003_s21 + $0x350] sm:$0xff] %v2748_v31  ;;  %v2726_v21 = vadd.f32 1.0, %v6897_v59  ;;  %6914 = vtanh.f32 %v8882_v34  ;;  %v8900_v57 = vmul.f32 0.5, %v2898_v19  ;;  %v2931_v27 = vmul.f32 %v2923_v9, %v8818_v26  ;;  %v5593_v26 = vld [vmem:[%s10164_s3 + $0x140] sm:$0xff] }
 0x69e   : > { %v6901_v61 = vpop.eup %6900  ;;  %v2930_v62 = vmul.f32 %v2922_v33, %v8828_v3  ;;  %v2727_v45 = vadd.f32 1.0, %v6899_v18  ;;  %6916 = vtanh.f32 %v8896_v51  ;;  %v5592_v3 = vld [vmem:[%s10164_s3 + $0x138] sm:$0xff]  ;;  %v3490_v18 = vld [vmem:[#allocation9 + $0x18] sm:$0x3] }
 0x69f   : > { %v6903_v20 = vpop.eup %6902  ;;  %v2750_v63 = vmul.f32 %v2726_v21, %v8833_v47  ;;  %v2925_v42 = vadd.f32 1.0, %v6901_v61  ;;  %6918 = vtanh.f32 %v8900_v57  ;;  %v6407_v53 = vpack.c.bf16 %v5593_v26, %v5592_v3  ;;  %v3491_v33 = vld [vmem:[#allocation9 + $0x20] sm:$0x3] }
 0x6a0   : > { %v2751_v15 = vmul.f32 %v2727_v45, %v8838_v48  ;;  %v2924_v10 = vadd.f32 1.0, %v6903_v20  ;;  %5571 = vmatmul.mubr.msk.f32.vlgmr.msra.gmra.mrb[70].mxu0 %vm764_vm6, %v2930_v62  ;;  %6137 = vmatprep.mubr.msk.f32.mxu1 %vm764_vm6, %v2930_v62  ;;  %v6414_v21 = vpack.c.bf16 %v3490_v18, %v8711_v40  ;;  %v2944_v40 = vld [vmem:[#allocation10] sm:$0x7] }
 0x6a1   : > { %2774 = vst [vmem:[%s8003_s21 + $0x408] sm:$0xff] %v2750_v63  ;;  %6138 = vmatmul.mubr.msk.f32.vlgmr.msra.gmra.mrb[74].mxu1 %vm764_vm6, %v2931_v27  ;;  %3064 = vmatprep.mubr.f32.mxu0 %v7457_v14  ;;  %v2933_v41 = vmul.f32 %v2925_v42, %v8844_v13  ;;  %v8999_v62 = vrot.slane %v2944_v40, %v7941_v36 }
 0x6a2   : > { %v6905_v47 = vpop.eup %6904  ;;  %2775 = vst [vmem:[%s8003_s21 + $0x410] sm:$0xff] %v2751_v15  ;;  %v2932_v48 = vmul.f32 %v2924_v10, %v8848_v35  ;;  %6402 = vmatpush3.bf16.msra.mxu1 %v8728_v28  ;;  %v9002_v45 = vrot.slane %v2944_v40, %v7943_v38 }
 0x6a3   : > { %v6907_v30 = vpop.eup %6906  ;;  %v2729_v25 = vadd.f32 1.0, %v6905_v47  ;;  %6404 = vmatprep.subr.bf16.mxu1 %v6403_v4 }
 0x6a4   : > { %v6909_v39 = vpop.eup %6908  ;;  %v2730_v29 = vadd.f32 1.0, %v6907_v30  ;;  %5572 = vmatmul.mubr.msk.f32.gmra.mrb[72].mxu0 %vm764_vm6, %v2931_v27  ;;  %6140 = vmatprep.mubr.msk.f32.mxu1 %vm764_vm6, %v2932_v48 }
 0x6a5   : > { %v6911_v12 = vpop.eup %6910  ;;  %v2753_v23 = vmul.f32 %v2729_v25, %v8860_v49  ;;  %v2927_v35 = vadd.f32 1.0, %v6909_v39  ;;  %6141 = vmatmul.mubr.msk.f32.gmra.mrb[76].mxu1 %vm764_vm6, %v2933_v41  ;;  %3070 = vmatprep.mubr.f32.mxu0 %v7457_v14 }
 0x6a6   : > { %v6913_v28 = vpop.eup %6912  ;;  %v2754_v13 = vmul.f32 %v2730_v29, %v8862_v37  ;;  %v2926_v22 = vadd.f32 1.0, %v6911_v12  ;;  %6406 = vmatpush3.bf16.msra.mxu1 %v6403_v4  ;;  %v9005_v4 = vrot.slane %v2944_v40, %v7959_v56 }
 0x6a7   : > { %v6915_v24 = vpop.eup %6914  ;;  %2777 = vst [vmem:[%s8003_s21 + $0x4c8] sm:$0xff] %v2753_v23  ;;  %v2732_v55 = vadd.f32 1.0, %v6913_v28  ;;  %6408 = vmatprep.subr.bf16.mxu1 %v6407_v53  ;;  %v2935_v31 = vmul.f32 %v2927_v35, %v8867_v8 }
 0x6a8   : > { %v6917_v11 = vpop.eup %6916  ;;  %2778 = vst [vmem:[%s8003_s21 + $0x4d0] sm:$0xff] %v2754_v13  ;;  %v2934_v50 = vmul.f32 %v2926_v22, %v8872_v46  ;;  %v2733_v49 = vadd.f32 1.0, %v6915_v24  ;;  %5573 = vmatmul.mubr.msk.f32.gmra.mrb[74].mxu0 %vm764_vm6, %v2932_v48 }
 0x6a9   : > { %v6919_v37 = vpop.eup %6918  ;;  %v2756_v9 = vmul.f32 %v2732_v55, %v8878_v44  ;;  %v2929_v19 = vadd.f32 1.0, %v6917_v11  ;;  %3076 = vmatprep.mubr.f32.mxu0 %v7457_v14  ;;  %v8976_v44 = vld [vmem:[#allocation9 + $0x10] sm:$0xff] }
 0x6aa   : > { %v2757_v32 = vmul.f32 %v2733_v49, %v8882_v34  ;;  %v2928_v43 = vadd.f32 1.0, %v6919_v37  ;;  %6143 = vmatprep.mubr.msk.f32.mxu1 %vm764_vm6, %v2934_v50  ;;  %6410 = vmatpush3.bf16.msra.mxu1 %v6407_v53  ;;  %v3492_v34 = vld [vmem:[#allocation9 + $0x28] sm:$0x3] }
 0x6ab   : > { %2780 = vst [vmem:[%s8003_s21 + $0x588] sm:$0xff] %v2756_v9  ;;  %6144 = vmatmul.mubr.msk.f32.gmra.mrb[78].mxu1 %vm764_vm6, %v2935_v31  ;;  %6161 = vmatprep.subr.msk.mxu1 %vm600_vm2, %v5594_v17  ;;  %v2937_v8 = vmul.f32 %v2929_v19, %v8896_v51  ;;  %v6417_v59 = vpack.c.bf16 %v3492_v34, %v8976_v44 }
 0x6ac   : > { %2781 = vst [vmem:[%s8003_s21 + $0x590] sm:$0xff] %v2757_v32  ;;  %v2936_v46 = vmul.f32 %v2928_v43, %v8900_v57  ;;  %5574 = vmatmul.mubr.msk.f32.gmra.mrb[76].mxu0 %vm764_vm6, %v2933_v41  ;;  %v6411_v51 = vpack.c.bf16 %v3491_v33, %v8708_v1  ;;  %v5624_v57 = vld [vmem:[%s10164_s3 + $0x150] sm:$0xff]  ;;  %v5625_v1 = vld [vmem:[%s10164_s3 + $0x158] sm:$0xff] }
 0x6ad   : > { %3082 = vmatprep.mubr.f32.mxu0 %v7457_v14  ;;  %v8995_v61 = vpack.c.bf16 %v5625_v1, %v5624_v57 }
 0x6ae   : > { %6146 = vmatprep.mubr.msk.f32.mxu1 %vm764_vm6, %v2936_v46  ;;  %6162 = vmatpush3.msk.msra.mxu1 %vm600_vm2, %v5594_v17 }
 0x6af   : > { %6147 = vmatmul.mubr.msk.f32.gmra.mrb[80].mxu1 %vm764_vm6, %v2937_v8  ;;  %6419 = vmatprep.subr.msk.bf16.mxu1 %vm7818_vm5, %v6417_v59 }
 0x6b0   : > { %6163 = vmatprep.mubr.msk.f32.mxu1 %vm575_vm3, %v7785_v52  ;;  %5575 = vmatmul.mubr.msk.f32.gmra.mrb[78].mxu0 %vm764_vm6, %v2934_v50 }
 0x6b1   : > { %3088 = vmatprep.mubr.f32.mxu0 %v7457_v14  ;;  %6413 = vmatprep.subr.msk.bf16.mxu0 %vm7818_vm5, %v6411_v51 }
 0x6b2   : > { %6416 = vmatpush1.bf16.msk.msra.mxu0 %vm7818_vm5, %v6414_v21 }
 0x6b3   : > { %6164 = vmatmul.mubr.msk.f32.vlgmr.msra.gmra.mrb[82].mxu1 %vm575_vm3, %v7787_v54 }
 0x6b4   : > { %6166 = vmatprep.mubr.msk.f32.mxu1 %vm575_vm3, %v7793_v58  ;;  %5576 = vmatmul.mubr.msk.f32.gmra.mrb[80].mxu0 %vm764_vm6, %v2935_v31 }
 0x6b5   : > { %3094 = vmatprep.mubr.f32.mxu0 %v7457_v14  ;;  %6422 = vmatpush3.bf16.msk.msra.mxu1 %vm7818_vm5, %v6417_v59 }
 0x6b6   : > { %6424 = vmatprep.subr.bf16.mxu1 %v8995_v61 }
 0x6b7   : > { %6167 = vmatmul.mubr.msk.f32.gmra.mrb[84].mxu1 %vm575_vm3, %v7795_v60 }
 0x6b8   : > { %6169 = vmatprep.mubr.msk.f32.mxu1 %vm575_vm3, %v7801_v0  ;;  %5577 = vmatmul.mubr.msk.f32.gmra.mrb[82].mxu0 %vm764_vm6, %v2936_v46 }
 0x6b9   : > { %3100 = vmatprep.mubr.f32.mxu0 %v7457_v14 }
 0x6bb   : > { %6170 = vmatmul.mubr.msk.f32.gmra.mrb[86].mxu1 %vm575_vm3, %v7803_v2 }
 0x6bc   : > { %6172 = vmatprep.mubr.msk.f32.mxu1 %vm575_vm3, %v7809_v5  ;;  %5578 = vmatmul.mubr.msk.f32.gmra.mrb[84].mxu0 %vm764_vm6, %v2937_v8 }
 0x6bd   : > { %3607 = vmatprep.mubr.f32.mxu0 %v7457_v14 }
 0x6bf   : > { %6173 = vmatmul.mubr.msk.f32.gmra.mrb[88].mxu1 %vm575_vm3, %v7811_v6 }
 0x773   : > { %v3060_v20 = vpop.f32.mrb[70].mxu0 }
 0x774   : > { %v3061_v27 = vadd.f32 %v3060_v20, %v8999_v62  ;;  %v3062_v63 = vpop.f32.mrb[71].mxu0  ;;  %v6139_v42 = vpop.f32.mrb[74].mxu1 }
 0x775   : > { %v3063_v15 = vadd.f32 %v3062_v63, %v9002_v45  ;;  %v3179_v10 = vadd.f32 %v6139_v42, %v9005_v4  ;;  %v3173_v3 = vpop.f32.mrb[75].mxu1 }
 0x776   : > { %v3212_v26 = vmul.f32 0.5, %v3061_v27  ;;  %v3174_v47 = vadd.f32 %v3173_v3, %v9005_v4 }
 0x777   : > { %v9011_v48 = vmul.f32 0.5, %v3063_v15  ;;  %v9013_v30 = vmul.f32 0.5, %v3179_v10  ;;  %v3066_v41 = vpop.f32.mrb[72].mxu0 }
 0x778   : > { %6920 = vtanh.f32 %v3212_v26  ;;  %v9015_v25 = vmul.f32 0.5, %v3174_v47  ;;  %v3067_v53 = vadd.f32 %v3066_v41, %v8999_v62  ;;  %v3068_v39 = vpop.f32.mrb[73].mxu0  ;;  %v6142_v29 = vpop.f32.mrb[76].mxu1 }
 0x779   : > { %6922 = vtanh.f32 %v9011_v48  ;;  %v3069_v12 = vadd.f32 %v3068_v39, %v9002_v45  ;;  %v3189_v23 = vadd.f32 %v6142_v29, %v9005_v4  ;;  %v3183_v35 = vpop.f32.mrb[77].mxu1 }
 0x77a   : > { %6924 = vtanh.f32 %v9013_v30  ;;  %v9022_v28 = vmul.f32 0.5, %v3067_v53  ;;  %v3184_v13 = vadd.f32 %v3183_v35, %v9005_v4 }
 0x77b   : > { %6926 = vtanh.f32 %v9015_v25  ;;  %v9026_v22 = vmul.f32 0.5, %v3069_v12  ;;  %v9028_v24 = vmul.f32 0.5, %v3189_v23  ;;  %v3072_v55 = vpop.f32.mrb[74].mxu0 }
 0x77c   : > { %6928 = vtanh.f32 %v9022_v28  ;;  %v9031_v11 = vmul.f32 0.5, %v3184_v13  ;;  %v3073_v50 = vadd.f32 %v3072_v55, %v8999_v62  ;;  %v3074_v49 = vpop.f32.mrb[75].mxu0 }
 0x77d   : > { %6930 = vtanh.f32 %v9026_v22  ;;  %v3075_v17 = vadd.f32 %v3074_v49, %v9002_v45 }
 0x77e   : > { %6932 = vtanh.f32 %v9028_v24  ;;  %v9037_v37 = vmul.f32 0.5, %v3073_v50  ;;  %v6145_v31 = vpop.f32.mrb[78].mxu1 }
 0x77f   : > { %6934 = vtanh.f32 %v9031_v11  ;;  %v9040_v9 = vmul.f32 0.5, %v3075_v17  ;;  %v3199_v19 = vadd.f32 %v6145_v31, %v9005_v4  ;;  %v3193_v32 = vpop.f32.mrb[79].mxu1  ;;  %v3078_v43 = vpop.f32.mrb[76].mxu0 }
 0x780   : > { %6936 = vtanh.f32 %v9037_v37  ;;  %v3194_v46 = vadd.f32 %v3193_v32, %v9005_v4  ;;  %v3079_v8 = vadd.f32 %v3078_v43, %v8999_v62  ;;  %v3080_v34 = vpop.f32.mrb[77].mxu0 }
 0x781   : > { %6938 = vtanh.f32 %v9040_v9  ;;  %v9047_v59 = vmul.f32 0.5, %v3199_v19  ;;  %v3081_v33 = vadd.f32 %v3080_v34, %v9002_v45 }
 0x782   : > { %v6921_v51 = vpop.eup %6920  ;;  %v9050_v18 = vmul.f32 0.5, %v3194_v46  ;;  %v9052_v21 = vmul.f32 0.5, %v3079_v8  ;;  %v6148_v57 = vpop.f32.mrb[80].mxu1 }
 0x783   : > { %v6923_v1 = vpop.eup %6922  ;;  %v3260_v40 = vadd.f32 1.0, %v6921_v51  ;;  %6940 = vtanh.f32 %v9047_v59  ;;  %v9055_v20 = vmul.f32 0.5, %v3081_v33  ;;  %v3209_v27 = vadd.f32 %v6148_v57, %v9005_v4  ;;  %v3203_v63 = vpop.f32.mrb[81].mxu1 }
 0x784   : > { %v3084_v42 = vpop.f32.mrb[78].mxu0  ;;  %v6925_v15 = vpop.eup %6924  ;;  %v3261_v10 = vadd.f32 1.0, %v6923_v1  ;;  %6942 = vtanh.f32 %v9050_v18  ;;  %v3204_v3 = vadd.f32 %v3203_v63, %v9005_v4 }
 0x785   : > { %v3085_v47 = vadd.f32 %v3084_v42, %v8999_v62  ;;  %v3086_v41 = vpop.f32.mrb[79].mxu0  ;;  %v6927_v53 = vpop.eup %6926  ;;  %v3284_v39 = vmul.f32 %v3260_v40, %v3212_v26  ;;  %v3265_v29 = vadd.f32 1.0, %v6925_v15  ;;  %6944 = vtanh.f32 %v9052_v21 }
 0x786   : > { %v9062_v12 = vmul.f32 0.5, %v3209_v27  ;;  %v6929_v23 = vpop.eup %6928  ;;  %v3285_v35 = vmul.f32 %v3261_v10, %v9011_v48  ;;  %v3262_v13 = vadd.f32 1.0, %v6927_v53  ;;  %6946 = vtanh.f32 %v9055_v20  ;;  %v6165_v4 = vpop.f32.mrb[82].mxu1 }
 0x787   : > { %v9066_v55 = vmul.f32 0.5, %v3204_v3  ;;  %v6931_v50 = vpop.eup %6930  ;;  %3308 = vst [vmem:[%s8003_s21 + $0x60] sm:$0xff] %v3284_v39  ;;  %v3289_v26 = vmul.f32 %v3265_v29, %v9013_v30  ;;  %v3263_v49 = vadd.f32 1.0, %v6929_v23  ;;  %v9071_v17 = vmul.f32 0.5, %v3085_v47  ;;  %v3416_v31 = vpop.f32.mrb[83].mxu1 }
 0x788   : > { %6948 = vtanh.f32 %v9062_v12  ;;  %v3090_v19 = vpop.f32.mrb[80].mxu0  ;;  %v6933_v48 = vpop.eup %6932  ;;  %3309 = vst [vmem:[%s8003_s21 + $0x68] sm:$0xff] %v3285_v35  ;;  %v3286_v32 = vmul.f32 %v3262_v13, %v9015_v25  ;;  %v3264_v43 = vadd.f32 1.0, %v6931_v50  ;;  %v3087_v46 = vadd.f32 %v3086_v41, %v9002_v45 }
 0x789   : > { %6950 = vtanh.f32 %v9066_v55  ;;  %v3092_v8 = vpop.f32.mrb[81].mxu0  ;;  %v6935_v30 = vpop.eup %6934  ;;  %3313 = vst [vmem:[%s8003_s21 + $0x130] sm:$0xff] %v3289_v26  ;;  %v3287_v34 = vmul.f32 %v3263_v49, %v9022_v28  ;;  %v3271_v33 = vadd.f32 1.0, %v6933_v48  ;;  %v3422_v51 = vadd.f32 %v6165_v4, %v8795_v16 }
 0x78a   : > { %6952 = vtanh.f32 %v9071_v17  ;;  %v6937_v57 = vpop.eup %6936  ;;  %3310 = vst [vmem:[%s8003_s21 + $0x70] sm:$0xff] %v3286_v32  ;;  %v3288_v25 = vmul.f32 %v3264_v43, %v9026_v22  ;;  %v3268_v1 = vadd.f32 1.0, %v6935_v30  ;;  %v9083_v40 = vmul.f32 0.5, %v3087_v46  ;;  %v6168_v63 = vpop.f32.mrb[84].mxu1 }
 0x78b   : > { %v3417_v27 = vadd.f32 %v8795_v16, %v3416_v31  ;;  %v6939_v42 = vpop.eup %6938  ;;  %3311 = vst [vmem:[%s8003_s21 + $0x120] sm:$0xff] %v3287_v34  ;;  %v3295_v28 = vmul.f32 %v3271_v33, %v9028_v24  ;;  %v3266_v15 = vadd.f32 1.0, %v6937_v57  ;;  %v9088_v10 = vmul.f32 0.5, %v3422_v51  ;;  %v3426_v47 = vpop.f32.mrb[85].mxu1 }
 0x78c   : > { %v3091_v3 = vadd.f32 %v3090_v19, %v8999_v62  ;;  %v3096_v41 = vpop.f32.mrb[82].mxu0  ;;  %3312 = vst [vmem:[%s8003_s21 + $0x128] sm:$0xff] %v3288_v25  ;;  %v3292_v22 = vmul.f32 %v3268_v1, %v9031_v11  ;;  %v3267_v53 = vadd.f32 1.0, %v6939_v42  ;;  %6954 = vtanh.f32 %v9083_v40 }
 0x78d   : > { %v9094_v39 = vmul.f32 0.5, %v3417_v27  ;;  %v3098_v29 = vpop.f32.mrb[83].mxu0  ;;  %v6941_v23 = vpop.eup %6940  ;;  %3319 = vst [vmem:[%s8003_s21 + $0x2b0] sm:$0xff] %v3295_v28  ;;  %v3290_v24 = vmul.f32 %v3266_v15, %v9037_v37  ;;  %6956 = vtanh.f32 %v9088_v10  ;;  %v3093_v13 = vadd.f32 %v3092_v8, %v9002_v45 }
 0x78e   : > { %v9099_v35 = vmul.f32 0.5, %v3091_v3  ;;  %v6943_v4 = vpop.eup %6942  ;;  %3316 = vst [vmem:[%s8003_s21 + $0x1f0] sm:$0xff] %v3292_v22  ;;  %v3291_v11 = vmul.f32 %v3267_v53, %v9040_v9  ;;  %v3277_v50 = vadd.f32 1.0, %v6941_v23  ;;  %v3432_v26 = vadd.f32 %v6168_v63, %v8795_v16  ;;  %v6171_v49 = vpop.f32.mrb[86].mxu1 }
 0x78f   : > { %6958 = vtanh.f32 %v9094_v39  ;;  %v6945_v31 = vpop.eup %6944  ;;  %3314 = vst [vmem:[%s8003_s21 + $0x1e0] sm:$0xff] %v3290_v24  ;;  %v3274_v37 = vadd.f32 1.0, %v6943_v4  ;;  %v9108_v19 = vmul.f32 0.5, %v3093_v13  ;;  %v3427_v48 = vadd.f32 %v8795_v16, %v3426_v47  ;;  %v3436_v32 = vpop.f32.mrb[87].mxu1 }
 0x790   : > { %6960 = vtanh.f32 %v9099_v35  ;;  %v3102_v43 = vpop.f32.mrb[84].mxu0  ;;  %v6947_v46 = vpop.eup %6946  ;;  %3315 = vst [vmem:[%s8003_s21 + $0x1e8] sm:$0xff] %v3291_v11  ;;  %v3301_v9 = vmul.f32 %v3277_v50, %v9047_v59  ;;  %v3269_v8 = vadd.f32 1.0, %v6945_v31  ;;  %v9113_v30 = vmul.f32 0.5, %v3432_v26 }
 0x791   : > { %v3097_v34 = vadd.f32 %v3096_v41, %v8999_v62  ;;  %v3104_v33 = vpop.f32.mrb[85].mxu0  ;;  %v3298_v57 = vmul.f32 %v3274_v37, %v9050_v18  ;;  %v3270_v25 = vadd.f32 1.0, %v6947_v46  ;;  %6962 = vtanh.f32 %v9108_v19 }
 0x792   : > { %v6949_v51 = vpop.eup %6948  ;;  %v9118_v1 = vmul.f32 0.5, %v3427_v48  ;;  %3325 = vst [vmem:[%s8003_s21 + $0x430] sm:$0xff] %v3301_v9  ;;  %v3293_v59 = vmul.f32 %v3269_v8, %v9052_v21  ;;  %6964 = vtanh.f32 %v9113_v30  ;;  %v6174_v28 = vpop.f32.mrb[88].mxu1  ;;  %v3099_v47 = vadd.f32 %v3098_v29, %v9002_v45  ;;  %v5626_v48 = vld [vmem:[%s10164_s3 + $0x160] sm:$0xff] }
 0x793   : > { %v6951_v27 = vpop.eup %6950  ;;  %v3283_v63 = vadd.f32 1.0, %v6949_v51  ;;  %v9123_v42 = vmul.f32 0.5, %v3097_v34  ;;  %3322 = vst [vmem:[%s8003_s21 + $0x370] sm:$0xff] %v3298_v57  ;;  %v3294_v18 = vmul.f32 %v3270_v25, %v9055_v20  ;;  %v3446_v41 = vpop.f32.mrb[89].mxu1  ;;  %v3442_v53 = vadd.f32 %v6171_v49, %v8795_v16 }
 0x794   : > { %v6953_v15 = vpop.eup %6952  ;;  %v3280_v3 = vadd.f32 1.0, %v6951_v27  ;;  %6966 = vtanh.f32 %v9118_v1  ;;  %3317 = vst [vmem:[%s8003_s21 + $0x2a0] sm:$0xff] %v3293_v59  ;;  %v9135_v20 = vmul.f32 0.5, %v3099_v47  ;;  %v3437_v24 = vadd.f32 %v8795_v16, %v3436_v32  ;;  %v5627_v32 = vld [vmem:[%s10164_s3 + $0x168] sm:$0xff] }
 0x795   : > { %v3307_v21 = vmul.f32 %v3283_v63, %v9062_v12  ;;  %v3272_v22 = vadd.f32 1.0, %v6953_v15  ;;  %6968 = vtanh.f32 %v9123_v42  ;;  %3318 = vst [vmem:[%s8003_s21 + $0x2a8] sm:$0xff] %v3294_v18  ;;  %v3103_v29 = vadd.f32 %v3102_v43, %v8999_v62 }
 0x796   : > { %v3304_v23 = vmul.f32 %v3280_v3, %v9066_v55  ;;  %v6955_v13 = vpop.eup %6954  ;;  %v9141_v4 = vmul.f32 0.5, %v3442_v53  ;;  %v3105_v11 = vadd.f32 %v3104_v33, %v9002_v45  ;;  %v3452_v50 = vadd.f32 %v6174_v28, %v8795_v16 }
 0x797   : > { %3331 = vst [vmem:[%s8003_s21 + $0x5b0] sm:$0xff] %v3307_v21  ;;  %v3296_v12 = vmul.f32 %v3272_v22, %v9071_v17  ;;  %v6957_v26 = vpop.eup %6956  ;;  %v3273_v55 = vadd.f32 1.0, %v6955_v13  ;;  %6970 = vtanh.f32 %v9135_v20  ;;  %v9147_v49 = vmul.f32 0.5, %v3437_v24 }
 0x798   : > { %3328 = vst [vmem:[%s8003_s21 + $0x4f0] sm:$0xff] %v3304_v23  ;;  %v9149_v31 = vmul.f32 0.5, %v3103_v29  ;;  %v3472_v37 = vadd.f32 1.0, %v6957_v26  ;;  %6972 = vtanh.f32 %v9141_v4  ;;  %v9153_v17 = vmul.f32 0.5, %v3105_v11 }
 0x799   : > { %v6959_v62 = vpop.eup %6958  ;;  %3320 = vst [vmem:[%s8003_s21 + $0x360] sm:$0xff] %v3296_v12  ;;  %v9155_v45 = vmul.f32 0.5, %v3452_v50  ;;  %v3297_v46 = vmul.f32 %v3273_v55, %v9083_v40  ;;  %6974 = vtanh.f32 %v9147_v49  ;;  %v3447_v8 = vadd.f32 %v8795_v16, %v3446_v41 }
 0x79a   : > { %v6961_v43 = vpop.eup %6960  ;;  %v3471_v9 = vadd.f32 1.0, %v6959_v62  ;;  %6976 = vtanh.f32 %v9149_v31  ;;  %v6427_v25 = vpack.c.bf16 %v5627_v32, %v5626_v48  ;;  %v3480_v40 = vmul.f32 %v3472_v37, %v9088_v10  ;;  %v5628_v10 = vld [vmem:[%s10164_s3 + $0x170] sm:$0xff]  ;;  %v5630_v37 = vld [vmem:[%s10164_s3 + $0x180] sm:$0x3] }
 0x79b   : > { %v3275_v34 = vadd.f32 1.0, %v6961_v43  ;;  %v6963_v33 = vpop.eup %6962  ;;  %3321 = vst [vmem:[%s8003_s21 + $0x368] sm:$0xff] %v3297_v46  ;;  %6978 = vtanh.f32 %v9153_v17  ;;  %v9170_v57 = vmul.f32 0.5, %v3447_v8  ;;  %v4040_v43 = vld [vmem:[#allocation9 + $0x20] sm:$0x3] }
 0x79c   : > { %v3479_v51 = vmul.f32 %v3471_v9, %v9094_v39  ;;  %v6965_v27 = vpop.eup %6964  ;;  %v3276_v63 = vadd.f32 1.0, %v6963_v33  ;;  %6980 = vtanh.f32 %v9155_v45  ;;  %v9249_v9 = vld [vmem:[#allocation9] sm:$0xff]  ;;  %v4039_v8 = vld [vmem:[#allocation9 + $0x18] sm:$0x3] }
 0x79d   : > { %v3299_v59 = vmul.f32 %v3275_v34, %v9099_v35  ;;  %v3474_v28 = vadd.f32 1.0, %v6965_v27  ;;  %6982 = vtanh.f32 %v9170_v57  ;;  %v5629_v35 = vld [vmem:[%s10164_s3 + $0x178] sm:$0xff]  ;;  %v6438_v34 = vpack.c.bf16 %v4039_v8, %v9249_v9  ;;  %v5661_v33 = vld [vmem:[%s10164_s3 + $0x190] sm:$0xff] }
 0x79e   : > { %v6967_v16 = vpop.eup %6966  ;;  %5607 = vmatmul.mubr.msk.f32.vlgmr.msra.gmra.mrb[86].mxu0 %vm764_vm6, %v3479_v51  ;;  %6179 = vmatprep.mubr.msk.f32.mxu1 %vm764_vm6, %v3479_v51  ;;  %v3300_v15 = vmul.f32 %v3276_v63, %v9108_v19  ;;  %v6431_v22 = vpack.c.bf16 %v5629_v35, %v5628_v10 }
 0x79f   : > { %v6969_v39 = vpop.eup %6968  ;;  %3323 = vst [vmem:[%s8003_s21 + $0x420] sm:$0xff] %v3299_v59  ;;  %v3473_v18 = vadd.f32 1.0, %v6967_v16  ;;  %6180 = vmatmul.mubr.msk.f32.vlgmr.msra.gmra.mrb[90].mxu1 %vm764_vm6, %v3480_v40  ;;  %3613 = vmatprep.mubr.f32.mxu0 %v7457_v14  ;;  %v3482_v41 = vmul.f32 %v3474_v28, %v9113_v30 }
 0x7a0   : > { %v3278_v3 = vadd.f32 1.0, %v6969_v39  ;;  %6426 = vmatpush3.bf16.msra.mxu1 %v8995_v61  ;;  %3324 = vst [vmem:[%s8003_s21 + $0x428] sm:$0xff] %v3300_v15 }
 0x7a1   : > { %v3481_v19 = vmul.f32 %v3473_v18, %v9118_v1  ;;  %6428 = vmatprep.subr.bf16.mxu1 %v6427_v25  ;;  %v6971_v47 = vpop.eup %6970 }
 0x7a2   : > { %v3302_v21 = vmul.f32 %v3278_v3, %v9123_v42  ;;  %5608 = vmatmul.mubr.msk.f32.gmra.mrb[88].mxu0 %vm764_vm6, %v3480_v40  ;;  %v6973_v53 = vpop.eup %6972  ;;  %v3279_v23 = vadd.f32 1.0, %v6971_v47 }
 0x7a3   : > { %6182 = vmatprep.mubr.msk.f32.mxu1 %vm764_vm6, %v3481_v19  ;;  %3619 = vmatprep.mubr.f32.mxu0 %v7457_v14  ;;  %v6975_v61 = vpop.eup %6974  ;;  %v3476_v24 = vadd.f32 1.0, %v6973_v53 }
 0x7a4   : > { %3326 = vst [vmem:[%s8003_s21 + $0x4e0] sm:$0xff] %v3302_v21  ;;  %6183 = vmatmul.mubr.msk.f32.gmra.mrb[92].mxu1 %vm764_vm6, %v3482_v41  ;;  %v6977_v1 = vpop.eup %6976  ;;  %v3303_v30 = vmul.f32 %v3279_v23, %v9135_v20  ;;  %v3475_v29 = vadd.f32 1.0, %v6975_v61 }
 0x7a5   : > { %6430 = vmatpush3.bf16.msra.mxu1 %v6427_v25  ;;  %v6979_v42 = vpop.eup %6978  ;;  %v3281_v13 = vadd.f32 1.0, %v6977_v1  ;;  %v3484_v55 = vmul.f32 %v3476_v24, %v9141_v4 }
 0x7a6   : > { %5609 = vmatmul.mubr.msk.f32.gmra.mrb[90].mxu0 %vm764_vm6, %v3481_v19  ;;  %6432 = vmatprep.subr.bf16.mxu1 %v6431_v22  ;;  %v6981_v12 = vpop.eup %6980  ;;  %3327 = vst [vmem:[%s8003_s21 + $0x4e8] sm:$0xff] %v3303_v30  ;;  %v3483_v11 = vmul.f32 %v3475_v29, %v9147_v49  ;;  %v3282_v50 = vadd.f32 1.0, %v6979_v42 }
 0x7a7   : > { %3625 = vmatprep.mubr.f32.mxu0 %v7457_v14  ;;  %v6983_v26 = vpop.eup %6982  ;;  %v3305_v20 = vmul.f32 %v3281_v13, %v9149_v31  ;;  %v3478_v62 = vadd.f32 1.0, %v6981_v12  ;;  %v4041_v31 = vld [vmem:[#allocation9 + $0x28] sm:$0x3] }
 0x7a8   : > { %v3306_v48 = vmul.f32 %v3282_v50, %v9153_v17  ;;  %v3477_v32 = vadd.f32 1.0, %v6983_v26  ;;  %6185 = vmatprep.mubr.msk.f32.mxu1 %vm764_vm6, %v3483_v11  ;;  %v6441_v17 = vpack.c.bf16 %v4041_v31, %v8976_v44  ;;  %v5660_v44 = vld [vmem:[%s10164_s3 + $0x188] sm:$0xff] }
 0x7a9   : > { %6434 = vmatpush3.bf16.msra.mxu1 %v6431_v22  ;;  %3329 = vst [vmem:[%s8003_s21 + $0x5a0] sm:$0xff] %v3305_v20  ;;  %v3486_v49 = vmul.f32 %v3478_v62, %v9155_v45  ;;  %v9246_v45 = vld [vmem:[#allocation9 + $0x8] sm:$0xff]  ;;  %v9266_v51 = vpack.c.bf16 %v5661_v33, %v5660_v44 }
 0x7aa   : > { %6186 = vmatmul.mubr.msk.f32.gmra.mrb[94].mxu1 %vm764_vm6, %v3484_v55  ;;  %5610 = vmatmul.mubr.msk.f32.gmra.mrb[92].mxu0 %vm764_vm6, %v3482_v41  ;;  %3330 = vst [vmem:[%s8003_s21 + $0x5a8] sm:$0xff] %v3306_v48  ;;  %v3485_v4 = vmul.f32 %v3477_v32, %v9170_v57  ;;  %v6435_v46 = vpack.c.bf16 %v4040_v43, %v9246_v45  ;;  %v3493_v57 = vld [vmem:[#allocation10] sm:$0x7] }
 0x7ab   : > { %6203 = vmatprep.subr.msk.mxu1 %vm600_vm2, %v5630_v37  ;;  %3631 = vmatprep.mubr.f32.mxu0 %v7457_v14  ;;  %v9270_v25 = vrot.slane %v3493_v57, %v7941_v36  ;;  %v9273_v27 = vrot.slane %v3493_v57, %v7943_v38  ;;  %v9276_v40 = vrot.slane %v3493_v57, %v7959_v56 }
 0x7ac   : > { %6188 = vmatprep.mubr.msk.f32.mxu1 %vm764_vm6, %v3485_v4  ;;  %6437 = vmatprep.subr.msk.bf16.mxu0 %vm7818_vm5, %v6435_v46 }
 0x7ad   : > { %6204 = vmatpush3.msk.msra.mxu1 %vm600_vm2, %v5630_v37  ;;  %6440 = vmatpush1.bf16.msk.msra.mxu0 %vm7818_vm5, %v6438_v34 }
 0x7ae   : > { %6189 = vmatmul.mubr.msk.f32.gmra.mrb[96].mxu1 %vm764_vm6, %v3486_v49  ;;  %5611 = vmatmul.mubr.msk.f32.gmra.mrb[94].mxu0 %vm764_vm6, %v3483_v11 }
 0x7af   : > { %6205 = vmatprep.mubr.msk.f32.mxu1 %vm575_vm3, %v7785_v52  ;;  %3637 = vmatprep.mubr.f32.mxu0 %v7457_v14 }
 0x7b0   : > { %6443 = vmatprep.subr.msk.bf16.mxu1 %vm7818_vm5, %v6441_v17 }
 0x7b2   : > { %6206 = vmatmul.mubr.msk.f32.vlgmr.msra.gmra.mrb[98].mxu1 %vm575_vm3, %v7787_v54  ;;  %5612 = vmatmul.mubr.msk.f32.gmra.mrb[96].mxu0 %vm764_vm6, %v3484_v55 }
 0x7b3   : > { %6208 = vmatprep.mubr.msk.f32.mxu1 %vm575_vm3, %v7793_v58  ;;  %3643 = vmatprep.mubr.f32.mxu0 %v7457_v14 }
 0x7b4   : > { %6446 = vmatpush3.bf16.msk.msra.mxu1 %vm7818_vm5, %v6441_v17 }
 0x7b5   : > { %6448 = vmatprep.subr.bf16.mxu1 %v9266_v51 }
 0x7b6   : > { %6209 = vmatmul.mubr.msk.f32.gmra.mrb[100].mxu1 %vm575_vm3, %v7795_v60  ;;  %5613 = vmatmul.mubr.msk.f32.gmra.mrb[98].mxu0 %vm764_vm6, %v3485_v4 }
 0x7b7   : > { %6211 = vmatprep.mubr.msk.f32.mxu1 %vm575_vm3, %v7801_v0  ;;  %3649 = vmatprep.mubr.f32.mxu0 %v7457_v14 }
 0x7ba   : > { %6212 = vmatmul.mubr.msk.f32.gmra.mrb[102].mxu1 %vm575_vm3, %v7803_v2  ;;  %5614 = vmatmul.mubr.msk.f32.gmra.mrb[100].mxu0 %vm764_vm6, %v3486_v49 }
 0x7bb   : > { %6214 = vmatprep.mubr.msk.f32.mxu1 %vm575_vm3, %v7809_v5  ;;  %4156 = vmatprep.mubr.f32.mxu0 %v7457_v14 }
 0x7be   : > { %6215 = vmatmul.mubr.msk.f32.gmra.mrb[104].mxu1 %vm575_vm3, %v7811_v6 }
 0x871   : > { %v3609_v59 = vpop.f32.mrb[86].mxu0 }
 0x872   : > { %v3610_v63 = vadd.f32 %v3609_v59, %v9270_v25  ;;  %v3611_v16 = vpop.f32.mrb[87].mxu0  ;;  %v6181_v28 = vpop.f32.mrb[90].mxu1 }
 0x873   : > { %v3612_v39 = vadd.f32 %v3611_v16, %v9273_v27  ;;  %v3728_v15 = vadd.f32 %v6181_v28, %v9276_v40  ;;  %v3722_v18 = vpop.f32.mrb[91].mxu1 }
 0x874   : > { %v3761_v10 = vmul.f32 0.5, %v3610_v63  ;;  %v3723_v35 = vadd.f32 %v3722_v18, %v9276_v40 }
 0x875   : > { %v3762_v3 = vmul.f32 0.5, %v3612_v39  ;;  %v9282_v19 = vmul.f32 0.5, %v3728_v15  ;;  %v3615_v47 = vpop.f32.mrb[88].mxu0 }
 0x876   : > { %6984 = vtanh.f32 %v3761_v10  ;;  %v9284_v41 = vmul.f32 0.5, %v3723_v35  ;;  %v3616_v21 = vadd.f32 %v3615_v47, %v9270_v25  ;;  %v3617_v22 = vpop.f32.mrb[89].mxu0 }
 0x877   : > { %6986 = vtanh.f32 %v3762_v3  ;;  %v3618_v53 = vadd.f32 %v3617_v22, %v9273_v27  ;;  %v6184_v23 = vpop.f32.mrb[92].mxu1 }
 0x878   : > { %6988 = vtanh.f32 %v9282_v19  ;;  %v9289_v61 = vmul.f32 0.5, %v3616_v21  ;;  %v3738_v24 = vadd.f32 %v6184_v23, %v9276_v40  ;;  %v3732_v1 = vpop.f32.mrb[93].mxu1 }
 0x879   : > { %6990 = vtanh.f32 %v9284_v41  ;;  %v9293_v30 = vmul.f32 0.5, %v3618_v53  ;;  %v3733_v29 = vadd.f32 %v3732_v1, %v9276_v40  ;;  %v3621_v42 = vpop.f32.mrb[90].mxu0 }
 0x87a   : > { %6992 = vtanh.f32 %v9289_v61  ;;  %v9297_v13 = vmul.f32 0.5, %v3738_v24  ;;  %v3622_v12 = vadd.f32 %v3621_v42, %v9270_v25  ;;  %v3623_v11 = vpop.f32.mrb[91].mxu0 }
 0x87b   : > { %6994 = vtanh.f32 %v9293_v30  ;;  %v9301_v50 = vmul.f32 0.5, %v3733_v29  ;;  %v3624_v26 = vadd.f32 %v3623_v11, %v9273_v27 }
 0x87c   : > { %6996 = vtanh.f32 %v9297_v13  ;;  %v9305_v55 = vmul.f32 0.5, %v3622_v12 }
 0x87d   : > { %6998 = vtanh.f32 %v9301_v50  ;;  %v9308_v20 = vmul.f32 0.5, %v3624_v26  ;;  %v6187_v62 = vpop.f32.mrb[94].mxu1  ;;  %v3627_v37 = vpop.f32.mrb[92].mxu0 }
 0x87e   : > { %7000 = vtanh.f32 %v9305_v55  ;;  %v3748_v48 = vadd.f32 %v6187_v62, %v9276_v40  ;;  %v3742_v32 = vpop.f32.mrb[95].mxu1  ;;  %v3628_v4 = vadd.f32 %v3627_v37, %v9270_v25  ;;  %v3629_v49 = vpop.f32.mrb[93].mxu0 }
 0x87f   : > { %7002 = vtanh.f32 %v9308_v20  ;;  %v3743_v31 = vadd.f32 %v3742_v32, %v9276_v40  ;;  %v3630_v17 = vadd.f32 %v3629_v49, %v9273_v27 }
 0x880   : > { %v6985_v43 = vpop.eup %6984  ;;  %v9316_v46 = vmul.f32 0.5, %v3748_v48  ;;  %v9318_v8 = vmul.f32 0.5, %v3628_v4 }
 0x881   : > { %v6987_v34 = vpop.eup %6986  ;;  %v3809_v44 = vadd.f32 1.0, %v6985_v43  ;;  %v9320_v33 = vmul.f32 0.5, %v3743_v31  ;;  %v9322_v57 = vmul.f32 0.5, %v3630_v17  ;;  %v6190_v59 = vpop.f32.mrb[96].mxu1 }
 0x882   : > { %v3633_v63 = vpop.f32.mrb[94].mxu0  ;;  %v6989_v16 = vpop.eup %6988  ;;  %v3810_v28 = vadd.f32 1.0, %v6987_v34  ;;  %7004 = vtanh.f32 %v9316_v46  ;;  %v3758_v39 = vadd.f32 %v6190_v59, %v9276_v40 }
 0x883   : > { %v3752_v15 = vpop.f32.mrb[97].mxu1  ;;  %v3634_v18 = vadd.f32 %v3633_v63, %v9270_v25  ;;  %v3635_v35 = vpop.f32.mrb[95].mxu0  ;;  %v3833_v21 = vmul.f32 %v3809_v44, %v3761_v10  ;;  %v3814_v22 = vadd.f32 1.0, %v6989_v16  ;;  %7006 = vtanh.f32 %v9320_v33 }
 0x884   : > { %v6991_v47 = vpop.eup %6990  ;;  %v3753_v53 = vadd.f32 %v3752_v15, %v9276_v40  ;;  %v3834_v24 = vmul.f32 %v3810_v28, %v3762_v3  ;;  %7008 = vtanh.f32 %v9318_v8  ;;  %v9330_v29 = vmul.f32 0.5, %v3758_v39  ;;  %v9337_v40 = vld [vmem:[#allocation7] ss:$0 sm:$0xff] }
 0x885   : > { %v6993_v23 = vpop.eup %6992  ;;  %v3811_v1 = vadd.f32 1.0, %v6991_v47  ;;  %3857 = vst [vmem:[%s8003_s21 + $0x78] sm:$0xff] %v3833_v21  ;;  %v3838_v12 = vmul.f32 %v3814_v22, %v9282_v19  ;;  %7010 = vtanh.f32 %v9322_v57  ;;  %v6207_v26 = vpop.f32.mrb[98].mxu1  ;;  %v9342_v32 = vmul.f32 0.5, %v3634_v18 }
 0x886   : > { %v6995_v42 = vpop.eup %6994  ;;  %v3812_v11 = vadd.f32 1.0, %v6993_v23  ;;  %v9335_v10 = vmul.f32 0.5, %v3753_v53  ;;  %v3639_v62 = vpop.f32.mrb[96].mxu0  ;;  %3858 = vst [vmem:[%s8003_s21 + $0x80] sm:$0xff] %v3834_v24  ;;  %7012 = vtanh.f32 %v9330_v29  ;;  %v3636_v43 = vadd.f32 %v3635_v35, %v9273_v27 }
 0x887   : > { %v6997_v3 = vpop.eup %6996  ;;  %v3835_v37 = vmul.f32 %v3811_v1, %v9284_v41  ;;  %v3813_v48 = vadd.f32 1.0, %v6995_v42  ;;  %v3965_v19 = vpop.f32.mrb[99].mxu1  ;;  %3862 = vst [vmem:[%s8003_s21 + $0x148] sm:$0xff] %v3838_v12  ;;  %v3971_v59 = vadd.f32 %v6207_v26, %v9337_v40  ;;  %v3640_v21 = vadd.f32 %v3639_v62, %v9270_v25 }
 0x888   : > { %v3641_v4 = vpop.f32.mrb[97].mxu0  ;;  %v6999_v49 = vpop.eup %6998  ;;  %v3836_v31 = vmul.f32 %v3812_v11, %v9289_v61  ;;  %v3820_v17 = vadd.f32 1.0, %v6997_v3  ;;  %7014 = vtanh.f32 %v9335_v10  ;;  %v9354_v28 = vmul.f32 0.5, %v3636_v43 }
 0x889   : > { %v7001_v34 = vpop.eup %7000  ;;  %3859 = vst [vmem:[%s8003_s21 + $0x88] sm:$0xff] %v3835_v37  ;;  %v3837_v41 = vmul.f32 %v3813_v48, %v9293_v30  ;;  %v3817_v44 = vadd.f32 1.0, %v6999_v49  ;;  %7016 = vtanh.f32 %v9342_v32  ;;  %v3966_v39 = vadd.f32 %v9337_v40, %v3965_v19  ;;  %v6210_v15 = vpop.f32.mrb[100].mxu1 }
 0x88a   : > { %v7003_v63 = vpop.eup %7002  ;;  %3860 = vst [vmem:[%s8003_s21 + $0x138] sm:$0xff] %v3836_v31  ;;  %v3844_v61 = vmul.f32 %v3820_v17, %v9297_v13  ;;  %v3815_v16 = vadd.f32 1.0, %v7001_v34  ;;  %v3645_v18 = vpop.f32.mrb[98].mxu0  ;;  %v9359_v47 = vmul.f32 0.5, %v3971_v59  ;;  %7018 = vtanh.f32 %v9354_v28 }
 0x88b   : > { %3861 = vst [vmem:[%s8003_s21 + $0x140] sm:$0xff] %v3837_v41  ;;  %v3841_v30 = vmul.f32 %v3817_v44, %v9301_v50  ;;  %v3816_v35 = vadd.f32 1.0, %v7003_v63  ;;  %v3975_v22 = vpop.f32.mrb[101].mxu1  ;;  %v3647_v53 = vpop.f32.mrb[99].mxu0  ;;  %v9365_v23 = vmul.f32 0.5, %v3966_v39  ;;  %v3642_v24 = vadd.f32 %v3641_v4, %v9273_v27 }
 0x88c   : > { %3868 = vst [vmem:[%s8003_s21 + $0x2c8] sm:$0xff] %v3844_v61  ;;  %v3839_v13 = vmul.f32 %v3815_v16, %v9305_v55  ;;  %v7005_v1 = vpop.eup %7004  ;;  %7020 = vtanh.f32 %v9359_v47  ;;  %v9371_v42 = vmul.f32 0.5, %v3640_v21  ;;  %v3981_v12 = vadd.f32 %v6210_v15, %v9337_v40 }
 0x88d   : > { %3865 = vst [vmem:[%s8003_s21 + $0x208] sm:$0xff] %v3841_v30  ;;  %v3840_v50 = vmul.f32 %v3816_v35, %v9308_v20  ;;  %v7007_v11 = vpop.eup %7006  ;;  %v3826_v55 = vadd.f32 1.0, %v7005_v1  ;;  %7022 = vtanh.f32 %v9365_v23  ;;  %v9376_v26 = vmul.f32 0.5, %v3642_v24  ;;  %v6213_v3 = vpop.f32.mrb[102].mxu1 }
 0x88e   : > { %3863 = vst [vmem:[%s8003_s21 + $0x1f8] sm:$0xff] %v3839_v13  ;;  %v3976_v62 = vadd.f32 %v9337_v40, %v3975_v22  ;;  %v3651_v37 = vpop.f32.mrb[100].mxu0  ;;  %v7009_v48 = vpop.eup %7008  ;;  %v3823_v20 = vadd.f32 1.0, %v7007_v11  ;;  %7024 = vtanh.f32 %v9371_v42  ;;  %v9381_v19 = vmul.f32 0.5, %v3981_v12 }
 0x88f   : > { %3864 = vst [vmem:[%s8003_s21 + $0x200] sm:$0xff] %v3840_v50  ;;  %v3646_v4 = vadd.f32 %v3645_v18, %v9270_v25  ;;  %v3985_v49 = vpop.f32.mrb[103].mxu1  ;;  %v3653_v31 = vpop.f32.mrb[101].mxu0  ;;  %v3850_v43 = vmul.f32 %v3826_v55, %v9316_v46  ;;  %v3818_v34 = vadd.f32 1.0, %v7009_v48  ;;  %7026 = vtanh.f32 %v9376_v26 }
 0x890   : > { %v7011_v17 = vpop.eup %7010  ;;  %v9386_v41 = vmul.f32 0.5, %v3976_v62  ;;  %v3847_v59 = vmul.f32 %v3823_v20, %v9320_v33  ;;  %7028 = vtanh.f32 %v9381_v19  ;;  %v3648_v15 = vadd.f32 %v3647_v53, %v9273_v27 }
 0x891   : > { %v7013_v44 = vpop.eup %7012  ;;  %v3819_v63 = vadd.f32 1.0, %v7011_v17  ;;  %v9390_v61 = vmul.f32 0.5, %v3646_v4  ;;  %3874 = vst [vmem:[%s8003_s21 + $0x448] sm:$0xff] %v3850_v43  ;;  %v3842_v39 = vmul.f32 %v3818_v34, %v9318_v8  ;;  %v6216_v18 = vpop.f32.mrb[104].mxu1  ;;  %v3991_v21 = vadd.f32 %v6213_v3, %v9337_v40  ;;  %v5662_v4 = vld [vmem:[%s10164_s3 + $0x198] sm:$0xff] }
 0x892   : > { %v7015_v16 = vpop.eup %7014  ;;  %v3832_v46 = vadd.f32 1.0, %v7013_v44  ;;  %7030 = vtanh.f32 %v9386_v41  ;;  %3871 = vst [vmem:[%s8003_s21 + $0x388] sm:$0xff] %v3847_v59  ;;  %v3995_v22 = vpop.f32.mrb[105].mxu1  ;;  %v9402_v24 = vmul.f32 0.5, %v3648_v15  ;;  %v3986_v53 = vadd.f32 %v9337_v40, %v3985_v49  ;;  %v5663_v49 = vld [vmem:[%s10164_s3 + $0x1a0] sm:$0xff] }
 0x893   : > { %v7017_v30 = vpop.eup %7016  ;;  %v3843_v33 = vmul.f32 %v3819_v63, %v9322_v57  ;;  %v3829_v35 = vadd.f32 1.0, %v7015_v16  ;;  %7032 = vtanh.f32 %v9390_v61  ;;  %3866 = vst [vmem:[%s8003_s21 + $0x2b8] sm:$0xff] %v3842_v39  ;;  %v9407_v57 = vmul.f32 0.5, %v3991_v21 }
 0x894   : > { %v3856_v8 = vmul.f32 %v3832_v46, %v9330_v29  ;;  %v3821_v13 = vadd.f32 1.0, %v7017_v30  ;;  %v3652_v50 = vadd.f32 %v3651_v37, %v9270_v25  ;;  %v3654_v12 = vadd.f32 %v3653_v31, %v9273_v27  ;;  %v7019_v11 = vpop.eup %7018 }
 0x895   : > { %3867 = vst [vmem:[%s8003_s21 + $0x2c0] sm:$0xff] %v3843_v33  ;;  %v3853_v1 = vmul.f32 %v3829_v35, %v9335_v10  ;;  %7034 = vtanh.f32 %v9402_v24  ;;  %v9414_v55 = vmul.f32 0.5, %v3986_v53  ;;  %v4001_v62 = vadd.f32 %v6216_v18, %v9337_v40 }
 0x896   : > { %3880 = vst [vmem:[%s8003_s21 + $0x5c8] sm:$0xff] %v3856_v8  ;;  %v3845_v29 = vmul.f32 %v3821_v13, %v9342_v32  ;;  %v7021_v3 = vpop.eup %7020  ;;  %v3822_v10 = vadd.f32 1.0, %v7019_v11  ;;  %7036 = vtanh.f32 %v9407_v57  ;;  %v9419_v48 = vmul.f32 0.5, %v3652_v50 }
 0x897   : > { %3877 = vst [vmem:[%s8003_s21 + $0x508] sm:$0xff] %v3853_v1  ;;  %v9421_v25 = vmul.f32 0.5, %v3654_v12  ;;  %v7023_v27 = vpop.eup %7022  ;;  %v4021_v37 = vadd.f32 1.0, %v7021_v3  ;;  %7038 = vtanh.f32 %v9414_v55  ;;  %v9425_v32 = vmul.f32 0.5, %v4001_v62 }
 0x898   : > { %3869 = vst [vmem:[%s8003_s21 + $0x378] sm:$0xff] %v3845_v29  ;;  %v3996_v20 = vadd.f32 %v9337_v40, %v3995_v22  ;;  %v7025_v31 = vpop.eup %7024  ;;  %v3846_v17 = vmul.f32 %v3822_v10, %v9354_v28  ;;  %v4020_v43 = vadd.f32 1.0, %v7023_v27  ;;  %7040 = vtanh.f32 %v9419_v48  ;;  %v5666_v27 = vld [vmem:[%s10164_s3 + $0x1b8] sm:$0x3] }
 0x899   : > { %v7027_v34 = vpop.eup %7026  ;;  %v3824_v44 = vadd.f32 1.0, %v7025_v31  ;;  %7042 = vtanh.f32 %v9421_v25  ;;  %v6451_v46 = vpack.c.bf16 %v5663_v49, %v5662_v4  ;;  %v4029_v28 = vmul.f32 %v4021_v37, %v9359_v47  ;;  %v5665_v47 = vld [vmem:[%s10164_s3 + $0x1b0] sm:$0xff] }
 0x89a   : > { %v9437_v59 = vmul.f32 0.5, %v3996_v20  ;;  %v7029_v63 = vpop.eup %7028  ;;  %3870 = vst [vmem:[%s8003_s21 + $0x380] sm:$0xff] %v3846_v17  ;;  %v4028_v16 = vmul.f32 %v4020_v43, %v9365_v23  ;;  %v3825_v39 = vadd.f32 1.0, %v7027_v34  ;;  %7044 = vtanh.f32 %v9425_v32  ;;  %v5664_v23 = vld [vmem:[%s10164_s3 + $0x1a8] sm:$0xff] }
 0x89b   : > { %v3848_v18 = vmul.f32 %v3824_v44, %v9371_v42  ;;  %v4023_v30 = vadd.f32 1.0, %v7029_v63  ;;  %v6455_v53 = vpack.c.bf16 %v5665_v47, %v5664_v23 }
 0x89c   : > { %v7031_v15 = vpop.eup %7030  ;;  %7046 = vtanh.f32 %v9437_v59  ;;  %v3849_v35 = vmul.f32 %v3825_v39, %v9376_v26  ;;  %5643 = vmatmul.mubr.msk.f32.vlgmr.msra.gmra.mrb[102].mxu0 %vm764_vm6, %v4028_v16  ;;  %6221 = vmatprep.mubr.msk.f32.mxu1 %vm764_vm6, %v4028_v16 }
 0x89d   : > { %v7033_v33 = vpop.eup %7032  ;;  %v4022_v21 = vadd.f32 1.0, %v7031_v15  ;;  %3872 = vst [vmem:[%s8003_s21 + $0x438] sm:$0xff] %v3848_v18  ;;  %6222 = vmatmul.mubr.msk.f32.vlgmr.msra.gmra.mrb[106].mxu1 %vm764_vm6, %v4029_v28  ;;  %4162 = vmatprep.mubr.f32.mxu0 %v7457_v14  ;;  %v4031_v8 = vmul.f32 %v4023_v30, %v9381_v19 }
 0x89e   : > { %v3827_v42 = vadd.f32 1.0, %v7033_v33  ;;  %3873 = vst [vmem:[%s8003_s21 + $0x440] sm:$0xff] %v3849_v35  ;;  %6450 = vmatpush3.bf16.msra.mxu1 %v9266_v51 }
 0x89f   : > { %v4030_v26 = vmul.f32 %v4022_v21, %v9386_v41  ;;  %v7035_v22 = vpop.eup %7034  ;;  %6452 = vmatprep.subr.bf16.mxu1 %v6451_v46 }
 0x8a0   : > { %v3851_v13 = vmul.f32 %v3827_v42, %v9390_v61  ;;  %v7037_v1 = vpop.eup %7036  ;;  %v3828_v50 = vadd.f32 1.0, %v7035_v22  ;;  %5644 = vmatmul.mubr.msk.f32.gmra.mrb[104].mxu0 %vm764_vm6, %v4029_v28 }
 0x8a1   : > { %6224 = vmatprep.mubr.msk.f32.mxu1 %vm764_vm6, %v4030_v26  ;;  %v7039_v12 = vpop.eup %7038  ;;  %v4025_v11 = vadd.f32 1.0, %v7037_v1  ;;  %4168 = vmatprep.mubr.f32.mxu0 %v7457_v14 }
 0x8a2   : > { %3875 = vst [vmem:[%s8003_s21 + $0x4f8] sm:$0xff] %v3851_v13  ;;  %6225 = vmatmul.mubr.msk.f32.gmra.mrb[108].mxu1 %vm764_vm6, %v4031_v8  ;;  %v7041_v51 = vpop.eup %7040  ;;  %v3852_v19 = vmul.f32 %v3828_v50, %v9402_v24  ;;  %v4024_v41 = vadd.f32 1.0, %v7039_v12 }
 0x8a3   : > { %6454 = vmatpush3.bf16.msra.mxu1 %v6451_v46  ;;  %v7043_v61 = vpop.eup %7042  ;;  %v3830_v29 = vadd.f32 1.0, %v7041_v51  ;;  %v4033_v24 = vmul.f32 %v4025_v11, %v9407_v57 }
 0x8a4   : > { %6456 = vmatprep.subr.bf16.mxu1 %v6455_v53  ;;  %v7045_v62 = vpop.eup %7044  ;;  %3876 = vst [vmem:[%s8003_s21 + $0x500] sm:$0xff] %v3852_v19  ;;  %v4032_v3 = vmul.f32 %v4024_v41, %v9414_v55  ;;  %v3831_v10 = vadd.f32 1.0, %v7043_v61  ;;  %5645 = vmatmul.mubr.msk.f32.gmra.mrb[106].mxu0 %vm764_vm6, %v4030_v26 }
 0x8a5   : > { %v3854_v20 = vmul.f32 %v3830_v29, %v9419_v48  ;;  %v4027_v4 = vadd.f32 1.0, %v7045_v62  ;;  %4174 = vmatprep.mubr.f32.mxu0 %v7457_v14 }
 0x8a6   : > { %v7047_v37 = vpop.eup %7046  ;;  %v3855_v49 = vmul.f32 %v3831_v10, %v9421_v25  ;;  %6227 = vmatprep.mubr.msk.f32.mxu1 %vm764_vm6, %v4032_v3 }
 0x8a7   : > { %v4026_v31 = vadd.f32 1.0, %v7047_v37  ;;  %6458 = vmatpush3.bf16.msra.mxu1 %v6455_v53  ;;  %3878 = vst [vmem:[%s8003_s21 + $0x5b8] sm:$0xff] %v3854_v20  ;;  %v4035_v57 = vmul.f32 %v4027_v4, %v9425_v32 }
 0x8a8   : > { %6228 = vmatmul.mubr.msk.f32.gmra.mrb[110].mxu1 %vm764_vm6, %v4033_v24  ;;  %6245 = vmatprep.subr.msk.mxu1 %vm600_vm2, %v5666_v27  ;;  %3879 = vst [vmem:[%s8003_s21 + $0x5c0] sm:$0xff] %v3855_v49 }
 0x8a9   : > { %v4034_v55 = vmul.f32 %v4026_v31, %v9437_v59  ;;  %5646 = vmatmul.mubr.msk.f32.gmra.mrb[108].mxu0 %vm764_vm6, %v4031_v8 }
 0x8aa   : > { %4180 = vmatprep.mubr.f32.mxu0 %v7457_v14 }
 0x8ab   : > { %6230 = vmatprep.mubr.msk.f32.mxu1 %vm764_vm6, %v4034_v55  ;;  %6246 = vmatpush3.msk.msra.mxu1 %vm600_vm2, %v5666_v27 }
 0x8ac   : > { %6231 = vmatmul.mubr.msk.f32.gmra.mrb[112].mxu1 %vm764_vm6, %v4035_v57 }
 0x8ad   : > { %6247 = vmatprep.mubr.msk.f32.mxu1 %vm575_vm3, %v7785_v52  ;;  %5647 = vmatmul.mubr.msk.f32.gmra.mrb[110].mxu0 %vm764_vm6, %v4032_v3  ;;  %v4589_v52 = vld [vmem:[#allocation9 + $0x20] sm:$0x3] }
 0x8ae   : > { %4186 = vmatprep.mubr.f32.mxu0 %v7457_v14 }
 0x8b0   : > { %6248 = vmatmul.mubr.msk.f32.vlgmr.msra.gmra.mrb[114].mxu1 %vm575_vm3, %v7787_v54  ;;  %v6459_v54 = vpack.c.bf16 %v4589_v52, %v9246_v45 }
 0x8b1   : > { %6250 = vmatprep.mubr.msk.f32.mxu1 %vm575_vm3, %v7793_v58  ;;  %5648 = vmatmul.mubr.msk.f32.gmra.mrb[112].mxu0 %vm764_vm6, %v4033_v24  ;;  %v4588_v58 = vld [vmem:[#allocation9 + $0x18] sm:$0x3] }
 0x8b2   : > { %4192 = vmatprep.mubr.f32.mxu0 %v7457_v14  ;;  %6461 = vmatprep.subr.msk.bf16.mxu0 %vm7818_vm5, %v6459_v54 }
 0x8b4   : > { %6251 = vmatmul.mubr.msk.f32.gmra.mrb[116].mxu1 %vm575_vm3, %v7795_v60  ;;  %v6462_v60 = vpack.c.bf16 %v4588_v58, %v9249_v9 }
 0x8b5   : > { %6253 = vmatprep.mubr.msk.f32.mxu1 %vm575_vm3, %v7801_v0  ;;  %5649 = vmatmul.mubr.msk.f32.gmra.mrb[114].mxu0 %vm764_vm6, %v4034_v55  ;;  %v4587_v0 = vld [vmem:[#allocation9 + $0x10] sm:$0xff] }
 0x8b6   : > { %4198 = vmatprep.mubr.f32.mxu0 %v7457_v14  ;;  %6464 = vmatpush1.bf16.msk.msra.mxu0 %vm7818_vm5, %v6462_v60 }
 0x8b8   : > { %6254 = vmatmul.mubr.msk.f32.gmra.mrb[118].mxu1 %vm575_vm3, %v7803_v2  ;;  %v4590_v2 = vld [vmem:[#allocation9 + $0x28] sm:$0x3] }
 0x8b9   : > { %6256 = vmatprep.mubr.msk.f32.mxu1 %vm575_vm3, %v7809_v5  ;;  %5650 = vmatmul.mubr.msk.f32.gmra.mrb[116].mxu0 %vm764_vm6, %v4035_v57  ;;  %v6465_v5 = vpack.c.bf16 %v4590_v2, %v4587_v0 }
 0x8ba   : > { %4705 = vmatprep.mubr.f32.mxu0 %v7457_v14 }
 0x8bb   : > { %6467 = vmatprep.subr.msk.bf16.mxu1 %vm7818_vm5, %v6465_v5 }
 0x8bc   : > { %6257 = vmatmul.mubr.msk.f32.gmra.mrb[120].mxu1 %vm575_vm3, %v7811_v6  ;;  %v4042_v6 = vld [vmem:[#allocation10] sm:$0x7] }
 0x8bd   : > { %6470 = vmatpush3.bf16.msk.msra.mxu1 %vm7818_vm5, %v6465_v5  ;;  %v9525_v45 = vrot.slane %v4042_v6, %v7941_v36  ;;  %v9528_v9 = vrot.slane %v4042_v6, %v7943_v38  ;;  %v9531_v48 = vrot.slane %v4042_v6, %v7959_v56 }
 0x96f   : > { %v4158_v25 = vpop.f32.mrb[102].mxu0 }
 0x970   : > { %v4159_v32 = vadd.f32 %v4158_v25, %v9525_v45  ;;  %v4160_v17 = vpop.f32.mrb[103].mxu0  ;;  %v6223_v43 = vpop.f32.mrb[106].mxu1 }
 0x971   : > { %v4161_v34 = vadd.f32 %v4160_v17, %v9528_v9  ;;  %v4277_v7 = vadd.f32 %v6223_v43, %v9531_v48  ;;  %v4271_v44 = vpop.f32.mrb[107].mxu1 }
 0x972   : > { %v4310_v59 = vmul.f32 0.5, %v4159_v32  ;;  %v4272_v63 = vadd.f32 %v4271_v44, %v9531_v48 }
 0x973   : > { %v9537_v16 = vmul.f32 0.5, %v4161_v34  ;;  %v9539_v39 = vmul.f32 0.5, %v4277_v7  ;;  %v4164_v46 = vpop.f32.mrb[104].mxu0 }
 0x974   : > { %7048 = vtanh.f32 %v4310_v59  ;;  %v9541_v15 = vmul.f32 0.5, %v4272_v63  ;;  %v4165_v28 = vadd.f32 %v4164_v46, %v9525_v45  ;;  %v4166_v18 = vpop.f32.mrb[105].mxu0 }
 0x975   : > { %v6226_v30 = vpop.f32.mrb[108].mxu1  ;;  %7050 = vtanh.f32 %v9537_v16  ;;  %v4167_v33 = vadd.f32 %v4166_v18, %v9528_v9 }
 0x976   : > { %v4287_v35 = vadd.f32 %v6226_v30, %v9531_v48  ;;  %v4281_v21 = vpop.f32.mrb[109].mxu1  ;;  %7052 = vtanh.f32 %v9539_v39  ;;  %v9548_v23 = vmul.f32 0.5, %v4165_v28 }
 0x977   : > { %v4282_v47 = vadd.f32 %v4281_v21, %v9531_v48  ;;  %7054 = vtanh.f32 %v9541_v15  ;;  %v9552_v42 = vmul.f32 0.5, %v4167_v33  ;;  %v4170_v22 = vpop.f32.mrb[106].mxu0 }
 0x978   : > { %v9554_v26 = vmul.f32 0.5, %v4287_v35  ;;  %7056 = vtanh.f32 %v9548_v23  ;;  %v4171_v13 = vadd.f32 %v4170_v22, %v9525_v45  ;;  %v4172_v53 = vpop.f32.mrb[107].mxu0 }
 0x979   : > { %v9557_v8 = vmul.f32 0.5, %v4282_v47  ;;  %7058 = vtanh.f32 %v9552_v42  ;;  %v4173_v1 = vadd.f32 %v4172_v53, %v9528_v9 }
 0x97a   : > { %7060 = vtanh.f32 %v9554_v26  ;;  %v9563_v50 = vmul.f32 0.5, %v4171_v13 }
 0x97b   : > { %v6229_v12 = vpop.f32.mrb[110].mxu1  ;;  %7062 = vtanh.f32 %v9557_v8  ;;  %v9566_v11 = vmul.f32 0.5, %v4173_v1 }
 0x97c   : > { %v4297_v51 = vadd.f32 %v6229_v12, %v9531_v48  ;;  %v4291_v19 = vpop.f32.mrb[111].mxu1  ;;  %v4176_v41 = vpop.f32.mrb[108].mxu0  ;;  %7064 = vtanh.f32 %v9563_v50 }
 0x97d   : > { %v4292_v61 = vadd.f32 %v4291_v19, %v9531_v48  ;;  %v4177_v29 = vadd.f32 %v4176_v41, %v9525_v45  ;;  %v4178_v62 = vpop.f32.mrb[109].mxu0  ;;  %7066 = vtanh.f32 %v9566_v11 }
 0x97e   : > { %v9573_v3 = vmul.f32 0.5, %v4297_v51  ;;  %v4179_v10 = vadd.f32 %v4178_v62, %v9528_v9  ;;  %v7049_v27 = vpop.eup %7048 }
 0x97f   : > { %v9576_v37 = vmul.f32 0.5, %v4292_v61  ;;  %v9578_v24 = vmul.f32 0.5, %v4177_v29  ;;  %v6232_v20 = vpop.f32.mrb[112].mxu1  ;;  %v7051_v4 = vpop.eup %7050  ;;  %v4358_v49 = vadd.f32 1.0, %v7049_v27 }
 0x980   : > { %7068 = vtanh.f32 %v9573_v3  ;;  %v9581_v31 = vmul.f32 0.5, %v4179_v10  ;;  %v4307_v55 = vadd.f32 %v6232_v20, %v9531_v48  ;;  %v4301_v57 = vpop.f32.mrb[113].mxu1  ;;  %v4182_v52 = vpop.f32.mrb[110].mxu0  ;;  %v4359_v58 = vadd.f32 1.0, %v7051_v4 }
 0x981   : > { %v7053_v54 = vpop.eup %7052  ;;  %7070 = vtanh.f32 %v9576_v37  ;;  %v4302_v60 = vadd.f32 %v4301_v57, %v9531_v48  ;;  %v4183_v0 = vadd.f32 %v4182_v52, %v9525_v45  ;;  %v4184_v2 = vpop.f32.mrb[111].mxu0  ;;  %v4382_v6 = vmul.f32 %v4358_v49, %v4310_v59 }
 0x982   : > { %v7055_v5 = vpop.eup %7054  ;;  %v4363_v25 = vadd.f32 1.0, %v7053_v54  ;;  %7072 = vtanh.f32 %v9578_v24  ;;  %v9588_v32 = vmul.f32 0.5, %v4307_v55  ;;  %v4383_v43 = vmul.f32 %v4359_v58, %v9537_v16 }
 0x983   : > { %v7057_v17 = vpop.eup %7056  ;;  %v4360_v34 = vadd.f32 1.0, %v7055_v5  ;;  %7074 = vtanh.f32 %v9581_v31  ;;  %v9592_v7 = vmul.f32 0.5, %v4302_v60  ;;  %v6249_v48 = vpop.f32.mrb[114].mxu1  ;;  %4406 = vst [vmem:[%s8003_s21 + $0x90] sm:$0xff] %v4382_v6  ;;  %v9597_v46 = vmul.f32 0.5, %v4183_v0 }
 0x984   : > { %v7059_v44 = vpop.eup %7058  ;;  %v4387_v59 = vmul.f32 %v4363_v25, %v9539_v39  ;;  %v4361_v63 = vadd.f32 1.0, %v7057_v17  ;;  %7076 = vtanh.f32 %v9588_v32  ;;  %v4514_v28 = vpop.f32.mrb[115].mxu1  ;;  %4407 = vst [vmem:[%s8003_s21 + $0x98] sm:$0xff] %v4383_v43  ;;  %v4185_v35 = vadd.f32 %v4184_v2, %v9528_v9 }
 0x985   : > { %v4188_v18 = vpop.f32.mrb[112].mxu0  ;;  %v7061_v16 = vpop.eup %7060  ;;  %v4384_v30 = vmul.f32 %v4360_v34, %v9541_v15  ;;  %v4362_v33 = vadd.f32 1.0, %v7059_v44  ;;  %7078 = vtanh.f32 %v9592_v7  ;;  %v4520_v13 = vadd.f32 %v6249_v48, %v9337_v40 }
 0x986   : > { %v4190_v21 = vpop.f32.mrb[113].mxu0  ;;  %v7063_v39 = vpop.eup %7062  ;;  %4411 = vst [vmem:[%s8003_s21 + $0x160] sm:$0xff] %v4387_v59  ;;  %v4385_v47 = vmul.f32 %v4361_v63, %v9548_v23  ;;  %v4369_v22 = vadd.f32 1.0, %v7061_v16  ;;  %7080 = vtanh.f32 %v9597_v46  ;;  %v9609_v12 = vmul.f32 0.5, %v4185_v35 }
 0x987   : > { %v7065_v53 = vpop.eup %7064  ;;  %4408 = vst [vmem:[%s8003_s21 + $0xa0] sm:$0xff] %v4384_v30  ;;  %v4386_v15 = vmul.f32 %v4362_v33, %v9552_v42  ;;  %v4366_v1 = vadd.f32 1.0, %v7063_v39  ;;  %v4515_v51 = vadd.f32 %v9337_v40, %v4514_v28  ;;  %v6252_v19 = vpop.f32.mrb[116].mxu1  ;;  %v9614_v29 = vmul.f32 0.5, %v4520_v13 }
 0x988   : > { %v7067_v41 = vpop.eup %7066  ;;  %4409 = vst [vmem:[%s8003_s21 + $0x150] sm:$0xff] %v4385_v47  ;;  %v4393_v23 = vmul.f32 %v4369_v22, %v9554_v26  ;;  %v4364_v61 = vadd.f32 1.0, %v7065_v53  ;;  %v4189_v62 = vadd.f32 %v4188_v18, %v9525_v45  ;;  %v4524_v10 = vpop.f32.mrb[117].mxu1  ;;  %7082 = vtanh.f32 %v9609_v12 }
 0x989   : > { %v4194_v27 = vpop.f32.mrb[114].mxu0  ;;  %4410 = vst [vmem:[%s8003_s21 + $0x158] sm:$0xff] %v4386_v15  ;;  %v4390_v42 = vmul.f32 %v4366_v1, %v9557_v8  ;;  %v4365_v20 = vadd.f32 1.0, %v7067_v41  ;;  %v9620_v4 = vmul.f32 0.5, %v4515_v51  ;;  %7084 = vtanh.f32 %v9614_v29 }
 0x98a   : > { %v4196_v49 = vpop.f32.mrb[115].mxu0  ;;  %v7069_v55 = vpop.eup %7068  ;;  %4417 = vst [vmem:[%s8003_s21 + $0x2e0] sm:$0xff] %v4393_v23  ;;  %v4388_v26 = vmul.f32 %v4364_v61, %v9563_v50  ;;  %v9625_v57 = vmul.f32 0.5, %v4189_v62  ;;  %v4191_v52 = vadd.f32 %v4190_v21, %v9528_v9  ;;  %v4530_v60 = vadd.f32 %v6252_v19, %v9337_v40 }
 0x98b   : > { %v7071_v54 = vpop.eup %7070  ;;  %4414 = vst [vmem:[%s8003_s21 + $0x220] sm:$0xff] %v4390_v42  ;;  %v4389_v8 = vmul.f32 %v4365_v20, %v9566_v11  ;;  %v4375_v58 = vadd.f32 1.0, %v7069_v55  ;;  %7086 = vtanh.f32 %v9620_v4  ;;  %v6255_v0 = vpop.f32.mrb[118].mxu1  ;;  %v4525_v6 = vadd.f32 %v9337_v40, %v4524_v10 }
 0x98c   : > { %v7073_v2 = vpop.eup %7072  ;;  %4412 = vst [vmem:[%s8003_s21 + $0x210] sm:$0xff] %v4388_v26  ;;  %v4372_v50 = vadd.f32 1.0, %v7071_v54  ;;  %7088 = vtanh.f32 %v9625_v57  ;;  %v9634_v5 = vmul.f32 0.5, %v4191_v52  ;;  %v4534_v25 = vpop.f32.mrb[119].mxu1  ;;  %v9639_v48 = vmul.f32 0.5, %v4530_v60 }
 0x98d   : > { %v4200_v17 = vpop.f32.mrb[116].mxu0  ;;  %v7075_v43 = vpop.eup %7074  ;;  %4413 = vst [vmem:[%s8003_s21 + $0x218] sm:$0xff] %v4389_v8  ;;  %v4399_v11 = vmul.f32 %v4375_v58, %v9573_v3  ;;  %v4367_v34 = vadd.f32 1.0, %v7073_v2  ;;  %v4195_v44 = vadd.f32 %v4194_v27, %v9525_v45  ;;  %v9644_v16 = vmul.f32 0.5, %v4525_v6 }
 0x98e   : > { %v4202_v59 = vpop.f32.mrb[117].mxu0  ;;  %v7077_v63 = vpop.eup %7076  ;;  %v4396_v28 = vmul.f32 %v4372_v50, %v9576_v37  ;;  %v4368_v18 = vadd.f32 1.0, %v7075_v43  ;;  %7090 = vtanh.f32 %v9634_v5  ;;  %v4197_v22 = vadd.f32 %v4196_v49, %v9528_v9 }
 0x98f   : > { %v7079_v30 = vpop.eup %7078  ;;  %4423 = vst [vmem:[%s8003_s21 + $0x460] sm:$0xff] %v4399_v11  ;;  %v4391_v3 = vmul.f32 %v4367_v34, %v9578_v24  ;;  %v4381_v33 = vadd.f32 1.0, %v7077_v63  ;;  %7092 = vtanh.f32 %v9639_v48  ;;  %v9649_v35 = vmul.f32 0.5, %v4195_v44  ;;  %v6258_v21 = vpop.f32.mrb[120].mxu1 }
 0x990   : > { %v7081_v39 = vpop.eup %7080  ;;  %4420 = vst [vmem:[%s8003_s21 + $0x3a0] sm:$0xff] %v4396_v28  ;;  %v4392_v37 = vmul.f32 %v4368_v18, %v9581_v31  ;;  %v4378_v47 = vadd.f32 1.0, %v7079_v30  ;;  %7094 = vtanh.f32 %v9644_v16  ;;  %v4544_v13 = vpop.f32.mrb[121].mxu1  ;;  %v4540_v15 = vadd.f32 %v6255_v0, %v9337_v40 }
 0x991   : > { %4415 = vst [vmem:[%s8003_s21 + $0x2d0] sm:$0xff] %v4391_v3  ;;  %v4405_v24 = vmul.f32 %v4381_v33, %v9588_v32  ;;  %v4370_v53 = vadd.f32 1.0, %v7081_v39  ;;  %7096 = vtanh.f32 %v9649_v35  ;;  %v9661_v31 = vmul.f32 0.5, %v4197_v22 }
 0x992   : > { %4416 = vst [vmem:[%s8003_s21 + $0x2d8] sm:$0xff] %v4392_v37  ;;  %v4402_v1 = vmul.f32 %v4378_v47, %v9592_v7  ;;  %v4535_v51 = vadd.f32 %v9337_v40, %v4534_v25  ;;  %v4201_v19 = vadd.f32 %v4200_v17, %v9525_v45  ;;  %v7083_v41 = vpop.eup %7082  ;;  %v9667_v23 = vmul.f32 0.5, %v4540_v15  ;;  %v4591_v15 = vld [vmem:[#allocation10] sm:$0x7] }
 0x993   : > { %4429 = vst [vmem:[%s8003_s21 + $0x5e0] sm:$0xff] %v4405_v24  ;;  %v4394_v32 = vmul.f32 %v4370_v53, %v9597_v46  ;;  %v4203_v61 = vadd.f32 %v4202_v59, %v9528_v9  ;;  %v4550_v62 = vadd.f32 %v6258_v21, %v9337_v40  ;;  %v7085_v10 = vpop.eup %7084  ;;  %v4371_v7 = vadd.f32 1.0, %v7083_v41 }
 0x994   : > { %4426 = vst [vmem:[%s8003_s21 + $0x520] sm:$0xff] %v4402_v1  ;;  %7098 = vtanh.f32 %v9661_v31  ;;  %v4557_v27 = vmul.f32 0.5, %v4535_v51  ;;  %v9673_v42 = vmul.f32 0.5, %v4201_v19  ;;  %v4570_v20 = vadd.f32 1.0, %v7085_v10 }
 0x995   : > { %v7087_v45 = vpop.eup %7086  ;;  %4418 = vst [vmem:[%s8003_s21 + $0x390] sm:$0xff] %v4394_v32  ;;  %7100 = vtanh.f32 %v9667_v23  ;;  %v4332_v46 = vmul.f32 0.5, %v4203_v61  ;;  %v9677_v49 = vmul.f32 0.5, %v4550_v62  ;;  %v4395_v55 = vmul.f32 %v4371_v7, %v9609_v12 }
 0x996   : > { %v7089_v9 = vpop.eup %7088  ;;  %v4569_v26 = vadd.f32 1.0, %v7087_v45  ;;  %7102 = vtanh.f32 %v4557_v27  ;;  %v4545_v52 = vadd.f32 %v9337_v40, %v4544_v13  ;;  %v4578_v2 = vmul.f32 %v4570_v20, %v9614_v29 }
 0x997   : > { %v4373_v54 = vadd.f32 1.0, %v7089_v9  ;;  %7104 = vtanh.f32 %v9673_v42  ;;  %4419 = vst [vmem:[%s8003_s21 + $0x398] sm:$0xff] %v4395_v55  ;;  %v9725_v1 = vrot.slane %v4591_v15, %v7941_v36  ;;  %v9731_v51 = vrot.slane %v4591_v15, %v7959_v56 }
 0x998   : > { %v7091_v8 = vpop.eup %7090  ;;  %v4577_v58 = vmul.f32 %v4569_v26, %v9620_v4  ;;  %7106 = vtanh.f32 %v4332_v46  ;;  %v4559_v60 = vmul.f32 0.5, %v4545_v52 }
 0x999   : > { %v7093_v0 = vpop.eup %7092  ;;  %v4397_v12 = vmul.f32 %v4373_v54, %v9625_v57  ;;  %v4374_v50 = vadd.f32 1.0, %v7091_v8  ;;  %7108 = vtanh.f32 %v9677_v49 }
 0x99a   : > { %v7095_v40 = vpop.eup %7094  ;;  %v4572_v6 = vadd.f32 1.0, %v7093_v0  ;;  %7110 = vtanh.f32 %v4559_v60  ;;  %5679 = vmatmul.mubr.msk.f32.vlgmr.msra.gmra.mrb[118].mxu0 %vm764_vm6, %v4577_v58  ;;  %6263 = vmatprep.mubr.msk.f32.mxu1 %vm764_vm6, %v4577_v58 }
 0x99b   : > { %v7097_v25 = vpop.eup %7096  ;;  %4421 = vst [vmem:[%s8003_s21 + $0x450] sm:$0xff] %v4397_v12  ;;  %v4398_v4 = vmul.f32 %v4374_v50, %v9634_v5  ;;  %v4571_v17 = vadd.f32 1.0, %v7095_v40  ;;  %6264 = vmatmul.mubr.msk.f32.vlgmr.msra.gmra.mrb[122].mxu1 %vm764_vm6, %v4578_v2  ;;  %4711 = vmatprep.mubr.f32.mxu0 %v7457_v14 }
 0x99c   : > { %v4376_v29 = vadd.f32 1.0, %v7097_v25  ;;  %v4580_v11 = vmul.f32 %v4572_v6, %v9639_v48 }
 0x99d   : > { %4422 = vst [vmem:[%s8003_s21 + $0x458] sm:$0xff] %v4398_v4  ;;  %v4579_v57 = vmul.f32 %v4571_v17, %v9644_v16 }
 0x99e   : > { %v7099_v43 = vpop.eup %7098  ;;  %v4400_v34 = vmul.f32 %v4376_v29, %v9649_v35  ;;  %5680 = vmatmul.mubr.msk.f32.gmra.mrb[120].mxu0 %vm764_vm6, %v4578_v2 }
 0x99f   : > { %v7101_v44 = vpop.eup %7100  ;;  %v4377_v5 = vadd.f32 1.0, %v7099_v43  ;;  %6266 = vmatprep.mubr.msk.f32.mxu1 %vm764_vm6, %v4579_v57  ;;  %4717 = vmatprep.mubr.f32.mxu0 %v7457_v14 }
 0x9a0   : > { %v7103_v59 = vpop.eup %7102  ;;  %4424 = vst [vmem:[%s8003_s21 + $0x510] sm:$0xff] %v4400_v34  ;;  %v4574_v63 = vadd.f32 1.0, %v7101_v44  ;;  %6267 = vmatmul.mubr.msk.f32.gmra.mrb[124].mxu1 %vm764_vm6, %v4580_v11 }
 0x9a1   : > { %v7105_v28 = vpop.eup %7104  ;;  %v4401_v18 = vmul.f32 %v4377_v5, %v9661_v31  ;;  %v4573_v48 = vadd.f32 1.0, %v7103_v59  ;;  %v9728_v31 = vrot.slane %v4591_v15, %v7943_v38 }
 0x9a2   : > { %v7107_v16 = vpop.eup %7106  ;;  %v4379_v30 = vadd.f32 1.0, %v7105_v28  ;;  %5681 = vmatmul.mubr.msk.f32.gmra.mrb[122].mxu0 %vm764_vm6, %v4579_v57  ;;  %v4582_v39 = vmul.f32 %v4574_v63, %v9667_v23 }
 0x9a3   : > { %v7109_v3 = vpop.eup %7108  ;;  %4425 = vst [vmem:[%s8003_s21 + $0x518] sm:$0xff] %v4401_v18  ;;  %v4581_v33 = vmul.f32 %v4573_v48, %v4557_v27  ;;  %v4380_v35 = vadd.f32 1.0, %v7107_v16  ;;  %4723 = vmatprep.mubr.f32.mxu0 %v7457_v14 }
 0x9a4   : > { %v7111_v21 = vpop.eup %7110  ;;  %v4403_v37 = vmul.f32 %v4379_v30, %v9673_v42  ;;  %v4576_v47 = vadd.f32 1.0, %v7109_v3 }
 0x9a5   : > { %v4404_v22 = vmul.f32 %v4380_v35, %v4332_v46  ;;  %v4575_v13 = vadd.f32 1.0, %v7111_v21  ;;  %6269 = vmatprep.mubr.msk.f32.mxu1 %vm764_vm6, %v4581_v33 }
 0x9a6   : > { %4427 = vst [vmem:[%s8003_s21 + $0x5d0] sm:$0xff] %v4403_v37  ;;  %6270 = vmatmul.mubr.msk.f32.gmra.mrb[126].mxu1 %vm764_vm6, %v4582_v39  ;;  %5682 = vmatmul.mubr.msk.f32.gmra.mrb[124].mxu0 %vm764_vm6, %v4580_v11  ;;  %v4584_v53 = vmul.f32 %v4576_v47, %v9677_v49 }
 0x9a7   : > { %4428 = vst [vmem:[%s8003_s21 + $0x5d8] sm:$0xff] %v4404_v22  ;;  %v4583_v24 = vmul.f32 %v4575_v13, %v4559_v60  ;;  %4729 = vmatprep.mubr.f32.mxu0 %v7457_v14 }
 0x9a9   : > { %6272 = vmatprep.mubr.msk.f32.mxu1 %vm764_vm6, %v4583_v24 }
 0x9aa   : > { %6273 = vmatmul.mubr.msk.f32.gmra.mrb[128].mxu1 %vm764_vm6, %v4584_v53  ;;  %5683 = vmatmul.mubr.msk.f32.gmra.mrb[126].mxu0 %vm764_vm6, %v4581_v33 }
 0x9ab   : > { %4735 = vmatprep.mubr.f32.mxu0 %v7457_v14 }
 0x9ae   : > { %5684 = vmatmul.mubr.msk.f32.gmra.mrb[128].mxu0 %vm764_vm6, %v4582_v39 }
 0x9af   : > { %4741 = vmatprep.mubr.f32.mxu0 %v7457_v14 }
 0x9b2   : > { %5685 = vmatmul.mubr.msk.f32.gmra.mrb[130].mxu0 %vm764_vm6, %v4583_v24 }
 0x9b3   : > { %4747 = vmatprep.mubr.f32.mxu0 %v7457_v14 }
 0x9b6   : > { %5686 = vmatmul.mubr.msk.f32.gmra.mrb[132].mxu0 %vm764_vm6, %v4584_v53 }
 0xa6d   : > { %v4707_v19 = vpop.f32.mrb[118].mxu0 }
 0xa6e   : > { %v4708_v41 = vadd.f32 %v4707_v19, %v9725_v1  ;;  %v4709_v32 = vpop.f32.mrb[119].mxu0  ;;  %v6265_v23 = vpop.f32.mrb[122].mxu1 }
 0xa6f   : > { %v4710_v61 = vadd.f32 %v4709_v32, %v9728_v31  ;;  %v4826_v14 = vadd.f32 %v6265_v23, %v9731_v51  ;;  %v4820_v62 = vpop.f32.mrb[123].mxu1 }
 0xa70   : > { %v4859_v10 = vmul.f32 0.5, %v4708_v41  ;;  %v4821_v36 = vadd.f32 %v4820_v62, %v9731_v51 }
 0xa71   : > { %v4860_v7 = vmul.f32 0.5, %v4710_v61  ;;  %v9737_v27 = vmul.f32 0.5, %v4826_v14  ;;  %v4713_v38 = vpop.f32.mrb[120].mxu0 }
 0xa72   : > { %7112 = vtanh.f32 %v4859_v10  ;;  %v9739_v56 = vmul.f32 0.5, %v4821_v36  ;;  %v4714_v42 = vadd.f32 %v4713_v38, %v9725_v1  ;;  %v4715_v45 = vpop.f32.mrb[121].mxu0 }
 0xa73   : > { %7114 = vtanh.f32 %v4860_v7  ;;  %v4716_v20 = vadd.f32 %v4715_v45, %v9728_v31  ;;  %v6268_v46 = vpop.f32.mrb[124].mxu1 }
 0xa74   : > { %7116 = vtanh.f32 %v9737_v27  ;;  %v9744_v49 = vmul.f32 0.5, %v4714_v42  ;;  %v4836_v9 = vadd.f32 %v6268_v46, %v9731_v51  ;;  %v4830_v55 = vpop.f32.mrb[125].mxu1 }
 0xa75   : > { %7118 = vtanh.f32 %v9739_v56  ;;  %v9748_v26 = vmul.f32 0.5, %v4716_v20  ;;  %v4831_v52 = vadd.f32 %v4830_v55, %v9731_v51  ;;  %v4719_v54 = vpop.f32.mrb[122].mxu0 }
 0xa76   : > { %7120 = vtanh.f32 %v9744_v49  ;;  %v9752_v8 = vmul.f32 0.5, %v4836_v9  ;;  %v4720_v58 = vadd.f32 %v4719_v54, %v9725_v1  ;;  %v4721_v60 = vpop.f32.mrb[123].mxu0 }
 0xa77   : > { %7122 = vtanh.f32 %v9748_v26  ;;  %v9756_v0 = vmul.f32 0.5, %v4831_v52  ;;  %v4722_v2 = vadd.f32 %v4721_v60, %v9728_v31 }
 0xa78   : > { %7124 = vtanh.f32 %v9752_v8  ;;  %v9760_v12 = vmul.f32 0.5, %v4720_v58 }
 0xa79   : > { %7126 = vtanh.f32 %v9756_v0  ;;  %v9763_v50 = vmul.f32 0.5, %v4722_v2  ;;  %v6271_v40 = vpop.f32.mrb[126].mxu1  ;;  %v4725_v6 = vpop.f32.mrb[124].mxu0 }
 0xa7a   : > { %7128 = vtanh.f32 %v9760_v12  ;;  %v4846_v25 = vadd.f32 %v6271_v40, %v9731_v51  ;;  %v4840_v4 = vpop.f32.mrb[127].mxu1  ;;  %v4726_v17 = vadd.f32 %v4725_v6, %v9725_v1  ;;  %v4727_v29 = vpop.f32.mrb[125].mxu0 }
 0xa7b   : > { %7130 = vtanh.f32 %v9763_v50  ;;  %v4841_v57 = vadd.f32 %v4840_v4, %v9731_v51  ;;  %v4728_v43 = vadd.f32 %v4727_v29, %v9728_v31 }
 0xa7c   : > { %v7113_v11 = vpop.eup %7112  ;;  %v9771_v34 = vmul.f32 0.5, %v4846_v25  ;;  %v9773_v44 = vmul.f32 0.5, %v4726_v17 }
 0xa7d   : > { %v7115_v5 = vpop.eup %7114  ;;  %v4907_v59 = vadd.f32 1.0, %v7113_v11  ;;  %v9775_v63 = vmul.f32 0.5, %v4841_v57  ;;  %v9777_v28 = vmul.f32 0.5, %v4728_v43  ;;  %v6274_v18 = vpop.f32.mrb[128].mxu1 }
 0xa7e   : > { %v4731_v48 = vpop.f32.mrb[126].mxu0  ;;  %v7117_v16 = vpop.eup %7116  ;;  %v4908_v30 = vadd.f32 1.0, %v7115_v5  ;;  %7132 = vtanh.f32 %v9771_v34  ;;  %v4856_v3 = vadd.f32 %v6274_v18, %v9731_v51 }
 0xa7f   : > { %v4850_v33 = vpop.f32.mrb[129].mxu1  ;;  %v4732_v35 = vadd.f32 %v4731_v48, %v9725_v1  ;;  %v4733_v21 = vpop.f32.mrb[127].mxu0  ;;  %v4931_v37 = vmul.f32 %v4907_v59, %v4859_v10  ;;  %v4912_v47 = vadd.f32 1.0, %v7117_v16  ;;  %7134 = vtanh.f32 %v9775_v63 }
 0xa80   : > { %v7119_v39 = vpop.eup %7118  ;;  %v4851_v22 = vadd.f32 %v4850_v33, %v9731_v51  ;;  %v4932_v24 = vmul.f32 %v4908_v30, %v4860_v7  ;;  %7136 = vtanh.f32 %v9773_v44  ;;  %v9785_v15 = vmul.f32 0.5, %v4856_v3 }
 0xa81   : > { %v7121_v13 = vpop.eup %7120  ;;  %v4909_v53 = vadd.f32 1.0, %v7119_v39  ;;  %4955 = vst [vmem:[%s8003_s21 + $0xa8] sm:$0xff] %v4931_v37  ;;  %v4936_v41 = vmul.f32 %v4912_v47, %v9737_v27  ;;  %7138 = vtanh.f32 %v9777_v28  ;;  %v4737_v61 = vpop.f32.mrb[128].mxu0  ;;  %v9795_v10 = vmul.f32 0.5, %v4732_v35 }
 0xa82   : > { %v7123_v19 = vpop.eup %7122  ;;  %v4910_v32 = vadd.f32 1.0, %v7121_v13  ;;  %v9790_v23 = vmul.f32 0.5, %v4851_v22  ;;  %4956 = vst [vmem:[%s8003_s21 + $0xb0] sm:$0xff] %v4932_v24  ;;  %7140 = vtanh.f32 %v9785_v15  ;;  %v4739_v36 = vpop.f32.mrb[129].mxu0  ;;  %v4734_v42 = vadd.f32 %v4733_v21, %v9728_v31 }
 0xa83   : > { %v7125_v51 = vpop.eup %7124  ;;  %v4933_v14 = vmul.f32 %v4909_v53, %v9739_v56  ;;  %v4911_v62 = vadd.f32 1.0, %v7123_v19  ;;  %4960 = vst [vmem:[%s8003_s21 + $0x178] sm:$0xff] %v4936_v41  ;;  %v4738_v46 = vadd.f32 %v4737_v61, %v9725_v1  ;;  %v4740_v54 = vadd.f32 %v4739_v36, %v9728_v31 }
 0xa84   : > { %v7127_v7 = vpop.eup %7126  ;;  %v4934_v27 = vmul.f32 %v4910_v32, %v9744_v49  ;;  %v4918_v38 = vadd.f32 1.0, %v7125_v51  ;;  %7142 = vtanh.f32 %v9790_v23  ;;  %v9807_v52 = vmul.f32 0.5, %v4734_v42 }
 0xa85   : > { %v7129_v45 = vpop.eup %7128  ;;  %4957 = vst [vmem:[%s8003_s21 + $0xb8] sm:$0xff] %v4933_v14  ;;  %v4935_v56 = vmul.f32 %v4911_v62, %v9748_v26  ;;  %v4915_v20 = vadd.f32 1.0, %v7127_v7  ;;  %7144 = vtanh.f32 %v9795_v10  ;;  %v4743_v58 = vpop.f32.mrb[130].mxu0  ;;  %v9812_v2 = vmul.f32 0.5, %v4738_v46 }
 0xa86   : > { %v7131_v9 = vpop.eup %7130  ;;  %4958 = vst [vmem:[%s8003_s21 + $0x168] sm:$0xff] %v4934_v27  ;;  %v4942_v49 = vmul.f32 %v4918_v38, %v9752_v8  ;;  %v4913_v55 = vadd.f32 1.0, %v7129_v45  ;;  %v4744_v40 = vadd.f32 %v4743_v58, %v9725_v1  ;;  %v4745_v6 = vpop.f32.mrb[131].mxu0  ;;  %7146 = vtanh.f32 %v9807_v52 }
 0xa87   : > { %4959 = vst [vmem:[%s8003_s21 + $0x170] sm:$0xff] %v4935_v56  ;;  %v4939_v26 = vmul.f32 %v4915_v20, %v9756_v0  ;;  %v4914_v60 = vadd.f32 1.0, %v7131_v9  ;;  %v4875_v25 = vmul.f32 0.5, %v4740_v54  ;;  %v4746_v4 = vadd.f32 %v4745_v6, %v9728_v31 }
 0xa88   : > { %4966 = vst [vmem:[%s8003_s21 + $0x2f8] sm:$0xff] %v4942_v49  ;;  %v4937_v8 = vmul.f32 %v4913_v55, %v9760_v12  ;;  %v7133_v17 = vpop.eup %7132  ;;  %7148 = vtanh.f32 %v9812_v2  ;;  %v4877_v29 = vmul.f32 0.5, %v4744_v40 }
 0xa89   : > { %4963 = vst [vmem:[%s8003_s21 + $0x238] sm:$0xff] %v4939_v26  ;;  %v4938_v0 = vmul.f32 %v4914_v60, %v9763_v50  ;;  %v7135_v57 = vpop.eup %7134  ;;  %v4924_v43 = vadd.f32 1.0, %v7133_v17  ;;  %7150 = vtanh.f32 %v4875_v25  ;;  %v4878_v11 = vmul.f32 0.5, %v4746_v4  ;;  %v4749_v5 = vpop.f32.mrb[132].mxu0 }
 0xa8a   : > { %4961 = vst [vmem:[%s8003_s21 + $0x228] sm:$0xff] %v4937_v8  ;;  %v7137_v12 = vpop.eup %7136  ;;  %v4921_v59 = vadd.f32 1.0, %v7135_v57  ;;  %7152 = vtanh.f32 %v4877_v29  ;;  %v4750_v18 = vadd.f32 %v4749_v5, %v9725_v1  ;;  %v4751_v48 = vpop.f32.mrb[133].mxu0 }
 0xa8b   : > { %4962 = vst [vmem:[%s8003_s21 + $0x230] sm:$0xff] %v4938_v0  ;;  %v7139_v16 = vpop.eup %7138  ;;  %v4948_v50 = vmul.f32 %v4924_v43, %v9771_v34  ;;  %v4916_v30 = vadd.f32 1.0, %v7137_v12  ;;  %7154 = vtanh.f32 %v4878_v11  ;;  %v4752_v3 = vadd.f32 %v4751_v48, %v9728_v31 }
 0xa8c   : > { %v7141_v33 = vpop.eup %7140  ;;  %v4945_v35 = vmul.f32 %v4921_v59, %v9775_v63  ;;  %v4917_v21 = vadd.f32 1.0, %v7139_v16  ;;  %v4880_v39 = vmul.f32 0.5, %v4750_v18 }
 0xa8d   : > { %4972 = vst [vmem:[%s8003_s21 + $0x478] sm:$0xff] %v4948_v50  ;;  %v4940_v1 = vmul.f32 %v4916_v30, %v9773_v44  ;;  %v4930_v47 = vadd.f32 1.0, %v7141_v33  ;;  %v4881_v22 = vmul.f32 0.5, %v4752_v3 }
 0xa8e   : > { %v7143_v37 = vpop.eup %7142  ;;  %4969 = vst [vmem:[%s8003_s21 + $0x3b8] sm:$0xff] %v4945_v35  ;;  %v4941_v13 = vmul.f32 %v4917_v21, %v9777_v28  ;;  %7156 = vtanh.f32 %v4880_v39 }
 0xa8f   : > { %v7145_v34 = vpop.eup %7144  ;;  %v4927_v31 = vadd.f32 1.0, %v7143_v37  ;;  %4964 = vst [vmem:[%s8003_s21 + $0x2e8] sm:$0xff] %v4940_v1  ;;  %v4954_v63 = vmul.f32 %v4930_v47, %v9785_v15  ;;  %7158 = vtanh.f32 %v4881_v22 }
 0xa90   : > { %v4919_v24 = vadd.f32 1.0, %v7145_v34  ;;  %4965 = vst [vmem:[%s8003_s21 + $0x2f0] sm:$0xff] %v4941_v13  ;;  %v7147_v44 = vpop.eup %7146 }
 0xa91   : > { %v4951_v53 = vmul.f32 %v4927_v31, %v9790_v23  ;;  %4978 = vst [vmem:[%s8003_s21 + $0x5f8] sm:$0xff] %v4954_v63  ;;  %v4920_v28 = vadd.f32 1.0, %v7147_v44 }
 0xa92   : > { %v4943_v19 = vmul.f32 %v4919_v24, %v9795_v10  ;;  %v7149_v41 = vpop.eup %7148 }
 0xa93   : > { %4975 = vst [vmem:[%s8003_s21 + $0x538] sm:$0xff] %v4951_v53  ;;  %v7151_v32 = vpop.eup %7150  ;;  %v4922_v61 = vadd.f32 1.0, %v7149_v41  ;;  %v4944_v51 = vmul.f32 %v4920_v28, %v9807_v52 }
 0xa94   : > { %4967 = vst [vmem:[%s8003_s21 + $0x3a8] sm:$0xff] %v4943_v19  ;;  %v7153_v15 = vpop.eup %7152  ;;  %v4923_v14 = vadd.f32 1.0, %v7151_v32 }
 0xa95   : > { %v7155_v23 = vpop.eup %7154  ;;  %v4946_v62 = vmul.f32 %v4922_v61, %v9812_v2  ;;  %v4925_v36 = vadd.f32 1.0, %v7153_v15  ;;  %4968 = vst [vmem:[%s8003_s21 + $0x3b0] sm:$0xff] %v4944_v51 }
 0xa96   : > { %v4947_v10 = vmul.f32 %v4923_v14, %v4875_v25  ;;  %v4926_v7 = vadd.f32 1.0, %v7155_v23 }
 0xa97   : > { %4970 = vst [vmem:[%s8003_s21 + $0x468] sm:$0xff] %v4946_v62  ;;  %v4949_v27 = vmul.f32 %v4925_v36, %v4877_v29 }
 0xa98   : > { %v7157_v38 = vpop.eup %7156  ;;  %4971 = vst [vmem:[%s8003_s21 + $0x470] sm:$0xff] %v4947_v10  ;;  %v4950_v42 = vmul.f32 %v4926_v7, %v4878_v11  ;;  %4985 = sbr.rel (!%p10194_p10) target bundleno = 2811 (0xafb), region = 76 }
 0xa99   : > { %v7159_v45 = vpop.eup %7158  ;;  %4973 = vst [vmem:[%s8003_s21 + $0x528] sm:$0xff] %v4949_v27  ;;  %v4928_v56 = vadd.f32 1.0, %v7157_v38 }
 0xa9a   : > { %4974 = vst [vmem:[%s8003_s21 + $0x530] sm:$0xff] %v4950_v42  ;;  %v4929_v20 = vadd.f32 1.0, %v7159_v45 }
 0xa9b   : > { %v4952_v46 = vmul.f32 %v4928_v56, %v4880_v39 }
 0xa9c   : > { %v4953_v9 = vmul.f32 %v4929_v20, %v4881_v22 }
 0xa9d   : > { %4976 = vst [vmem:[%s8003_s21 + $0x5e8] sm:$0xff] %v4952_v46 }
 0xa9e   : > { %4977 = vst [vmem:[%s8003_s21 + $0x5f0] sm:$0xff] %v4953_v9 }
 0xa9f   : > { %s10213_s13 = smov (!%p4988_p4, %s4987_s13), 8 }
 0xaa0   : > { %s5698_s18 = smul.u32 3072, %s10213_s13 }
 0xaa2   : > { %p5702_p1 = scmp.eq.s32.totalorder %s5698_s18, 0 }
 0xaa3   : > { %7160 = sdivrem.u32 (!%p5702_p1), %s10213_s13, 3 }
 0xaa4   : > { %4998 = sbr.rel (%p5702_p1) target bundleno = 2811 (0xafb), region = 80 }
 0xaac   : > { %s9862_s12 = spop.drf %7160 }
 0xaad   : > { %p5703_p11 = scmp.le.s32.totalorder %s9862_s12, 0 }
 0xaae   : > { %s10196_s28 = smov (!%p5703_p11), %s9856_s20  ;;  %s10197_s27 = smov (!%p5703_p11), %s8003_s21 }
 0xaaf   : > { %5291 = sbr.rel (%p5703_p11) target bundleno = 2779 (0xadb), region = 141  ;;  %s9871_s15 = smov (!%p5703_p11), 0  }
 0xab0   : > { %s9873_s8 = smov (!%p5703_p11), 0  }
 0xab6 LB: >> { %v5012_v49 = vld [vmem:[%s7418_s27] sm:$0xff]  ;;  %s5156_s29 = sadd.s32 1, %s7422_s15  ;;  %v5018_v54 = vld [vmem:[%s7418_s27 + $0x8] sm:$0xff]  ;;  %v5024_v60 = vld [vmem:[%s7418_s27 + $0x10] sm:$0xff]  ;;  %s5006_s8 = sadd.s32 1, %s7426_s8   ;;  %s7426_s8 = sphi %s9873_s8, %s5006_s8   ;;  %s7422_s15 = sphi %s9871_s15, %s10200_s15   ;;  %s7418_s27 = sphi %s10197_s27, %s10199_s27   ;;  %s7414_s28 = sphi %s10196_s28, %s10198_s28  }
 0xab7   : >> { %v5014_v55 = vld [vmem:[%s7418_s27 + $0xc0] sm:$0xff]  ;;  %5013 = vst [vmem:[%s7414_s28] sm:$0xff] %v5012_v49  ;;  %v5020_v58 = vld [vmem:[%s7418_s27 + $0xc8] sm:$0xff]  ;;  %p5157_p3 = scmp.ge.s32.totalorder %s5156_s29, %s9862_s12  ;;  %5019 = vst [vmem:[%s7414_s28 + $0x8] sm:$0xff] %v5018_v54  ;;  %p5005_p7 = scmp.ge.s32.totalorder %s5006_s8, %s9862_s12 }
 0xab8   : >> { %v5016_v52 = vld [vmem:[%s7418_s27 + $0x180] sm:$0xff]  ;;  %5015 = vst [vmem:[%s7414_s28 + $0xc0] sm:$0xff] %v5014_v55  ;;  %v5022_v26 = vld [vmem:[%s7418_s27 + $0x188] sm:$0xff]  ;;  %5021 = vst [vmem:[%s7414_s28 + $0xc8] sm:$0xff] %v5020_v58 }
 0xab9   : >> { %5017 = vst [vmem:[%s7414_s28 + $0x180] sm:$0xff] %v5016_v52  ;;  %5023 = vst [vmem:[%s7414_s28 + $0x188] sm:$0xff] %v5022_v26  ;;  %v5026_v2 = vld [vmem:[%s7418_s27 + $0xd0] sm:$0xff]  ;;  %v5030_v6 = vld [vmem:[%s7418_s27 + $0x18] sm:$0xff]  ;;  %s10215_s29 = smov (%p5157_p3, %s5156_s29), 0 }
 0xaba   : >> { %v5028_v40 = vld [vmem:[%s7418_s27 + $0x190] sm:$0xff]  ;;  %5025 = vst [vmem:[%s7414_s28 + $0x10] sm:$0xff] %v5024_v60  ;;  %5027 = vst [vmem:[%s7414_s28 + $0xd0] sm:$0xff] %v5026_v2  ;;  %v5032_v8 = vld [vmem:[%s7418_s27 + $0xd8] sm:$0xff]  ;;  %s5159_s7 = smul.u32 576, %s10215_s29  ;;  %s10200_s15 = smov %s10215_s29 }
 0xabb   : >> { %5029 = vst [vmem:[%s7414_s28 + $0x190] sm:$0xff] %v5028_v40  ;;  %v5034_v25 = vld [vmem:[%s7418_s27 + $0x198] sm:$0xff]  ;;  %5031 = vst [vmem:[%s7414_s28 + $0x18] sm:$0xff] %v5030_v6  ;;  %v5036_v4 = vld [vmem:[%s7418_s27 + $0x20] sm:$0xff] }
 0xabc   : >> { %5033 = vst [vmem:[%s7414_s28 + $0xd8] sm:$0xff] %v5032_v8  ;;  %5035 = vst [vmem:[%s7414_s28 + $0x198] sm:$0xff] %v5034_v25  ;;  %v5038_v17 = vld [vmem:[%s7418_s27 + $0xe0] sm:$0xff]  ;;  %v5042_v29 = vld [vmem:[%s7418_s27 + $0x28] sm:$0xff]  ;;  %s9935_s22 = scalar_lea.vmem %s8003_s21, %s5159_s7 [#allocation12]   ;;  %s9938_s16 = scalar_lea.vmem %s9856_s20, %s5159_s7  }
 0xabd   : >> { %v5040_v0 = vld [vmem:[%s7418_s27 + $0x1a0] sm:$0xff]  ;;  %5037 = vst [vmem:[%s7414_s28 + $0x20] sm:$0xff] %v5036_v4  ;;  %5039 = vst [vmem:[%s7414_s28 + $0xe0] sm:$0xff] %v5038_v17  ;;  %v5044_v57 = vld [vmem:[%s7418_s27 + $0xe8] sm:$0xff] }
 0xabe   : >> { %5041 = vst [vmem:[%s7414_s28 + $0x1a0] sm:$0xff] %v5040_v0  ;;  %v5046_v43 = vld [vmem:[%s7418_s27 + $0x1a8] sm:$0xff]  ;;  %5043 = vst [vmem:[%s7414_s28 + $0x28] sm:$0xff] %v5042_v29  ;;  %v5048_v11 = vld [vmem:[%s7418_s27 + $0x30] sm:$0xff] }
 0xabf   : >> { %5045 = vst [vmem:[%s7414_s28 + $0xe8] sm:$0xff] %v5044_v57  ;;  %5047 = vst [vmem:[%s7414_s28 + $0x1a8] sm:$0xff] %v5046_v43  ;;  %v5050_v5 = vld [vmem:[%s7418_s27 + $0xf0] sm:$0xff]  ;;  %v5054_v59 = vld [vmem:[%s7418_s27 + $0x38] sm:$0xff] }
 0xac0   : >> { %v5052_v12 = vld [vmem:[%s7418_s27 + $0x1b0] sm:$0xff]  ;;  %5049 = vst [vmem:[%s7414_s28 + $0x30] sm:$0xff] %v5048_v11  ;;  %5051 = vst [vmem:[%s7414_s28 + $0xf0] sm:$0xff] %v5050_v5  ;;  %v5056_v18 = vld [vmem:[%s7418_s27 + $0xf8] sm:$0xff] }
 0xac1   : >> { %5053 = vst [vmem:[%s7414_s28 + $0x1b0] sm:$0xff] %v5052_v12  ;;  %v5058_v48 = vld [vmem:[%s7418_s27 + $0x1b8] sm:$0xff]  ;;  %5055 = vst [vmem:[%s7414_s28 + $0x38] sm:$0xff] %v5054_v59  ;;  %v5060_v16 = vld [vmem:[%s7418_s27 + $0x40] sm:$0xff] }
 0xac2   : >> { %5057 = vst [vmem:[%s7414_s28 + $0xf8] sm:$0xff] %v5056_v18  ;;  %5059 = vst [vmem:[%s7414_s28 + $0x1b8] sm:$0xff] %v5058_v48  ;;  %v5062_v50 = vld [vmem:[%s7418_s27 + $0x100] sm:$0xff]  ;;  %v5066_v3 = vld [vmem:[%s7418_s27 + $0x48] sm:$0xff] }
 0xac3   : >> { %v5064_v30 = vld [vmem:[%s7418_s27 + $0x1c0] sm:$0xff]  ;;  %5061 = vst [vmem:[%s7414_s28 + $0x40] sm:$0xff] %v5060_v16  ;;  %5063 = vst [vmem:[%s7414_s28 + $0x100] sm:$0xff] %v5062_v50  ;;  %v5068_v33 = vld [vmem:[%s7418_s27 + $0x108] sm:$0xff] }
 0xac4   : >> { %5065 = vst [vmem:[%s7414_s28 + $0x1c0] sm:$0xff] %v5064_v30  ;;  %v5070_v35 = vld [vmem:[%s7418_s27 + $0x1c8] sm:$0xff]  ;;  %5067 = vst [vmem:[%s7414_s28 + $0x48] sm:$0xff] %v5066_v3  ;;  %v5072_v21 = vld [vmem:[%s7418_s27 + $0x50] sm:$0xff] }
 0xac5   : >> { %5069 = vst [vmem:[%s7414_s28 + $0x108] sm:$0xff] %v5068_v33  ;;  %5071 = vst [vmem:[%s7414_s28 + $0x1c8] sm:$0xff] %v5070_v35  ;;  %v5074_v39 = vld [vmem:[%s7418_s27 + $0x110] sm:$0xff]  ;;  %v5078_v1 = vld [vmem:[%s7418_s27 + $0x58] sm:$0xff] }
 0xac6   : >> { %v5076_v37 = vld [vmem:[%s7418_s27 + $0x1d0] sm:$0xff]  ;;  %5073 = vst [vmem:[%s7414_s28 + $0x50] sm:$0xff] %v5072_v21  ;;  %5075 = vst [vmem:[%s7414_s28 + $0x110] sm:$0xff] %v5074_v39  ;;  %v5080_v47 = vld [vmem:[%s7418_s27 + $0x118] sm:$0xff] }
 0xac7   : >> { %5077 = vst [vmem:[%s7414_s28 + $0x1d0] sm:$0xff] %v5076_v37  ;;  %v5082_v22 = vld [vmem:[%s7418_s27 + $0x1d8] sm:$0xff]  ;;  %5079 = vst [vmem:[%s7414_s28 + $0x58] sm:$0xff] %v5078_v1  ;;  %v5084_v34 = vld [vmem:[%s7418_s27 + $0x60] sm:$0xff] }
 0xac8   : >> { %5081 = vst [vmem:[%s7414_s28 + $0x118] sm:$0xff] %v5080_v47  ;;  %5083 = vst [vmem:[%s7414_s28 + $0x1d8] sm:$0xff] %v5082_v22  ;;  %v5086_v13 = vld [vmem:[%s7418_s27 + $0x120] sm:$0xff]  ;;  %v5090_v63 = vld [vmem:[%s7418_s27 + $0x68] sm:$0xff] }
 0xac9   : >> { %v5088_v31 = vld [vmem:[%s7418_s27 + $0x1e0] sm:$0xff]  ;;  %5085 = vst [vmem:[%s7414_s28 + $0x60] sm:$0xff] %v5084_v34  ;;  %5087 = vst [vmem:[%s7414_s28 + $0x120] sm:$0xff] %v5086_v13  ;;  %v5092_v24 = vld [vmem:[%s7418_s27 + $0x128] sm:$0xff] }
 0xaca   : >> { %5089 = vst [vmem:[%s7414_s28 + $0x1e0] sm:$0xff] %v5088_v31  ;;  %v5094_v53 = vld [vmem:[%s7418_s27 + $0x1e8] sm:$0xff]  ;;  %5091 = vst [vmem:[%s7414_s28 + $0x68] sm:$0xff] %v5090_v63  ;;  %v5096_v44 = vld [vmem:[%s7418_s27 + $0x70] sm:$0xff] }
 0xacb   : >> { %5093 = vst [vmem:[%s7414_s28 + $0x128] sm:$0xff] %v5092_v24  ;;  %5095 = vst [vmem:[%s7414_s28 + $0x1e8] sm:$0xff] %v5094_v53  ;;  %v5098_v19 = vld [vmem:[%s7418_s27 + $0x130] sm:$0xff]  ;;  %v5102_v28 = vld [vmem:[%s7418_s27 + $0x78] sm:$0xff] }
 0xacc   : >> { %v5100_v41 = vld [vmem:[%s7418_s27 + $0x1f0] sm:$0xff]  ;;  %5097 = vst [vmem:[%s7414_s28 + $0x70] sm:$0xff] %v5096_v44  ;;  %5099 = vst [vmem:[%s7414_s28 + $0x130] sm:$0xff] %v5098_v19  ;;  %v5104_v32 = vld [vmem:[%s7418_s27 + $0x138] sm:$0xff] }
 0xacd   : >> { %5101 = vst [vmem:[%s7414_s28 + $0x1f0] sm:$0xff] %v5100_v41  ;;  %v5106_v61 = vld [vmem:[%s7418_s27 + $0x1f8] sm:$0xff]  ;;  %5103 = vst [vmem:[%s7414_s28 + $0x78] sm:$0xff] %v5102_v28  ;;  %v5108_v15 = vld [vmem:[%s7418_s27 + $0x80] sm:$0xff] }
 0xace   : >> { %5105 = vst [vmem:[%s7414_s28 + $0x138] sm:$0xff] %v5104_v32  ;;  %5107 = vst [vmem:[%s7414_s28 + $0x1f8] sm:$0xff] %v5106_v61  ;;  %v5110_v51 = vld [vmem:[%s7418_s27 + $0x140] sm:$0xff]  ;;  %v5114_v23 = vld [vmem:[%s7418_s27 + $0x88] sm:$0xff] }
 0xacf   : >> { %v5112_v14 = vld [vmem:[%s7418_s27 + $0x200] sm:$0xff]  ;;  %5109 = vst [vmem:[%s7414_s28 + $0x80] sm:$0xff] %v5108_v15  ;;  %5111 = vst [vmem:[%s7414_s28 + $0x140] sm:$0xff] %v5110_v51  ;;  %v5116_v62 = vld [vmem:[%s7418_s27 + $0x148] sm:$0xff] }
 0xad0   : >> { %5113 = vst [vmem:[%s7414_s28 + $0x200] sm:$0xff] %v5112_v14  ;;  %v5118_v36 = vld [vmem:[%s7418_s27 + $0x208] sm:$0xff]  ;;  %5115 = vst [vmem:[%s7414_s28 + $0x88] sm:$0xff] %v5114_v23  ;;  %v5120_v10 = vld [vmem:[%s7418_s27 + $0x90] sm:$0xff] }
 0xad1   : >> { %5117 = vst [vmem:[%s7414_s28 + $0x148] sm:$0xff] %v5116_v62  ;;  %5119 = vst [vmem:[%s7414_s28 + $0x208] sm:$0xff] %v5118_v36  ;;  %v5122_v7 = vld [vmem:[%s7418_s27 + $0x150] sm:$0xff]  ;;  %v5126_v38 = vld [vmem:[%s7418_s27 + $0x98] sm:$0xff] }
 0xad2   : >> { %v5124_v27 = vld [vmem:[%s7418_s27 + $0x210] sm:$0xff]  ;;  %5121 = vst [vmem:[%s7414_s28 + $0x90] sm:$0xff] %v5120_v10  ;;  %5123 = vst [vmem:[%s7414_s28 + $0x150] sm:$0xff] %v5122_v7  ;;  %v5128_v42 = vld [vmem:[%s7418_s27 + $0x158] sm:$0xff] }
 0xad3   : >> { %5125 = vst [vmem:[%s7414_s28 + $0x210] sm:$0xff] %v5124_v27  ;;  %v5130_v45 = vld [vmem:[%s7418_s27 + $0x218] sm:$0xff]  ;;  %5127 = vst [vmem:[%s7414_s28 + $0x98] sm:$0xff] %v5126_v38  ;;  %v5132_v56 = vld [vmem:[%s7418_s27 + $0xa0] sm:$0xff] }
 0xad4   : >> { %5129 = vst [vmem:[%s7414_s28 + $0x158] sm:$0xff] %v5128_v42  ;;  %5131 = vst [vmem:[%s7414_s28 + $0x218] sm:$0xff] %v5130_v45  ;;  %v5134_v20 = vld [vmem:[%s7418_s27 + $0x160] sm:$0xff]  ;;  %v5138_v9 = vld [vmem:[%s7418_s27 + $0xa8] sm:$0xff]  ;;  %5008 = sbr.rel (!%p5005_p7) target bundleno = 2742 (0xab6), region = 147 }
 0xad5   : >> { %v5136_v46 = vld [vmem:[%s7418_s27 + $0x220] sm:$0xff]  ;;  %5133 = vst [vmem:[%s7414_s28 + $0xa0] sm:$0xff] %v5132_v56  ;;  %5135 = vst [vmem:[%s7414_s28 + $0x160] sm:$0xff] %v5134_v20  ;;  %v5140_v49 = vld [vmem:[%s7418_s27 + $0x168] sm:$0xff] }
 0xad6   : >> { %5137 = vst [vmem:[%s7414_s28 + $0x220] sm:$0xff] %v5136_v46  ;;  %v5142_v55 = vld [vmem:[%s7418_s27 + $0x228] sm:$0xff]  ;;  %5139 = vst [vmem:[%s7414_s28 + $0xa8] sm:$0xff] %v5138_v9  ;;  %v5144_v52 = vld [vmem:[%s7418_s27 + $0xb0] sm:$0xff] }
 0xad7   : >> { %5141 = vst [vmem:[%s7414_s28 + $0x168] sm:$0xff] %v5140_v49  ;;  %5143 = vst [vmem:[%s7414_s28 + $0x228] sm:$0xff] %v5142_v55  ;;  %v5146_v54 = vld [vmem:[%s7418_s27 + $0x170] sm:$0xff]  ;;  %v5150_v26 = vld [vmem:[%s7418_s27 + $0xb8] sm:$0xff] }
 0xad8   : >> { %v5148_v58 = vld [vmem:[%s7418_s27 + $0x230] sm:$0xff]  ;;  %5145 = vst [vmem:[%s7414_s28 + $0xb0] sm:$0xff] %v5144_v52  ;;  %5147 = vst [vmem:[%s7414_s28 + $0x170] sm:$0xff] %v5146_v54  ;;  %v5152_v60 = vld [vmem:[%s7418_s27 + $0x178] sm:$0xff] }
 0xad9   : >> { %5149 = vst [vmem:[%s7414_s28 + $0x230] sm:$0xff] %v5148_v58  ;;  %v5154_v2 = vld [vmem:[%s7418_s27 + $0x238] sm:$0xff]  ;;  %5151 = vst [vmem:[%s7414_s28 + $0xb8] sm:$0xff] %v5150_v26  ;;  %s10199_s27 = smov %s9935_s22 }
 0xada   : >> { %5153 = vst [vmem:[%s7414_s28 + $0x178] sm:$0xff] %v5152_v60  ;;  %5155 = vst [vmem:[%s7414_s28 + $0x238] sm:$0xff] %v5154_v2  ;;  %s10198_s28 = smov %s9938_s16 }
 0xadb PF: > { %7162 = sdivrem.u32 %s10213_s13, 3 }
 0xadc   : > { %s5704_s30 = smul.u32 576, %s9862_s12 }
 0xade   : > { %s10055_s10 = scalar_lea.vmem %s8003_s21, %s5704_s30 [#allocation12]   ;;  %s10058_s14 = scalar_lea.vmem %s9856_s20, %s5704_s30  }
 0xae4   : > { %s10060_s9 = spop.drf %7162 }
 0xae5   : > { %p5706_p6 = scmp.le.s32.totalorder %s10060_s9, 0 }
 0xae6   : > { %s10201_s19 = smov (!%p5706_p6), %s10058_s14  ;;  %s10202_s11 = smov (!%p5706_p6), %s10055_s10 }
 0xae7   : > { %5305 = sbr.rel (%p5706_p6) target bundleno = 2811 (0xafb), region = 152  ;;  %s10069_s23 = smov (!%p5706_p6), 0  }
 0xae8   : > { %s10071_s24 = smov (!%p5706_p6), 0  }
 0xaee LB: >> { %v5179_v40 = vld [vmem:[%s7434_s11] sm:$0xff]  ;;  %v5181_v6 = vld [vmem:[%s7434_s11 + $0x8] sm:$0xff]  ;;  %v5183_v8 = vld [vmem:[%s7434_s11 + $0x10] sm:$0xff]  ;;  %s5227_s21 = sadd.s32 1, %s7438_s23  ;;  %s5173_s24 = sadd.s32 1, %s7442_s24   ;;  %s7442_s24 = sphi %s10071_s24, %s5173_s24   ;;  %s7438_s23 = sphi %s10069_s23, %s10204_s23   ;;  %s7434_s11 = sphi %s10202_s11, %s5232_s11   ;;  %s7430_s19 = sphi %s10201_s19, %s10203_s19  }
 0xaef   : >> { %5180 = vst [vmem:[%s7430_s19] sm:$0xff] %v5179_v40  ;;  %5182 = vst [vmem:[%s7430_s19 + $0x8] sm:$0xff] %v5181_v6  ;;  %v5185_v25 = vld [vmem:[%s7434_s11 + $0x18] sm:$0xff]  ;;  %v5187_v4 = vld [vmem:[%s7434_s11 + $0x20] sm:$0xff]  ;;  %p5228_p9 = scmp.ge.s32.totalorder %s5227_s21, %s10060_s9  ;;  %p5172_p13 = scmp.ge.s32.totalorder %s5173_s24, %s10060_s9 }
 0xaf0   : >> { %5184 = vst [vmem:[%s7430_s19 + $0x10] sm:$0xff] %v5183_v8  ;;  %v5189_v17 = vld [vmem:[%s7434_s11 + $0x28] sm:$0xff]  ;;  %5186 = vst [vmem:[%s7430_s19 + $0x18] sm:$0xff] %v5185_v25  ;;  %v5191_v0 = vld [vmem:[%s7434_s11 + $0x30] sm:$0xff] }
 0xaf1   : >> { %5188 = vst [vmem:[%s7430_s19 + $0x20] sm:$0xff] %v5187_v4  ;;  %5190 = vst [vmem:[%s7430_s19 + $0x28] sm:$0xff] %v5189_v17  ;;  %v5193_v29 = vld [vmem:[%s7434_s11 + $0x38] sm:$0xff]  ;;  %v5195_v57 = vld [vmem:[%s7434_s11 + $0x40] sm:$0xff]  ;;  %s10217_s21 = smov (%p5228_p9, %s5227_s21), 0 }
 0xaf2   : >> { %5192 = vst [vmem:[%s7430_s19 + $0x30] sm:$0xff] %v5191_v0  ;;  %5194 = vst [vmem:[%s7430_s19 + $0x38] sm:$0xff] %v5193_v29  ;;  %v5197_v43 = vld [vmem:[%s7434_s11 + $0x48] sm:$0xff]  ;;  %v5199_v11 = vld [vmem:[%s7434_s11 + $0x50] sm:$0xff]  ;;  %s5230_s13 = smul.u32 192, %s10217_s21  ;;  %s10204_s23 = smov %s10217_s21 }
 0xaf3   : >> { %5196 = vst [vmem:[%s7430_s19 + $0x40] sm:$0xff] %v5195_v57  ;;  %v5201_v5 = vld [vmem:[%s7434_s11 + $0x58] sm:$0xff]  ;;  %5198 = vst [vmem:[%s7430_s19 + $0x48] sm:$0xff] %v5197_v43  ;;  %v5203_v12 = vld [vmem:[%s7434_s11 + $0x60] sm:$0xff] }
 0xaf4   : >> { %5200 = vst [vmem:[%s7430_s19 + $0x50] sm:$0xff] %v5199_v11  ;;  %5202 = vst [vmem:[%s7430_s19 + $0x58] sm:$0xff] %v5201_v5  ;;  %v5205_v59 = vld [vmem:[%s7434_s11 + $0x68] sm:$0xff]  ;;  %v5207_v18 = vld [vmem:[%s7434_s11 + $0x70] sm:$0xff]  ;;  %s5233_s17 = scalar_lea.vmem %s10058_s14, %s5230_s13   ;;  %5175 = sbr.rel (!%p5172_p13) target bundleno = 2798 (0xaee), region = 158 }
 0xaf5   : >> { %5204 = vst [vmem:[%s7430_s19 + $0x60] sm:$0xff] %v5203_v12  ;;  %5206 = vst [vmem:[%s7430_s19 + $0x68] sm:$0xff] %v5205_v59  ;;  %v5209_v48 = vld [vmem:[%s7434_s11 + $0x78] sm:$0xff]  ;;  %v5211_v16 = vld [vmem:[%s7434_s11 + $0x80] sm:$0xff] }
 0xaf6   : >> { %5208 = vst [vmem:[%s7430_s19 + $0x70] sm:$0xff] %v5207_v18  ;;  %v5213_v50 = vld [vmem:[%s7434_s11 + $0x88] sm:$0xff]  ;;  %5210 = vst [vmem:[%s7430_s19 + $0x78] sm:$0xff] %v5209_v48  ;;  %v5215_v30 = vld [vmem:[%s7434_s11 + $0x90] sm:$0xff] }
 0xaf7   : >> { %5212 = vst [vmem:[%s7430_s19 + $0x80] sm:$0xff] %v5211_v16  ;;  %5214 = vst [vmem:[%s7430_s19 + $0x88] sm:$0xff] %v5213_v50  ;;  %v5217_v3 = vld [vmem:[%s7434_s11 + $0x98] sm:$0xff]  ;;  %v5219_v33 = vld [vmem:[%s7434_s11 + $0xa0] sm:$0xff] }
 0xaf8   : >> { %5216 = vst [vmem:[%s7430_s19 + $0x90] sm:$0xff] %v5215_v30  ;;  %5218 = vst [vmem:[%s7430_s19 + $0x98] sm:$0xff] %v5217_v3  ;;  %v5221_v35 = vld [vmem:[%s7434_s11 + $0xa8] sm:$0xff]  ;;  %v5223_v21 = vld [vmem:[%s7434_s11 + $0xb0] sm:$0xff] }
 0xaf9   : >> { %5220 = vst [vmem:[%s7430_s19 + $0xa0] sm:$0xff] %v5219_v33  ;;  %v5225_v39 = vld [vmem:[%s7434_s11 + $0xb8] sm:$0xff]  ;;  %s5232_s11 = scalar_lea.vmem %s10055_s10, %s5230_s13 [#allocation12]   ;;  %5222 = vst [vmem:[%s7430_s19 + $0xa8] sm:$0xff] %v5221_v35 }
 0xafa   : >> { %5224 = vst [vmem:[%s7430_s19 + $0xb0] sm:$0xff] %v5223_v21  ;;  %5226 = vst [vmem:[%s7430_s19 + $0xb8] sm:$0xff] %v5225_v39  ;;  %s10203_s19 = smov %s5233_s17 }
 0xafb PF: > { %s10205_s27 = sld [smem:[#allocation17_spill]]  ;;  %s10206_s20 = sld [smem:[#allocation18_spill]] }
 0xafc   : > { %s10207_s24 = smov %s7402_s25  ;;  %s10208_s25 = smov %s7406_s26 }
 0xb01   : > { %p20_p12 = scmp.ge.s32.totalorder %s10205_s27, 4   ;;  %s10209_s26 = smov %s10206_s20 }
 0xb03   :  { %22 = sbr.rel (!%p20_p12) target bundleno = 8 (0x8), region = 169 }
 0xb0a   :  { %5249 = vsyncpa [#allocation3], 1 }
 0xb0b   :  { %5251 = vsyncpa [#allocation3 + $0x1], 1 }
 0xb0c   :  { %5252 = vsyncpa [#allocation5], 1 }
 0xb0d   :  { %5253 = vsyncpa [#allocation8], 1 }
 0xb0e   :  { %5254 = vsyncpa [#allocation11], 1 }

</bundles_post_ra>
